<compile_context>
chip_gen: v5e
topology: v5e:2x2
jax: 0.10.0
libtpu: 0.0.40
codegen_flags: <defaults>
</compile_context>

<pallas_src>
from functools import partial
import math

import jax
import jax.numpy as jnp
from jax.experimental import pallas as pl
from jax.experimental.pallas import tpu as pltpu


def _round_up(x, m):
    return ((x + m - 1) // m) * m


def _padded_channels(c):
    # Lane-dense (multiple-of-128) padding only pays once channels reach 128;
    # for tiny channel counts it would just be wasted MXU work / store traffic.
    return c if c <= 128 else _round_up(c, 128)


def _vmem_limit(need_bytes):
    """Right-size the compiler VMEM budget from the actual tile sizes."""
    try:
        cap = int(pltpu.get_tpu_info().vmem_capacity_bytes)
    except Exception:  # conservative fallback (v7x: 64 MiB per TensorCore)
        cap = 64 << 20
    hi = max(int(cap * 3 / 4), 32 << 20)
    return int(min(max(2 * int(need_bytes) + (2 << 20), 32 << 20), hi))


# ---------------------------------------------------------------------------
# Fused 3x3x3 conv kernel: per-(batch, out-depth) plane, tap accumulation.
# ---------------------------------------------------------------------------
def _conv3x3_kernel(*refs, s, ho, wo, apply_relu, has_residual):
    """Grid (B, Dout, 3).  kd (innermost) walks the 3 depth taps; the 9
    in-plane (kh, kw) taps are unrolled here and accumulated into an f32 VMEM
    scratch.  Bias (+ residual) + ReLU are fused into the kd == 2 step."""
    if has_residual:
        x_ref, w_ref, b_ref, r_ref, o_ref, acc_ref = refs
    else:
        x_ref, w_ref, b_ref, o_ref, acc_ref = refs
        r_ref = None

    kd = pl.program_id(2)

    @pl.when(kd == 0)
    def _init():
        acc_ref[...] = jnp.zeros_like(acc_ref)

    cin = x_ref.shape[-1]
    acc = acc_ref[...]
    for kh in range(3):
        for kw in range(3):
            g = (kh % s) * s + (kw % s)            # stride-phase group (0 if s == 1)
            patch = x_ref[g, kh // s:kh // s + ho, kw // s:kw // s + wo, :]
            w_tap = w_ref[kd * 9 + kh * 3 + kw]    # (cin, cp), VMEM-resident
            acc = acc + jnp.dot(patch.reshape(ho * wo, cin), w_tap,
                                preferred_element_type=jnp.float32)
    acc_ref[...] = acc

    @pl.when(kd == 2)
    def _finalize():
        y = acc_ref[...] + b_ref[...]
        if has_residual:
            y = y + r_ref[...].reshape(ho * wo, -1).astype(jnp.float32)
        if apply_relu:
            y = jnp.maximum(y, 0.0)
        o_ref[...] = y.reshape(o_ref.shape).astype(o_ref.dtype)


def conv3x3_replicate(x, w, b, stride, *, apply_relu, residual=None,
                      out_dtype=jnp.bfloat16):
    """3x3x3 conv, replicate padding 1, stride s, channels-last, with fused
    bias [+ residual] [+ ReLU].  x: (B, D, H, W, C) -> (B, Do, Ho, Wo, cp)."""
    x = x.astype(jnp.bfloat16)
    B, D, H, W, C = x.shape
    kcin, cout = w.shape[3], w.shape[4]
    s = int(stride)
    Do, Ho, Wo = (D - 1) // s + 1, (H - 1) // s + 1, (W - 1) // s + 1
    cp = _padded_channels(cout)

    # Tap-major weights padded to (carried Cin, cp); padded rows/cols are zero
    # so the carried channel-padded layout stays inert.  Bias kept in f32.
    wf = jnp.pad(w.reshape(27, kcin, cout),
                 ((0, 0), (0, C - kcin), (0, cp - cout))).astype(jnp.bfloat16)
    bf = jnp.pad(b, (0, cp - cout)).reshape(1, cp).astype(jnp.float32)

    # Replicate-pad once (bf16).  For strided convs, fold the stride phases
    # into a small leading "group" axis so every in-kernel tap is a static,
    # contiguous slice (no strided VMEM reads).
    xp = jnp.pad(x, ((0, 0), (1, 1), (1, 1), (1, 1), (0, 0)), mode="edge")
    if s == 1:
        Hs, Ws = H + 2, W + 2
        xin = xp.reshape(B, D + 2, 1, Hs, Ws, C)
    else:
        Hs = max(Ho + 1, -(-(H + 2) // s))
        Ws = max(Wo + 1, -(-(W + 2) // s))
        xp = jnp.pad(xp, ((0, 0), (0, 0), (0, s * Hs - (H + 2)),
                          (0, s * Ws - (W + 2)), (0, 0)))
        xin = xp.reshape(B, D + 2, Hs, s, Ws, s, C)
        xin = xin.transpose(0, 1, 3, 5, 2, 4, 6).reshape(B, D + 2, s * s, Hs, Ws, C)

    x_spec = pl.BlockSpec((None, None, s * s, Hs, Ws, C),
                          lambda bb, dd, kk: (bb, s * dd + kk, 0, 0, 0, 0))
    w_spec = pl.BlockSpec((27, C, cp), lambda bb, dd, kk: (0, 0, 0))
    b_spec = pl.BlockSpec((1, cp), lambda bb, dd, kk: (0, 0))
    o_spec = pl.BlockSpec((None, None, Ho, Wo, cp),
                          lambda bb, dd, kk: (bb, dd, 0, 0, 0))

    in_specs = [x_spec, w_spec, b_spec]
    args = [xin, wf, bf]
    has_res = residual is not None
    if has_res:
        in_specs.append(pl.BlockSpec((None, None, Ho, Wo, cp),
                                     lambda bb, dd, kk: (bb, dd, 0, 0, 0)))
        args.append(residual.astype(jnp.bfloat16))

    out_bytes = jnp.dtype(out_dtype).itemsize
    need = (2 * s * s * Hs * Ws * C * 2            # x slab, double-buffered
            + 27 * C * cp * 2 + cp * 4             # resident weights + bias
            + (2 * Ho * Wo * cp * 2 if has_res else 0)
            + 2 * Ho * Wo * cp * out_bytes         # output block
            + Ho * Wo * cp * 4)                    # f32 accumulator
    flops = 2 * B * Do * Ho * Wo * 27 * C * cp
    bytes_accessed = (B * Do * 3 * s * s * Hs * Ws * C * 2
                      + 27 * C * cp * 2
                      + B * Do * Ho * Wo * cp * (out_bytes + (2 if has_res else 0)))

    kernel = partial(_conv3x3_kernel, s=s, ho=Ho, wo=Wo,
                     apply_relu=apply_relu, has_residual=has_res)
    return pl.pallas_call(
        kernel,
        out_shape=jax.ShapeDtypeStruct((B, Do, Ho, Wo, cp), out_dtype),
        grid=(B, Do, 3),
        in_specs=in_specs,
        out_specs=o_spec,
        scratch_shapes=[pltpu.VMEM((Ho * Wo, cp), jnp.float32)],
        compiler_params=pltpu.CompilerParams(
            dimension_semantics=("parallel", "parallel", "arbitrary"),
            vmem_limit_bytes=_vmem_limit(need)),
        cost_estimate=pl.CostEstimate(flops=flops, transcendentals=0,
                                      bytes_accessed=bytes_accessed),
    )(*args)


# ---------------------------------------------------------------------------
# 1x1x1 strided projection for the residual path (no activation).
# ---------------------------------------------------------------------------
def _proj1x1_kernel(x_ref, w_ref, b_ref, o_ref, *, ho, wo):
    cin = x_ref.shape[-1]
    y = jnp.dot(x_ref[...].reshape(ho * wo, cin), w_ref[...],
                preferred_element_type=jnp.float32) + b_ref[...]
    o_ref[...] = y.reshape(o_ref.shape).astype(o_ref.dtype)


def conv1x1_proj(x, w, b, stride, out_dtype=jnp.bfloat16):
    x = x.astype(jnp.bfloat16)
    kcin, cout = w.shape
    cp = _padded_channels(cout)
    s = int(stride)
    xs = x[:, ::s, ::s, ::s, :]                    # (B, Do, Ho, Wo, C)
    B, Do, Ho, Wo, C = xs.shape
    wp = jnp.pad(w, ((0, C - kcin), (0, cp - cout))).astype(jnp.bfloat16)
    bp = jnp.pad(b, (0, cp - cout)).reshape(1, cp).astype(jnp.float32)
    need = 2 * Ho * Wo * C * 2 + C * cp * 2 + cp * 4 + 2 * Ho * Wo * cp * 2
    return pl.pallas_call(
        partial(_proj1x1_kernel, ho=Ho, wo=Wo),
        out_shape=jax.ShapeDtypeStruct((B, Do, Ho, Wo, cp), out_dtype),
        grid=(B, Do),
        in_specs=[pl.BlockSpec((None, None, Ho, Wo, C),
                               lambda bb, dd: (bb, dd, 0, 0, 0)),
                  pl.BlockSpec((C, cp), lambda bb, dd: (0, 0)),
                  pl.BlockSpec((1, cp), lambda bb, dd: (0, 0))],
        out_specs=pl.BlockSpec((None, None, Ho, Wo, cp),
                               lambda bb, dd: (bb, dd, 0, 0, 0)),
        compiler_params=pltpu.CompilerParams(
            dimension_semantics=("parallel", "parallel"),
            vmem_limit_bytes=_vmem_limit(need)),
        cost_estimate=pl.CostEstimate(
            flops=2 * B * Do * Ho * Wo * C * cp, transcendentals=0,
            bytes_accessed=B * Do * Ho * Wo * (C + cp) * 2 + C * cp * 2),
    )(xs, wp, bp)


# ---------------------------------------------------------------------------
# ResConv3d / ResBlock3d forward (norm='none' -> Identity, actv='relu')
# ---------------------------------------------------------------------------
def res_conv3d(x, p, stride):
    cout = p["w1"].shape[-1]
    cp = _padded_channels(cout)
    # dx = relu(conv1(x))
    dx = conv3x3_replicate(x, p["w1"], p["b1"], stride, apply_relu=True)
    # residual path
    if "wr" in p:
        res = conv1x1_proj(x, p["wr"], p["br"], stride)
    else:
        res = x
        if res.shape[-1] != cp:   # unpadded block input feeding an identity skip
            res = jnp.pad(res, ((0, 0),) * 4 + ((0, cp - res.shape[-1]),))
    # out = relu(res + conv2(dx) + b2), fused in one kernel
    return conv3x3_replicate(dx, p["w2"], p["b2"], 1, apply_relu=True, residual=res)


def res_block3d_forward(x_ncdhw, params, stride):
    x = jnp.transpose(x_ncdhw, (0, 2, 3, 4, 1)).astype(jnp.bfloat16)  # NCDHW->NDHWC once
    s = stride
    for p in params:
        x = res_conv3d(x, p, s)
        s = 1
    plane = params[-1]["w1"].shape[-1]
    x = x[..., :plane]                               # drop carried channel padding (no-op if none)
    return jnp.transpose(x, (0, 4, 1, 2, 3)).astype(jnp.float32)


# ---------------------------------------------------------------------------
# Pure-JAX f32 reference (for sanity check)
# ---------------------------------------------------------------------------
def _conv3d_ref(x, w, b, stride):
    xp = jnp.pad(x, ((0, 0), (1, 1), (1, 1), (1, 1), (0, 0)), mode="edge")
    y = jax.lax.conv_general_dilated(
        xp, w, window_strides=(stride,) * 3, padding="VALID",
        dimension_numbers=("NDHWC", "DHWIO", "NDHWC"))
    return y + b


def res_block3d_reference(x_ncdhw, params, stride):
    x = jnp.transpose(x_ncdhw, (0, 2, 3, 4, 1))
    s = stride
    for p in params:
        cin = x.shape[-1]
        cout = p["w1"].shape[-1]
        dx = jnp.maximum(_conv3d_ref(x, p["w1"], p["b1"], s), 0.0)
        dx = _conv3d_ref(dx, p["w2"], p["b2"], 1)
        if s > 1 or cin != cout:
            res = x[:, ::s, ::s, ::s, :] @ p["wr"] + p["br"]
        else:
            res = x
        x = jnp.maximum(res + dx, 0.0)
        s = 1
    return jnp.transpose(x, (0, 4, 1, 2, 3))


# ---------------------------------------------------------------------------
def make_params(key, in_plane, plane, stride, n_layers):
    params = []
    cin, s = in_plane, stride
    layer_keys = jax.random.split(key, n_layers)
    for i in range(n_layers):
        k = jax.random.split(layer_keys[i], 6)
        lim1 = 1.0 / math.sqrt(cin * 27)
        lim2 = 1.0 / math.sqrt(plane * 27)
        p = {
            "w1": jax.random.uniform(k[0], (3, 3, 3, cin, plane), jnp.float32, -lim1, lim1),
            "b1": jax.random.uniform(k[1], (plane,), jnp.float32, -lim1, lim1),
            "w2": jax.random.uniform(k[2], (3, 3, 3, plane, plane), jnp.float32, -lim2, lim2),
            "b2": jax.random.uniform(k[3], (plane,), jnp.float32, -lim2, lim2),
        }
        if s > 1 or cin != plane:
            limr = 1.0 / math.sqrt(cin)
            p["wr"] = jax.random.uniform(k[4], (cin, plane), jnp.float32, -limr, limr)
            p["br"] = jax.random.uniform(k[5], (plane,), jnp.float32, -limr, limr)
        params.append(p)
        cin, s = plane, 1
    return params


if __name__ == "__main__":
    B, CIN, PLANE = 2, 4, 8
    D, H, W = 8, 16, 16
    STRIDE, N_LAYERS = 2, 2

    key = jax.random.PRNGKey(0)
    kx, kp = jax.random.split(key)
    x = jax.random.normal(kx, (B, CIN, D, H, W), jnp.float32)
    params = make_params(kp, CIN, PLANE, STRIDE, N_LAYERS)

    fwd = jax.jit(partial(res_block3d_forward, stride=STRIDE))
    out = jax.block_until_ready(fwd(x, params))

    ref_fn = jax.jit(partial(res_block3d_reference, stride=STRIDE))
    ref = jax.block_until_ready(ref_fn(x, params))

    expected_shape = (B, PLANE, D // STRIDE, H // STRIDE, W // STRIDE)
    assert out.shape == expected_shape and ref.shape == expected_shape
    assert bool(jnp.all(jnp.isfinite(out)))
    # bf16 MXU inputs / bf16 intermediates -> loose tolerance vs f32 reference
    rel_err = float(jnp.max(jnp.abs(out - ref)) / (jnp.max(jnp.abs(ref)) + 1e-6))
    assert rel_err < 5e-2, f"mismatch vs reference: rel err {rel_err}"

    print("KERNEL_OK")
</pallas_src>

<mosaic_0001>
module attributes {stable_mosaic.version = 11 : i64} {
  func.func @_proj1x1_kernel(%arg0: i32, %arg1: i32, %arg2: memref<1x1x8x8x4xbf16, #tpu.memory_space<vmem>>, %arg3: memref<4x8xbf16, #tpu.memory_space<vmem>>, %arg4: memref<1x8xf32, #tpu.memory_space<vmem>>, %arg5: memref<1x1x8x8x8xbf16, #tpu.memory_space<vmem>>) attributes {dimension_semantics = [#tpu.dimension_semantics<parallel>, #tpu.dimension_semantics<parallel>], iteration_bounds = array<i64: 2, 4>, scalar_prefetch = 0 : i64, scratch_operands = 0 : i64, tpu.core_type = #tpu.core_type<tc>, window_params = [{transform_indices = @transform_0, window_bounds = array<i64: 1, 1, 8, 8, 4>}, {pipeline_mode = #tpu.pipeline_mode<synchronous>, transform_indices = @transform_1, window_bounds = array<i64: 4, 8>}, {pipeline_mode = #tpu.pipeline_mode<synchronous>, transform_indices = @transform_2, window_bounds = array<i64: 1, 8>}, {transform_indices = @transform_3, window_bounds = array<i64: 1, 1, 8, 8, 8>}]} {
    %c0 = arith.constant 0 : index
    %c0_0 = arith.constant 0 : index
    %c0_1 = arith.constant 0 : index
    %c0_2 = arith.constant 0 : index
    %c0_3 = arith.constant 0 : index
    %0 = vector.load %arg2[%c0, %c0_0, %c0_1, %c0_2, %c0_3] : memref<1x1x8x8x4xbf16, #tpu.memory_space<vmem>>, vector<1x1x8x8x4xbf16>
    %1 = vector.shape_cast %0 : vector<1x1x8x8x4xbf16> to vector<8x8x4xbf16>
    %2 = vector.shape_cast %1 : vector<8x8x4xbf16> to vector<64x4xbf16>
    %c0_4 = arith.constant 0 : index
    %c0_5 = arith.constant 0 : index
    %3 = vector.load %arg3[%c0_4, %c0_5] : memref<4x8xbf16, #tpu.memory_space<vmem>>, vector<4x8xbf16>
    %cst = arith.constant dense<0.000000e+00> : vector<64x8xf32>
    %4 = tpu.matmul %2, %3, %cst {dimension_numbers = #tpu.dot_dimension_numbers<[1], [0], [0], [1], [0, 0, 1, 1], [], []>} : vector<64x4xbf16>, vector<4x8xbf16>, vector<64x8xf32> -> vector<64x8xf32>
    %c0_6 = arith.constant 0 : index
    %c0_7 = arith.constant 0 : index
    %5 = vector.load %arg4[%c0_6, %c0_7] : memref<1x8xf32, #tpu.memory_space<vmem>>, vector<1x8xf32>
    %6 = vector.broadcast %5 : vector<1x8xf32> to vector<64x8xf32>
    %7 = arith.addf %4, %6 : vector<64x8xf32>
    %8 = vector.shape_cast %7 : vector<64x8xf32> to vector<8x8x8xf32>
    %9 = arith.truncf %8 : vector<8x8x8xf32> to vector<8x8x8xbf16>
    %c0_8 = arith.constant 0 : index
    %c0_9 = arith.constant 0 : index
    %c0_10 = arith.constant 0 : index
    %c0_11 = arith.constant 0 : index
    %c0_12 = arith.constant 0 : index
    %10 = vector.load %arg5[%c0_8, %c0_9, %c0_10, %c0_11, %c0_12] : memref<1x1x8x8x8xbf16, #tpu.memory_space<vmem>>, vector<1x1x8x8x8xbf16>
    %11 = vector.shape_cast %10 : vector<1x1x8x8x8xbf16> to vector<8x8x8xbf16>
    %12 = vector.shape_cast %9 : vector<8x8x8xbf16> to vector<1x1x8x8x8xbf16>
    tpu.vector_store %arg5[%c0_8, %c0_9, %c0_10, %c0_11, %c0_12], %12 {strides = array<i32>} : memref<1x1x8x8x8xbf16, #tpu.memory_space<vmem>>, vector<1x1x8x8x8xbf16>,
    return
  }
  func.func @transform_0(%arg0: i32, %arg1: i32) -> (i32, i32, i32, i32, i32) {
    %c0_i32 = arith.constant 0 : i32
    %c0_i32_0 = arith.constant 0 : i32
    %c0_i32_1 = arith.constant 0 : i32
    %c0_i32_2 = arith.constant 0 : i32
    return %arg0, %arg1, %c0_i32, %c0_i32_0, %c0_i32_1 : i32, i32, i32, i32, i32
  }
  func.func @transform_1(%arg0: i32, %arg1: i32) -> (i32, i32) {
    %c0_i32 = arith.constant 0 : i32
    %c0_i32_0 = arith.constant 0 : i32
    %c0_i32_1 = arith.constant 0 : i32
    return %c0_i32, %c0_i32_0 : i32, i32
  }
  func.func @transform_2(%arg0: i32, %arg1: i32) -> (i32, i32) {
    %c0_i32 = arith.constant 0 : i32
    %c0_i32_0 = arith.constant 0 : i32
    %c0_i32_1 = arith.constant 0 : i32
    return %c0_i32, %c0_i32_0 : i32, i32
  }
  func.func @transform_3(%arg0: i32, %arg1: i32) -> (i32, i32, i32, i32, i32) {
    %c0_i32 = arith.constant 0 : i32
    %c0_i32_0 = arith.constant 0 : i32
    %c0_i32_1 = arith.constant 0 : i32
    %c0_i32_2 = arith.constant 0 : i32
    return %arg0, %arg1, %c0_i32, %c0_i32_0, %c0_i32_1 : i32, i32, i32, i32, i32
  }
}

module attributes {stable_mosaic.version = 11 : i64} {
  func.func @_conv3x3_kernel(%arg0: i32, %arg1: i32, %arg2: i32, %arg3: memref<1x1x4x9x9x4xbf16, #tpu.memory_space<vmem>>, %arg4: memref<27x4x8xbf16, #tpu.memory_space<vmem>>, %arg5: memref<1x8xf32, #tpu.memory_space<vmem>>, %arg6: memref<1x1x8x8x8xbf16, #tpu.memory_space<vmem>>, %arg7: memref<64x8xf32, #tpu.memory_space<vmem>>) attributes {dimension_semantics = [#tpu.dimension_semantics<parallel>, #tpu.dimension_semantics<parallel>, #tpu.dimension_semantics<arbitrary>], iteration_bounds = array<i64: 2, 4, 3>, scalar_prefetch = 0 : i64, scratch_operands = 1 : i64, tpu.core_type = #tpu.core_type<tc>, window_params = [{transform_indices = @transform_0, window_bounds = array<i64: 1, 1, 4, 9, 9, 4>}, {pipeline_mode = #tpu.pipeline_mode<synchronous>, transform_indices = @transform_1, window_bounds = array<i64: 27, 4, 8>}, {pipeline_mode = #tpu.pipeline_mode<synchronous>, transform_indices = @transform_2, window_bounds = array<i64: 1, 8>}, {transform_indices = @transform_3, window_bounds = array<i64: 1, 1, 8, 8, 8>}]} {
    %c0_i32 = arith.constant 0 : i32
    %0 = arith.cmpi eq, %arg2, %c0_i32 : i32
    %1 = arith.extui %0 : i1 to i32
    %c0_i32_0 = arith.constant 0 : i32
    %2 = arith.cmpi ne, %1, %c0_i32_0 : i32
    scf.if %2 {
      %cst_105 = arith.constant 0.000000e+00 : f32
      %107 = vector.broadcast %cst_105 : f32 to vector<64x8xf32>
      %c0_106 = arith.constant 0 : index
      %c0_107 = arith.constant 0 : index
      %108 = vector.load %arg7[%c0_106, %c0_107] : memref<64x8xf32, #tpu.memory_space<vmem>>, vector<64x8xf32>
      tpu.vector_store %arg7[%c0_106, %c0_107], %107 {strides = array<i32>} : memref<64x8xf32, #tpu.memory_space<vmem>>, vector<64x8xf32>,
    } else {
    }
    %c0 = arith.constant 0 : index
    %c0_1 = arith.constant 0 : index
    %3 = vector.load %arg7[%c0, %c0_1] : memref<64x8xf32, #tpu.memory_space<vmem>>, vector<64x8xf32>
    %c0_2 = arith.constant 0 : index
    %c0_3 = arith.constant 0 : index
    %c0_4 = arith.constant 0 : index
    %c0_5 = arith.constant 0 : index
    %c0_6 = arith.constant 0 : index
    %c0_7 = arith.constant 0 : index
    %4 = vector.load %arg3[%c0_2, %c0_3, %c0_4, %c0_5, %c0_6, %c0_7] : memref<1x1x4x9x9x4xbf16, #tpu.memory_space<vmem>>, vector<1x1x1x8x8x4xbf16>
    %5 = vector.shape_cast %4 : vector<1x1x1x8x8x4xbf16> to vector<8x8x4xbf16>
    %c9_i32 = arith.constant 9 : i32
    %6 = arith.muli %arg2, %c9_i32 : i32
    %c0_i32_8 = arith.constant 0 : i32
    %7 = arith.addi %6, %c0_i32_8 : i32
    %c0_i32_9 = arith.constant 0 : i32
    %8 = arith.addi %7, %c0_i32_9 : i32
    %9 = arith.index_cast %8 : i32 to index
    %c0_10 = arith.constant 0 : index
    %c0_11 = arith.constant 0 : index
    %10 = vector.load %arg4[%9, %c0_10, %c0_11] : memref<27x4x8xbf16, #tpu.memory_space<vmem>>, vector<1x4x8xbf16>
    %11 = vector.shape_cast %10 : vector<1x4x8xbf16> to vector<4x8xbf16>
    %12 = vector.shape_cast %5 : vector<8x8x4xbf16> to vector<64x4xbf16>
    %cst = arith.constant dense<0.000000e+00> : vector<64x8xf32>
    %13 = tpu.matmul %12, %11, %cst {dimension_numbers = #tpu.dot_dimension_numbers<[1], [0], [0], [1], [0, 0, 1, 1], [], []>} : vector<64x4xbf16>, vector<4x8xbf16>, vector<64x8xf32> -> vector<64x8xf32>
    %14 = arith.addf %3, %13 : vector<64x8xf32>
    %c0_12 = arith.constant 0 : index
    %c0_13 = arith.constant 0 : index
    %c1 = arith.constant 1 : index
    %c0_14 = arith.constant 0 : index
    %c0_15 = arith.constant 0 : index
    %c0_16 = arith.constant 0 : index
    %15 = vector.load %arg3[%c0_12, %c0_13, %c1, %c0_14, %c0_15, %c0_16] : memref<1x1x4x9x9x4xbf16, #tpu.memory_space<vmem>>, vector<1x1x1x8x8x4xbf16>
    %16 = vector.shape_cast %15 : vector<1x1x1x8x8x4xbf16> to vector<8x8x4xbf16>
    %c9_i32_17 = arith.constant 9 : i32
    %17 = arith.muli %arg2, %c9_i32_17 : i32
    %c0_i32_18 = arith.constant 0 : i32
    %18 = arith.addi %17, %c0_i32_18 : i32
    %c1_i32 = arith.constant 1 : i32
    %19 = arith.addi %18, %c1_i32 : i32
    %20 = arith.index_cast %19 : i32 to index
    %c0_19 = arith.constant 0 : index
    %c0_20 = arith.constant 0 : index
    %21 = vector.load %arg4[%20, %c0_19, %c0_20] : memref<27x4x8xbf16, #tpu.memory_space<vmem>>, vector<1x4x8xbf16>
    %22 = vector.shape_cast %21 : vector<1x4x8xbf16> to vector<4x8xbf16>
    %23 = vector.shape_cast %16 : vector<8x8x4xbf16> to vector<64x4xbf16>
    %cst_21 = arith.constant dense<0.000000e+00> : vector<64x8xf32>
    %24 = tpu.matmul %23, %22, %cst_21 {dimension_numbers = #tpu.dot_dimension_numbers<[1], [0], [0], [1], [0, 0, 1, 1], [], []>} : vector<64x4xbf16>, vector<4x8xbf16>, vector<64x8xf32> -> vector<64x8xf32>
    %25 = arith.addf %14, %24 : vector<64x8xf32>
    %c0_22 = arith.constant 0 : index
    %c0_23 = arith.constant 0 : index
    %c0_24 = arith.constant 0 : index
    %c0_25 = arith.constant 0 : index
    %c1_26 = arith.constant 1 : index
    %c0_27 = arith.constant 0 : index
    %26 = vector.load %arg3[%c0_22, %c0_23, %c0_24, %c0_25, %c1_26, %c0_27] : memref<1x1x4x9x9x4xbf16, #tpu.memory_space<vmem>>, vector<1x1x1x8x8x4xbf16>
    %27 = vector.shape_cast %26 : vector<1x1x1x8x8x4xbf16> to vector<8x8x4xbf16>
    %c9_i32_28 = arith.constant 9 : i32
    %28 = arith.muli %arg2, %c9_i32_28 : i32
    %c0_i32_29 = arith.constant 0 : i32
    %29 = arith.addi %28, %c0_i32_29 : i32
    %c2_i32 = arith.constant 2 : i32
    %30 = arith.addi %29, %c2_i32 : i32
    %31 = arith.index_cast %30 : i32 to index
    %c0_30 = arith.constant 0 : index
    %c0_31 = arith.constant 0 : index
    %32 = vector.load %arg4[%31, %c0_30, %c0_31] : memref<27x4x8xbf16, #tpu.memory_space<vmem>>, vector<1x4x8xbf16>
    %33 = vector.shape_cast %32 : vector<1x4x8xbf16> to vector<4x8xbf16>
    %34 = vector.shape_cast %27 : vector<8x8x4xbf16> to vector<64x4xbf16>
    %cst_32 = arith.constant dense<0.000000e+00> : vector<64x8xf32>
    %35 = tpu.matmul %34, %33, %cst_32 {dimension_numbers = #tpu.dot_dimension_numbers<[1], [0], [0], [1], [0, 0, 1, 1], [], []>} : vector<64x4xbf16>, vector<4x8xbf16>, vector<64x8xf32> -> vector<64x8xf32>
    %36 = arith.addf %25, %35 : vector<64x8xf32>
    %c0_33 = arith.constant 0 : index
    %c0_34 = arith.constant 0 : index
    %c2 = arith.constant 2 : index
    %c0_35 = arith.constant 0 : index
    %c0_36 = arith.constant 0 : index
    %c0_37 = arith.constant 0 : index
    %37 = vector.load %arg3[%c0_33, %c0_34, %c2, %c0_35, %c0_36, %c0_37] : memref<1x1x4x9x9x4xbf16, #tpu.memory_space<vmem>>, vector<1x1x1x8x8x4xbf16>
    %38 = vector.shape_cast %37 : vector<1x1x1x8x8x4xbf16> to vector<8x8x4xbf16>
    %c9_i32_38 = arith.constant 9 : i32
    %39 = arith.muli %arg2, %c9_i32_38 : i32
    %c3_i32 = arith.constant 3 : i32
    %40 = arith.addi %39, %c3_i32 : i32
    %c0_i32_39 = arith.constant 0 : i32
    %41 = arith.addi %40, %c0_i32_39 : i32
    %42 = arith.index_cast %41 : i32 to index
    %c0_40 = arith.constant 0 : index
    %c0_41 = arith.constant 0 : index
    %43 = vector.load %arg4[%42, %c0_40, %c0_41] : memref<27x4x8xbf16, #tpu.memory_space<vmem>>, vector<1x4x8xbf16>
    %44 = vector.shape_cast %43 : vector<1x4x8xbf16> to vector<4x8xbf16>
    %45 = vector.shape_cast %38 : vector<8x8x4xbf16> to vector<64x4xbf16>
    %cst_42 = arith.constant dense<0.000000e+00> : vector<64x8xf32>
    %46 = tpu.matmul %45, %44, %cst_42 {dimension_numbers = #tpu.dot_dimension_numbers<[1], [0], [0], [1], [0, 0, 1, 1], [], []>} : vector<64x4xbf16>, vector<4x8xbf16>, vector<64x8xf32> -> vector<64x8xf32>
    %47 = arith.addf %36, %46 : vector<64x8xf32>
    %c0_43 = arith.constant 0 : index
    %c0_44 = arith.constant 0 : index
    %c3 = arith.constant 3 : index
    %c0_45 = arith.constant 0 : index
    %c0_46 = arith.constant 0 : index
    %c0_47 = arith.constant 0 : index
    %48 = vector.load %arg3[%c0_43, %c0_44, %c3, %c0_45, %c0_46, %c0_47] : memref<1x1x4x9x9x4xbf16, #tpu.memory_space<vmem>>, vector<1x1x1x8x8x4xbf16>
    %49 = vector.shape_cast %48 : vector<1x1x1x8x8x4xbf16> to vector<8x8x4xbf16>
    %c9_i32_48 = arith.constant 9 : i32
    %50 = arith.muli %arg2, %c9_i32_48 : i32
    %c3_i32_49 = arith.constant 3 : i32
    %51 = arith.addi %50, %c3_i32_49 : i32
    %c1_i32_50 = arith.constant 1 : i32
    %52 = arith.addi %51, %c1_i32_50 : i32
    %53 = arith.index_cast %52 : i32 to index
    %c0_51 = arith.constant 0 : index
    %c0_52 = arith.constant 0 : index
    %54 = vector.load %arg4[%53, %c0_51, %c0_52] : memref<27x4x8xbf16, #tpu.memory_space<vmem>>, vector<1x4x8xbf16>
    %55 = vector.shape_cast %54 : vector<1x4x8xbf16> to vector<4x8xbf16>
    %56 = vector.shape_cast %49 : vector<8x8x4xbf16> to vector<64x4xbf16>
    %cst_53 = arith.constant dense<0.000000e+00> : vector<64x8xf32>
    %57 = tpu.matmul %56, %55, %cst_53 {dimension_numbers = #tpu.dot_dimension_numbers<[1], [0], [0], [1], [0, 0, 1, 1], [], []>} : vector<64x4xbf16>, vector<4x8xbf16>, vector<64x8xf32> -> vector<64x8xf32>
    %58 = arith.addf %47, %57 : vector<64x8xf32>
    %c0_54 = arith.constant 0 : index
    %c0_55 = arith.constant 0 : index
    %c2_56 = arith.constant 2 : index
    %c0_57 = arith.constant 0 : index
    %c1_58 = arith.constant 1 : index
    %c0_59 = arith.constant 0 : index
    %59 = vector.load %arg3[%c0_54, %c0_55, %c2_56, %c0_57, %c1_58, %c0_59] : memref<1x1x4x9x9x4xbf16, #tpu.memory_space<vmem>>, vector<1x1x1x8x8x4xbf16>
    %60 = vector.shape_cast %59 : vector<1x1x1x8x8x4xbf16> to vector<8x8x4xbf16>
    %c9_i32_60 = arith.constant 9 : i32
    %61 = arith.muli %arg2, %c9_i32_60 : i32
    %c3_i32_61 = arith.constant 3 : i32
    %62 = arith.addi %61, %c3_i32_61 : i32
    %c2_i32_62 = arith.constant 2 : i32
    %63 = arith.addi %62, %c2_i32_62 : i32
    %64 = arith.index_cast %63 : i32 to index
    %c0_63 = arith.constant 0 : index
    %c0_64 = arith.constant 0 : index
    %65 = vector.load %arg4[%64, %c0_63, %c0_64] : memref<27x4x8xbf16, #tpu.memory_space<vmem>>, vector<1x4x8xbf16>
    %66 = vector.shape_cast %65 : vector<1x4x8xbf16> to vector<4x8xbf16>
    %67 = vector.shape_cast %60 : vector<8x8x4xbf16> to vector<64x4xbf16>
    %cst_65 = arith.constant dense<0.000000e+00> : vector<64x8xf32>
    %68 = tpu.matmul %67, %66, %cst_65 {dimension_numbers = #tpu.dot_dimension_numbers<[1], [0], [0], [1], [0, 0, 1, 1], [], []>} : vector<64x4xbf16>, vector<4x8xbf16>, vector<64x8xf32> -> vector<64x8xf32>
    %69 = arith.addf %58, %68 : vector<64x8xf32>
    %c0_66 = arith.constant 0 : index
    %c0_67 = arith.constant 0 : index
    %c0_68 = arith.constant 0 : index
    %c1_69 = arith.constant 1 : index
    %c0_70 = arith.constant 0 : index
    %c0_71 = arith.constant 0 : index
    %70 = vector.load %arg3[%c0_66, %c0_67, %c0_68, %c1_69, %c0_70, %c0_71] : memref<1x1x4x9x9x4xbf16, #tpu.memory_space<vmem>>, vector<1x1x1x8x8x4xbf16>
    %71 = vector.shape_cast %70 : vector<1x1x1x8x8x4xbf16> to vector<8x8x4xbf16>
    %c9_i32_72 = arith.constant 9 : i32
    %72 = arith.muli %arg2, %c9_i32_72 : i32
    %c6_i32 = arith.constant 6 : i32
    %73 = arith.addi %72, %c6_i32 : i32
    %c0_i32_73 = arith.constant 0 : i32
    %74 = arith.addi %73, %c0_i32_73 : i32
    %75 = arith.index_cast %74 : i32 to index
    %c0_74 = arith.constant 0 : index
    %c0_75 = arith.constant 0 : index
    %76 = vector.load %arg4[%75, %c0_74, %c0_75] : memref<27x4x8xbf16, #tpu.memory_space<vmem>>, vector<1x4x8xbf16>
    %77 = vector.shape_cast %76 : vector<1x4x8xbf16> to vector<4x8xbf16>
    %78 = vector.shape_cast %71 : vector<8x8x4xbf16> to vector<64x4xbf16>
    %cst_76 = arith.constant dense<0.000000e+00> : vector<64x8xf32>
    %79 = tpu.matmul %78, %77, %cst_76 {dimension_numbers = #tpu.dot_dimension_numbers<[1], [0], [0], [1], [0, 0, 1, 1], [], []>} : vector<64x4xbf16>, vector<4x8xbf16>, vector<64x8xf32> -> vector<64x8xf32>
    %80 = arith.addf %69, %79 : vector<64x8xf32>
    %c0_77 = arith.constant 0 : index
    %c0_78 = arith.constant 0 : index
    %c1_79 = arith.constant 1 : index
    %c1_80 = arith.constant 1 : index
    %c0_81 = arith.constant 0 : index
    %c0_82 = arith.constant 0 : index
    %81 = vector.load %arg3[%c0_77, %c0_78, %c1_79, %c1_80, %c0_81, %c0_82] : memref<1x1x4x9x9x4xbf16, #tpu.memory_space<vmem>>, vector<1x1x1x8x8x4xbf16>
    %82 = vector.shape_cast %81 : vector<1x1x1x8x8x4xbf16> to vector<8x8x4xbf16>
    %c9_i32_83 = arith.constant 9 : i32
    %83 = arith.muli %arg2, %c9_i32_83 : i32
    %c6_i32_84 = arith.constant 6 : i32
    %84 = arith.addi %83, %c6_i32_84 : i32
    %c1_i32_85 = arith.constant 1 : i32
    %85 = arith.addi %84, %c1_i32_85 : i32
    %86 = arith.index_cast %85 : i32 to index
    %c0_86 = arith.constant 0 : index
    %c0_87 = arith.constant 0 : index
    %87 = vector.load %arg4[%86, %c0_86, %c0_87] : memref<27x4x8xbf16, #tpu.memory_space<vmem>>, vector<1x4x8xbf16>
    %88 = vector.shape_cast %87 : vector<1x4x8xbf16> to vector<4x8xbf16>
    %89 = vector.shape_cast %82 : vector<8x8x4xbf16> to vector<64x4xbf16>
    %cst_88 = arith.constant dense<0.000000e+00> : vector<64x8xf32>
    %90 = tpu.matmul %89, %88, %cst_88 {dimension_numbers = #tpu.dot_dimension_numbers<[1], [0], [0], [1], [0, 0, 1, 1], [], []>} : vector<64x4xbf16>, vector<4x8xbf16>, vector<64x8xf32> -> vector<64x8xf32>
    %91 = arith.addf %80, %90 : vector<64x8xf32>
    %c0_89 = arith.constant 0 : index
    %c0_90 = arith.constant 0 : index
    %c0_91 = arith.constant 0 : index
    %c1_92 = arith.constant 1 : index
    %c1_93 = arith.constant 1 : index
    %c0_94 = arith.constant 0 : index
    %92 = vector.load %arg3[%c0_89, %c0_90, %c0_91, %c1_92, %c1_93, %c0_94] : memref<1x1x4x9x9x4xbf16, #tpu.memory_space<vmem>>, vector<1x1x1x8x8x4xbf16>
    %93 = vector.shape_cast %92 : vector<1x1x1x8x8x4xbf16> to vector<8x8x4xbf16>
    %c9_i32_95 = arith.constant 9 : i32
    %94 = arith.muli %arg2, %c9_i32_95 : i32
    %c6_i32_96 = arith.constant 6 : i32
    %95 = arith.addi %94, %c6_i32_96 : i32
    %c2_i32_97 = arith.constant 2 : i32
    %96 = arith.addi %95, %c2_i32_97 : i32
    %97 = arith.index_cast %96 : i32 to index
    %c0_98 = arith.constant 0 : index
    %c0_99 = arith.constant 0 : index
    %98 = vector.load %arg4[%97, %c0_98, %c0_99] : memref<27x4x8xbf16, #tpu.memory_space<vmem>>, vector<1x4x8xbf16>
    %99 = vector.shape_cast %98 : vector<1x4x8xbf16> to vector<4x8xbf16>
    %100 = vector.shape_cast %93 : vector<8x8x4xbf16> to vector<64x4xbf16>
    %cst_100 = arith.constant dense<0.000000e+00> : vector<64x8xf32>
    %101 = tpu.matmul %100, %99, %cst_100 {dimension_numbers = #tpu.dot_dimension_numbers<[1], [0], [0], [1], [0, 0, 1, 1], [], []>} : vector<64x4xbf16>, vector<4x8xbf16>, vector<64x8xf32> -> vector<64x8xf32>
    %102 = arith.addf %91, %101 : vector<64x8xf32>
    %c0_101 = arith.constant 0 : index
    %c0_102 = arith.constant 0 : index
    %103 = vector.load %arg7[%c0_101, %c0_102] : memref<64x8xf32, #tpu.memory_space<vmem>>, vector<64x8xf32>
    tpu.vector_store %arg7[%c0_101, %c0_102], %102 {strides = array<i32>} : memref<64x8xf32, #tpu.memory_space<vmem>>, vector<64x8xf32>,
    %c2_i32_103 = arith.constant 2 : i32
    %104 = arith.cmpi eq, %arg2, %c2_i32_103 : i32
    %105 = arith.extui %104 : i1 to i32
    %c0_i32_104 = arith.constant 0 : i32
    %106 = arith.cmpi ne, %105, %c0_i32_104 : i32
    scf.if %106 {
      %c0_105 = arith.constant 0 : index
      %c0_106 = arith.constant 0 : index
      %107 = vector.load %arg7[%c0_105, %c0_106] : memref<64x8xf32, #tpu.memory_space<vmem>>, vector<64x8xf32>
      %c0_107 = arith.constant 0 : index
      %c0_108 = arith.constant 0 : index
      %108 = vector.load %arg5[%c0_107, %c0_108] : memref<1x8xf32, #tpu.memory_space<vmem>>, vector<1x8xf32>
      %109 = vector.broadcast %108 : vector<1x8xf32> to vector<64x8xf32>
      %110 = arith.addf %107, %109 : vector<64x8xf32>
      %cst_109 = arith.constant 0.000000e+00 : f32
      %111 = vector.broadcast %cst_109 : f32 to vector<64x8xf32>
      %112 = arith.maximumf %110, %111 : vector<64x8xf32>
      %113 = vector.shape_cast %112 : vector<64x8xf32> to vector<8x8x8xf32>
      %114 = arith.truncf %113 : vector<8x8x8xf32> to vector<8x8x8xbf16>
      %c0_110 = arith.constant 0 : index
      %c0_111 = arith.constant 0 : index
      %c0_112 = arith.constant 0 : index
      %c0_113 = arith.constant 0 : index
      %c0_114 = arith.constant 0 : index
      %115 = vector.load %arg6[%c0_110, %c0_111, %c0_112, %c0_113, %c0_114] : memref<1x1x8x8x8xbf16, #tpu.memory_space<vmem>>, vector<1x1x8x8x8xbf16>
      %116 = vector.shape_cast %115 : vector<1x1x8x8x8xbf16> to vector<8x8x8xbf16>
      %117 = vector.shape_cast %114 : vector<8x8x8xbf16> to vector<1x1x8x8x8xbf16>
      tpu.vector_store %arg6[%c0_110, %c0_111, %c0_112, %c0_113, %c0_114], %117 {strides = array<i32>} : memref<1x1x8x8x8xbf16, #tpu.memory_space<vmem>>, vector<1x1x8x8x8xbf16>,
    } else {
    }
    return
  }
  func.func @transform_0(%arg0: i32, %arg1: i32, %arg2: i32) -> (i32, i32, i32, i32, i32, i32) {
    %c2_i32 = arith.constant 2 : i32
    %0 = arith.muli %c2_i32, %arg1 : i32
    %1 = arith.addi %0, %arg2 : i32
    %c0_i32 = arith.constant 0 : i32
    %c0_i32_0 = arith.constant 0 : i32
    %c0_i32_1 = arith.constant 0 : i32
    %c0_i32_2 = arith.constant 0 : i32
    %c0_i32_3 = arith.constant 0 : i32
    return %arg0, %1, %c0_i32, %c0_i32_0, %c0_i32_1, %c0_i32_2 : i32, i32, i32, i32, i32, i32
  }
  func.func @transform_1(%arg0: i32, %arg1: i32, %arg2: i32) -> (i32, i32, i32) {
    %c0_i32 = arith.constant 0 : i32
    %c0_i32_0 = arith.constant 0 : i32
    %c0_i32_1 = arith.constant 0 : i32
    %c0_i32_2 = arith.constant 0 : i32
    return %c0_i32, %c0_i32_0, %c0_i32_1 : i32, i32, i32
  }
  func.func @transform_2(%arg0: i32, %arg1: i32, %arg2: i32) -> (i32, i32) {
    %c0_i32 = arith.constant 0 : i32
    %c0_i32_0 = arith.constant 0 : i32
    %c0_i32_1 = arith.constant 0 : i32
    return %c0_i32, %c0_i32_0 : i32, i32
  }
  func.func @transform_3(%arg0: i32, %arg1: i32, %arg2: i32) -> (i32, i32, i32, i32, i32) {
    %c0_i32 = arith.constant 0 : i32
    %c0_i32_0 = arith.constant 0 : i32
    %c0_i32_1 = arith.constant 0 : i32
    %c0_i32_2 = arith.constant 0 : i32
    return %arg0, %arg1, %c0_i32, %c0_i32_0, %c0_i32_1 : i32, i32, i32, i32, i32
  }
}

module attributes {stable_mosaic.version = 11 : i64} {
  func.func @_conv3x3_kernel(%arg0: i32, %arg1: i32, %arg2: i32, %arg3: memref<1x1x1x10x10x8xbf16, #tpu.memory_space<vmem>>, %arg4: memref<27x8x8xbf16, #tpu.memory_space<vmem>>, %arg5: memref<1x8xf32, #tpu.memory_space<vmem>>, %arg6: memref<1x1x8x8x8xbf16, #tpu.memory_space<vmem>>, %arg7: memref<1x1x8x8x8xbf16, #tpu.memory_space<vmem>>, %arg8: memref<64x8xf32, #tpu.memory_space<vmem>>) attributes {dimension_semantics = [#tpu.dimension_semantics<parallel>, #tpu.dimension_semantics<parallel>, #tpu.dimension_semantics<arbitrary>], iteration_bounds = array<i64: 2, 4, 3>, scalar_prefetch = 0 : i64, scratch_operands = 1 : i64, tpu.core_type = #tpu.core_type<tc>, window_params = [{transform_indices = @transform_0, window_bounds = array<i64: 1, 1, 1, 10, 10, 8>}, {pipeline_mode = #tpu.pipeline_mode<synchronous>, transform_indices = @transform_1, window_bounds = array<i64: 27, 8, 8>}, {pipeline_mode = #tpu.pipeline_mode<synchronous>, transform_indices = @transform_2, window_bounds = array<i64: 1, 8>}, {transform_indices = @transform_3, window_bounds = array<i64: 1, 1, 8, 8, 8>}, {transform_indices = @transform_4, window_bounds = array<i64: 1, 1, 8, 8, 8>}]} {
    %c0_i32 = arith.constant 0 : i32
    %0 = arith.cmpi eq, %arg2, %c0_i32 : i32
    %1 = arith.extui %0 : i1 to i32
    %c0_i32_0 = arith.constant 0 : i32
    %2 = arith.cmpi ne, %1, %c0_i32_0 : i32
    scf.if %2 {
      %cst_106 = arith.constant 0.000000e+00 : f32
      %107 = vector.broadcast %cst_106 : f32 to vector<64x8xf32>
      %c0_107 = arith.constant 0 : index
      %c0_108 = arith.constant 0 : index
      %108 = vector.load %arg8[%c0_107, %c0_108] : memref<64x8xf32, #tpu.memory_space<vmem>>, vector<64x8xf32>
      tpu.vector_store %arg8[%c0_107, %c0_108], %107 {strides = array<i32>} : memref<64x8xf32, #tpu.memory_space<vmem>>, vector<64x8xf32>,
    } else {
    }
    %c0 = arith.constant 0 : index
    %c0_1 = arith.constant 0 : index
    %3 = vector.load %arg8[%c0, %c0_1] : memref<64x8xf32, #tpu.memory_space<vmem>>, vector<64x8xf32>
    %c0_2 = arith.constant 0 : index
    %c0_3 = arith.constant 0 : index
    %c0_4 = arith.constant 0 : index
    %c0_5 = arith.constant 0 : index
    %c0_6 = arith.constant 0 : index
    %c0_7 = arith.constant 0 : index
    %4 = vector.load %arg3[%c0_2, %c0_3, %c0_4, %c0_5, %c0_6, %c0_7] : memref<1x1x1x10x10x8xbf16, #tpu.memory_space<vmem>>, vector<1x1x1x8x8x8xbf16>
    %5 = vector.shape_cast %4 : vector<1x1x1x8x8x8xbf16> to vector<8x8x8xbf16>
    %c9_i32 = arith.constant 9 : i32
    %6 = arith.muli %arg2, %c9_i32 : i32
    %c0_i32_8 = arith.constant 0 : i32
    %7 = arith.addi %6, %c0_i32_8 : i32
    %c0_i32_9 = arith.constant 0 : i32
    %8 = arith.addi %7, %c0_i32_9 : i32
    %9 = arith.index_cast %8 : i32 to index
    %c0_10 = arith.constant 0 : index
    %c0_11 = arith.constant 0 : index
    %10 = vector.load %arg4[%9, %c0_10, %c0_11] : memref<27x8x8xbf16, #tpu.memory_space<vmem>>, vector<1x8x8xbf16>
    %11 = vector.shape_cast %10 : vector<1x8x8xbf16> to vector<8x8xbf16>
    %12 = vector.shape_cast %5 : vector<8x8x8xbf16> to vector<64x8xbf16>
    %cst = arith.constant dense<0.000000e+00> : vector<64x8xf32>
    %13 = tpu.matmul %12, %11, %cst {dimension_numbers = #tpu.dot_dimension_numbers<[1], [0], [0], [1], [0, 0, 1, 1], [], []>} : vector<64x8xbf16>, vector<8x8xbf16>, vector<64x8xf32> -> vector<64x8xf32>
    %14 = arith.addf %3, %13 : vector<64x8xf32>
    %c0_12 = arith.constant 0 : index
    %c0_13 = arith.constant 0 : index
    %c0_14 = arith.constant 0 : index
    %c0_15 = arith.constant 0 : index
    %c1 = arith.constant 1 : index
    %c0_16 = arith.constant 0 : index
    %15 = vector.load %arg3[%c0_12, %c0_13, %c0_14, %c0_15, %c1, %c0_16] : memref<1x1x1x10x10x8xbf16, #tpu.memory_space<vmem>>, vector<1x1x1x8x8x8xbf16>
    %16 = vector.shape_cast %15 : vector<1x1x1x8x8x8xbf16> to vector<8x8x8xbf16>
    %c9_i32_17 = arith.constant 9 : i32
    %17 = arith.muli %arg2, %c9_i32_17 : i32
    %c0_i32_18 = arith.constant 0 : i32
    %18 = arith.addi %17, %c0_i32_18 : i32
    %c1_i32 = arith.constant 1 : i32
    %19 = arith.addi %18, %c1_i32 : i32
    %20 = arith.index_cast %19 : i32 to index
    %c0_19 = arith.constant 0 : index
    %c0_20 = arith.constant 0 : index
    %21 = vector.load %arg4[%20, %c0_19, %c0_20] : memref<27x8x8xbf16, #tpu.memory_space<vmem>>, vector<1x8x8xbf16>
    %22 = vector.shape_cast %21 : vector<1x8x8xbf16> to vector<8x8xbf16>
    %23 = vector.shape_cast %16 : vector<8x8x8xbf16> to vector<64x8xbf16>
    %cst_21 = arith.constant dense<0.000000e+00> : vector<64x8xf32>
    %24 = tpu.matmul %23, %22, %cst_21 {dimension_numbers = #tpu.dot_dimension_numbers<[1], [0], [0], [1], [0, 0, 1, 1], [], []>} : vector<64x8xbf16>, vector<8x8xbf16>, vector<64x8xf32> -> vector<64x8xf32>
    %25 = arith.addf %14, %24 : vector<64x8xf32>
    %c0_22 = arith.constant 0 : index
    %c0_23 = arith.constant 0 : index
    %c0_24 = arith.constant 0 : index
    %c0_25 = arith.constant 0 : index
    %c2 = arith.constant 2 : index
    %c0_26 = arith.constant 0 : index
    %26 = vector.load %arg3[%c0_22, %c0_23, %c0_24, %c0_25, %c2, %c0_26] : memref<1x1x1x10x10x8xbf16, #tpu.memory_space<vmem>>, vector<1x1x1x8x8x8xbf16>
    %27 = vector.shape_cast %26 : vector<1x1x1x8x8x8xbf16> to vector<8x8x8xbf16>
    %c9_i32_27 = arith.constant 9 : i32
    %28 = arith.muli %arg2, %c9_i32_27 : i32
    %c0_i32_28 = arith.constant 0 : i32
    %29 = arith.addi %28, %c0_i32_28 : i32
    %c2_i32 = arith.constant 2 : i32
    %30 = arith.addi %29, %c2_i32 : i32
    %31 = arith.index_cast %30 : i32 to index
    %c0_29 = arith.constant 0 : index
    %c0_30 = arith.constant 0 : index
    %32 = vector.load %arg4[%31, %c0_29, %c0_30] : memref<27x8x8xbf16, #tpu.memory_space<vmem>>, vector<1x8x8xbf16>
    %33 = vector.shape_cast %32 : vector<1x8x8xbf16> to vector<8x8xbf16>
    %34 = vector.shape_cast %27 : vector<8x8x8xbf16> to vector<64x8xbf16>
    %cst_31 = arith.constant dense<0.000000e+00> : vector<64x8xf32>
    %35 = tpu.matmul %34, %33, %cst_31 {dimension_numbers = #tpu.dot_dimension_numbers<[1], [0], [0], [1], [0, 0, 1, 1], [], []>} : vector<64x8xbf16>, vector<8x8xbf16>, vector<64x8xf32> -> vector<64x8xf32>
    %36 = arith.addf %25, %35 : vector<64x8xf32>
    %c0_32 = arith.constant 0 : index
    %c0_33 = arith.constant 0 : index
    %c0_34 = arith.constant 0 : index
    %c1_35 = arith.constant 1 : index
    %c0_36 = arith.constant 0 : index
    %c0_37 = arith.constant 0 : index
    %37 = vector.load %arg3[%c0_32, %c0_33, %c0_34, %c1_35, %c0_36, %c0_37] : memref<1x1x1x10x10x8xbf16, #tpu.memory_space<vmem>>, vector<1x1x1x8x8x8xbf16>
    %38 = vector.shape_cast %37 : vector<1x1x1x8x8x8xbf16> to vector<8x8x8xbf16>
    %c9_i32_38 = arith.constant 9 : i32
    %39 = arith.muli %arg2, %c9_i32_38 : i32
    %c3_i32 = arith.constant 3 : i32
    %40 = arith.addi %39, %c3_i32 : i32
    %c0_i32_39 = arith.constant 0 : i32
    %41 = arith.addi %40, %c0_i32_39 : i32
    %42 = arith.index_cast %41 : i32 to index
    %c0_40 = arith.constant 0 : index
    %c0_41 = arith.constant 0 : index
    %43 = vector.load %arg4[%42, %c0_40, %c0_41] : memref<27x8x8xbf16, #tpu.memory_space<vmem>>, vector<1x8x8xbf16>
    %44 = vector.shape_cast %43 : vector<1x8x8xbf16> to vector<8x8xbf16>
    %45 = vector.shape_cast %38 : vector<8x8x8xbf16> to vector<64x8xbf16>
    %cst_42 = arith.constant dense<0.000000e+00> : vector<64x8xf32>
    %46 = tpu.matmul %45, %44, %cst_42 {dimension_numbers = #tpu.dot_dimension_numbers<[1], [0], [0], [1], [0, 0, 1, 1], [], []>} : vector<64x8xbf16>, vector<8x8xbf16>, vector<64x8xf32> -> vector<64x8xf32>
    %47 = arith.addf %36, %46 : vector<64x8xf32>
    %c0_43 = arith.constant 0 : index
    %c0_44 = arith.constant 0 : index
    %c0_45 = arith.constant 0 : index
    %c1_46 = arith.constant 1 : index
    %c1_47 = arith.constant 1 : index
    %c0_48 = arith.constant 0 : index
    %48 = vector.load %arg3[%c0_43, %c0_44, %c0_45, %c1_46, %c1_47, %c0_48] : memref<1x1x1x10x10x8xbf16, #tpu.memory_space<vmem>>, vector<1x1x1x8x8x8xbf16>
    %49 = vector.shape_cast %48 : vector<1x1x1x8x8x8xbf16> to vector<8x8x8xbf16>
    %c9_i32_49 = arith.constant 9 : i32
    %50 = arith.muli %arg2, %c9_i32_49 : i32
    %c3_i32_50 = arith.constant 3 : i32
    %51 = arith.addi %50, %c3_i32_50 : i32
    %c1_i32_51 = arith.constant 1 : i32
    %52 = arith.addi %51, %c1_i32_51 : i32
    %53 = arith.index_cast %52 : i32 to index
    %c0_52 = arith.constant 0 : index
    %c0_53 = arith.constant 0 : index
    %54 = vector.load %arg4[%53, %c0_52, %c0_53] : memref<27x8x8xbf16, #tpu.memory_space<vmem>>, vector<1x8x8xbf16>
    %55 = vector.shape_cast %54 : vector<1x8x8xbf16> to vector<8x8xbf16>
    %56 = vector.shape_cast %49 : vector<8x8x8xbf16> to vector<64x8xbf16>
    %cst_54 = arith.constant dense<0.000000e+00> : vector<64x8xf32>
    %57 = tpu.matmul %56, %55, %cst_54 {dimension_numbers = #tpu.dot_dimension_numbers<[1], [0], [0], [1], [0, 0, 1, 1], [], []>} : vector<64x8xbf16>, vector<8x8xbf16>, vector<64x8xf32> -> vector<64x8xf32>
    %58 = arith.addf %47, %57 : vector<64x8xf32>
    %c0_55 = arith.constant 0 : index
    %c0_56 = arith.constant 0 : index
    %c0_57 = arith.constant 0 : index
    %c1_58 = arith.constant 1 : index
    %c2_59 = arith.constant 2 : index
    %c0_60 = arith.constant 0 : index
    %59 = vector.load %arg3[%c0_55, %c0_56, %c0_57, %c1_58, %c2_59, %c0_60] : memref<1x1x1x10x10x8xbf16, #tpu.memory_space<vmem>>, vector<1x1x1x8x8x8xbf16>
    %60 = vector.shape_cast %59 : vector<1x1x1x8x8x8xbf16> to vector<8x8x8xbf16>
    %c9_i32_61 = arith.constant 9 : i32
    %61 = arith.muli %arg2, %c9_i32_61 : i32
    %c3_i32_62 = arith.constant 3 : i32
    %62 = arith.addi %61, %c3_i32_62 : i32
    %c2_i32_63 = arith.constant 2 : i32
    %63 = arith.addi %62, %c2_i32_63 : i32
    %64 = arith.index_cast %63 : i32 to index
    %c0_64 = arith.constant 0 : index
    %c0_65 = arith.constant 0 : index
    %65 = vector.load %arg4[%64, %c0_64, %c0_65] : memref<27x8x8xbf16, #tpu.memory_space<vmem>>, vector<1x8x8xbf16>
    %66 = vector.shape_cast %65 : vector<1x8x8xbf16> to vector<8x8xbf16>
    %67 = vector.shape_cast %60 : vector<8x8x8xbf16> to vector<64x8xbf16>
    %cst_66 = arith.constant dense<0.000000e+00> : vector<64x8xf32>
    %68 = tpu.matmul %67, %66, %cst_66 {dimension_numbers = #tpu.dot_dimension_numbers<[1], [0], [0], [1], [0, 0, 1, 1], [], []>} : vector<64x8xbf16>, vector<8x8xbf16>, vector<64x8xf32> -> vector<64x8xf32>
    %69 = arith.addf %58, %68 : vector<64x8xf32>
    %c0_67 = arith.constant 0 : index
    %c0_68 = arith.constant 0 : index
    %c0_69 = arith.constant 0 : index
    %c2_70 = arith.constant 2 : index
    %c0_71 = arith.constant 0 : index
    %c0_72 = arith.constant 0 : index
    %70 = vector.load %arg3[%c0_67, %c0_68, %c0_69, %c2_70, %c0_71, %c0_72] : memref<1x1x1x10x10x8xbf16, #tpu.memory_space<vmem>>, vector<1x1x1x8x8x8xbf16>
    %71 = vector.shape_cast %70 : vector<1x1x1x8x8x8xbf16> to vector<8x8x8xbf16>
    %c9_i32_73 = arith.constant 9 : i32
    %72 = arith.muli %arg2, %c9_i32_73 : i32
    %c6_i32 = arith.constant 6 : i32
    %73 = arith.addi %72, %c6_i32 : i32
    %c0_i32_74 = arith.constant 0 : i32
    %74 = arith.addi %73, %c0_i32_74 : i32
    %75 = arith.index_cast %74 : i32 to index
    %c0_75 = arith.constant 0 : index
    %c0_76 = arith.constant 0 : index
    %76 = vector.load %arg4[%75, %c0_75, %c0_76] : memref<27x8x8xbf16, #tpu.memory_space<vmem>>, vector<1x8x8xbf16>
    %77 = vector.shape_cast %76 : vector<1x8x8xbf16> to vector<8x8xbf16>
    %78 = vector.shape_cast %71 : vector<8x8x8xbf16> to vector<64x8xbf16>
    %cst_77 = arith.constant dense<0.000000e+00> : vector<64x8xf32>
    %79 = tpu.matmul %78, %77, %cst_77 {dimension_numbers = #tpu.dot_dimension_numbers<[1], [0], [0], [1], [0, 0, 1, 1], [], []>} : vector<64x8xbf16>, vector<8x8xbf16>, vector<64x8xf32> -> vector<64x8xf32>
    %80 = arith.addf %69, %79 : vector<64x8xf32>
    %c0_78 = arith.constant 0 : index
    %c0_79 = arith.constant 0 : index
    %c0_80 = arith.constant 0 : index
    %c2_81 = arith.constant 2 : index
    %c1_82 = arith.constant 1 : index
    %c0_83 = arith.constant 0 : index
    %81 = vector.load %arg3[%c0_78, %c0_79, %c0_80, %c2_81, %c1_82, %c0_83] : memref<1x1x1x10x10x8xbf16, #tpu.memory_space<vmem>>, vector<1x1x1x8x8x8xbf16>
    %82 = vector.shape_cast %81 : vector<1x1x1x8x8x8xbf16> to vector<8x8x8xbf16>
    %c9_i32_84 = arith.constant 9 : i32
    %83 = arith.muli %arg2, %c9_i32_84 : i32
    %c6_i32_85 = arith.constant 6 : i32
    %84 = arith.addi %83, %c6_i32_85 : i32
    %c1_i32_86 = arith.constant 1 : i32
    %85 = arith.addi %84, %c1_i32_86 : i32
    %86 = arith.index_cast %85 : i32 to index
    %c0_87 = arith.constant 0 : index
    %c0_88 = arith.constant 0 : index
    %87 = vector.load %arg4[%86, %c0_87, %c0_88] : memref<27x8x8xbf16, #tpu.memory_space<vmem>>, vector<1x8x8xbf16>
    %88 = vector.shape_cast %87 : vector<1x8x8xbf16> to vector<8x8xbf16>
    %89 = vector.shape_cast %82 : vector<8x8x8xbf16> to vector<64x8xbf16>
    %cst_89 = arith.constant dense<0.000000e+00> : vector<64x8xf32>
    %90 = tpu.matmul %89, %88, %cst_89 {dimension_numbers = #tpu.dot_dimension_numbers<[1], [0], [0], [1], [0, 0, 1, 1], [], []>} : vector<64x8xbf16>, vector<8x8xbf16>, vector<64x8xf32> -> vector<64x8xf32>
    %91 = arith.addf %80, %90 : vector<64x8xf32>
    %c0_90 = arith.constant 0 : index
    %c0_91 = arith.constant 0 : index
    %c0_92 = arith.constant 0 : index
    %c2_93 = arith.constant 2 : index
    %c2_94 = arith.constant 2 : index
    %c0_95 = arith.constant 0 : index
    %92 = vector.load %arg3[%c0_90, %c0_91, %c0_92, %c2_93, %c2_94, %c0_95] : memref<1x1x1x10x10x8xbf16, #tpu.memory_space<vmem>>, vector<1x1x1x8x8x8xbf16>
    %93 = vector.shape_cast %92 : vector<1x1x1x8x8x8xbf16> to vector<8x8x8xbf16>
    %c9_i32_96 = arith.constant 9 : i32
    %94 = arith.muli %arg2, %c9_i32_96 : i32
    %c6_i32_97 = arith.constant 6 : i32
    %95 = arith.addi %94, %c6_i32_97 : i32
    %c2_i32_98 = arith.constant 2 : i32
    %96 = arith.addi %95, %c2_i32_98 : i32
    %97 = arith.index_cast %96 : i32 to index
    %c0_99 = arith.constant 0 : index
    %c0_100 = arith.constant 0 : index
    %98 = vector.load %arg4[%97, %c0_99, %c0_100] : memref<27x8x8xbf16, #tpu.memory_space<vmem>>, vector<1x8x8xbf16>
    %99 = vector.shape_cast %98 : vector<1x8x8xbf16> to vector<8x8xbf16>
    %100 = vector.shape_cast %93 : vector<8x8x8xbf16> to vector<64x8xbf16>
    %cst_101 = arith.constant dense<0.000000e+00> : vector<64x8xf32>
    %101 = tpu.matmul %100, %99, %cst_101 {dimension_numbers = #tpu.dot_dimension_numbers<[1], [0], [0], [1], [0, 0, 1, 1], [], []>} : vector<64x8xbf16>, vector<8x8xbf16>, vector<64x8xf32> -> vector<64x8xf32>
    %102 = arith.addf %91, %101 : vector<64x8xf32>
    %c0_102 = arith.constant 0 : index
    %c0_103 = arith.constant 0 : index
    %103 = vector.load %arg8[%c0_102, %c0_103] : memref<64x8xf32, #tpu.memory_space<vmem>>, vector<64x8xf32>
    tpu.vector_store %arg8[%c0_102, %c0_103], %102 {strides = array<i32>} : memref<64x8xf32, #tpu.memory_space<vmem>>, vector<64x8xf32>,
    %c2_i32_104 = arith.constant 2 : i32
    %104 = arith.cmpi eq, %arg2, %c2_i32_104 : i32
    %105 = arith.extui %104 : i1 to i32
    %c0_i32_105 = arith.constant 0 : i32
    %106 = arith.cmpi ne, %105, %c0_i32_105 : i32
    scf.if %106 {
      %c0_106 = arith.constant 0 : index
      %c0_107 = arith.constant 0 : index
      %107 = vector.load %arg8[%c0_106, %c0_107] : memref<64x8xf32, #tpu.memory_space<vmem>>, vector<64x8xf32>
      %c0_108 = arith.constant 0 : index
      %c0_109 = arith.constant 0 : index
      %108 = vector.load %arg5[%c0_108, %c0_109] : memref<1x8xf32, #tpu.memory_space<vmem>>, vector<1x8xf32>
      %109 = vector.broadcast %108 : vector<1x8xf32> to vector<64x8xf32>
      %110 = arith.addf %107, %109 : vector<64x8xf32>
      %c0_110 = arith.constant 0 : index
      %c0_111 = arith.constant 0 : index
      %c0_112 = arith.constant 0 : index
      %c0_113 = arith.constant 0 : index
      %c0_114 = arith.constant 0 : index
      %111 = vector.load %arg6[%c0_110, %c0_111, %c0_112, %c0_113, %c0_114] : memref<1x1x8x8x8xbf16, #tpu.memory_space<vmem>>, vector<1x1x8x8x8xbf16>
      %112 = vector.shape_cast %111 : vector<1x1x8x8x8xbf16> to vector<8x8x8xbf16>
      %113 = vector.shape_cast %112 : vector<8x8x8xbf16> to vector<64x8xbf16>
      %114 = arith.extf %113 : vector<64x8xbf16> to vector<64x8xf32>
      %115 = arith.addf %110, %114 : vector<64x8xf32>
      %cst_115 = arith.constant 0.000000e+00 : f32
      %116 = vector.broadcast %cst_115 : f32 to vector<64x8xf32>
      %117 = arith.maximumf %115, %116 : vector<64x8xf32>
      %118 = vector.shape_cast %117 : vector<64x8xf32> to vector<8x8x8xf32>
      %119 = arith.truncf %118 : vector<8x8x8xf32> to vector<8x8x8xbf16>
      %c0_116 = arith.constant 0 : index
      %c0_117 = arith.constant 0 : index
      %c0_118 = arith.constant 0 : index
      %c0_119 = arith.constant 0 : index
      %c0_120 = arith.constant 0 : index
      %120 = vector.load %arg7[%c0_116, %c0_117, %c0_118, %c0_119, %c0_120] : memref<1x1x8x8x8xbf16, #tpu.memory_space<vmem>>, vector<1x1x8x8x8xbf16>
      %121 = vector.shape_cast %120 : vector<1x1x8x8x8xbf16> to vector<8x8x8xbf16>
      %122 = vector.shape_cast %119 : vector<8x8x8xbf16> to vector<1x1x8x8x8xbf16>
      tpu.vector_store %arg7[%c0_116, %c0_117, %c0_118, %c0_119, %c0_120], %122 {strides = array<i32>} : memref<1x1x8x8x8xbf16, #tpu.memory_space<vmem>>, vector<1x1x8x8x8xbf16>,
    } else {
    }
    return
  }
  func.func @transform_0(%arg0: i32, %arg1: i32, %arg2: i32) -> (i32, i32, i32, i32, i32, i32) {
    %c1_i32 = arith.constant 1 : i32
    %0 = arith.muli %c1_i32, %arg1 : i32
    %1 = arith.addi %0, %arg2 : i32
    %c0_i32 = arith.constant 0 : i32
    %c0_i32_0 = arith.constant 0 : i32
    %c0_i32_1 = arith.constant 0 : i32
    %c0_i32_2 = arith.constant 0 : i32
    %c0_i32_3 = arith.constant 0 : i32
    return %arg0, %1, %c0_i32, %c0_i32_0, %c0_i32_1, %c0_i32_2 : i32, i32, i32, i32, i32, i32
  }
  func.func @transform_1(%arg0: i32, %arg1: i32, %arg2: i32) -> (i32, i32, i32) {
    %c0_i32 = arith.constant 0 : i32
    %c0_i32_0 = arith.constant 0 : i32
    %c0_i32_1 = arith.constant 0 : i32
    %c0_i32_2 = arith.constant 0 : i32
    return %c0_i32, %c0_i32_0, %c0_i32_1 : i32, i32, i32
  }
  func.func @transform_2(%arg0: i32, %arg1: i32, %arg2: i32) -> (i32, i32) {
    %c0_i32 = arith.constant 0 : i32
    %c0_i32_0 = arith.constant 0 : i32
    %c0_i32_1 = arith.constant 0 : i32
    return %c0_i32, %c0_i32_0 : i32, i32
  }
  func.func @transform_3(%arg0: i32, %arg1: i32, %arg2: i32) -> (i32, i32, i32, i32, i32) {
    %c0_i32 = arith.constant 0 : i32
    %c0_i32_0 = arith.constant 0 : i32
    %c0_i32_1 = arith.constant 0 : i32
    %c0_i32_2 = arith.constant 0 : i32
    return %arg0, %arg1, %c0_i32, %c0_i32_0, %c0_i32_1 : i32, i32, i32, i32, i32
  }
  func.func @transform_4(%arg0: i32, %arg1: i32, %arg2: i32) -> (i32, i32, i32, i32, i32) {
    %c0_i32 = arith.constant 0 : i32
    %c0_i32_0 = arith.constant 0 : i32
    %c0_i32_1 = arith.constant 0 : i32
    %c0_i32_2 = arith.constant 0 : i32
    return %arg0, %arg1, %c0_i32, %c0_i32_0, %c0_i32_1 : i32, i32, i32, i32, i32
  }
}

module attributes {stable_mosaic.version = 11 : i64} {
  func.func @_conv3x3_kernel(%arg0: i32, %arg1: i32, %arg2: i32, %arg3: memref<1x1x1x10x10x8xbf16, #tpu.memory_space<vmem>>, %arg4: memref<27x8x8xbf16, #tpu.memory_space<vmem>>, %arg5: memref<1x8xf32, #tpu.memory_space<vmem>>, %arg6: memref<1x1x8x8x8xbf16, #tpu.memory_space<vmem>>, %arg7: memref<64x8xf32, #tpu.memory_space<vmem>>) attributes {dimension_semantics = [#tpu.dimension_semantics<parallel>, #tpu.dimension_semantics<parallel>, #tpu.dimension_semantics<arbitrary>], iteration_bounds = array<i64: 2, 4, 3>, scalar_prefetch = 0 : i64, scratch_operands = 1 : i64, tpu.core_type = #tpu.core_type<tc>, window_params = [{transform_indices = @transform_0, window_bounds = array<i64: 1, 1, 1, 10, 10, 8>}, {pipeline_mode = #tpu.pipeline_mode<synchronous>, transform_indices = @transform_1, window_bounds = array<i64: 27, 8, 8>}, {pipeline_mode = #tpu.pipeline_mode<synchronous>, transform_indices = @transform_2, window_bounds = array<i64: 1, 8>}, {transform_indices = @transform_3, window_bounds = array<i64: 1, 1, 8, 8, 8>}]} {
    %c0_i32 = arith.constant 0 : i32
    %0 = arith.cmpi eq, %arg2, %c0_i32 : i32
    %1 = arith.extui %0 : i1 to i32
    %c0_i32_0 = arith.constant 0 : i32
    %2 = arith.cmpi ne, %1, %c0_i32_0 : i32
    scf.if %2 {
      %cst_106 = arith.constant 0.000000e+00 : f32
      %107 = vector.broadcast %cst_106 : f32 to vector<64x8xf32>
      %c0_107 = arith.constant 0 : index
      %c0_108 = arith.constant 0 : index
      %108 = vector.load %arg7[%c0_107, %c0_108] : memref<64x8xf32, #tpu.memory_space<vmem>>, vector<64x8xf32>
      tpu.vector_store %arg7[%c0_107, %c0_108], %107 {strides = array<i32>} : memref<64x8xf32, #tpu.memory_space<vmem>>, vector<64x8xf32>,
    } else {
    }
    %c0 = arith.constant 0 : index
    %c0_1 = arith.constant 0 : index
    %3 = vector.load %arg7[%c0, %c0_1] : memref<64x8xf32, #tpu.memory_space<vmem>>, vector<64x8xf32>
    %c0_2 = arith.constant 0 : index
    %c0_3 = arith.constant 0 : index
    %c0_4 = arith.constant 0 : index
    %c0_5 = arith.constant 0 : index
    %c0_6 = arith.constant 0 : index
    %c0_7 = arith.constant 0 : index
    %4 = vector.load %arg3[%c0_2, %c0_3, %c0_4, %c0_5, %c0_6, %c0_7] : memref<1x1x1x10x10x8xbf16, #tpu.memory_space<vmem>>, vector<1x1x1x8x8x8xbf16>
    %5 = vector.shape_cast %4 : vector<1x1x1x8x8x8xbf16> to vector<8x8x8xbf16>
    %c9_i32 = arith.constant 9 : i32
    %6 = arith.muli %arg2, %c9_i32 : i32
    %c0_i32_8 = arith.constant 0 : i32
    %7 = arith.addi %6, %c0_i32_8 : i32
    %c0_i32_9 = arith.constant 0 : i32
    %8 = arith.addi %7, %c0_i32_9 : i32
    %9 = arith.index_cast %8 : i32 to index
    %c0_10 = arith.constant 0 : index
    %c0_11 = arith.constant 0 : index
    %10 = vector.load %arg4[%9, %c0_10, %c0_11] : memref<27x8x8xbf16, #tpu.memory_space<vmem>>, vector<1x8x8xbf16>
    %11 = vector.shape_cast %10 : vector<1x8x8xbf16> to vector<8x8xbf16>
    %12 = vector.shape_cast %5 : vector<8x8x8xbf16> to vector<64x8xbf16>
    %cst = arith.constant dense<0.000000e+00> : vector<64x8xf32>
    %13 = tpu.matmul %12, %11, %cst {dimension_numbers = #tpu.dot_dimension_numbers<[1], [0], [0], [1], [0, 0, 1, 1], [], []>} : vector<64x8xbf16>, vector<8x8xbf16>, vector<64x8xf32> -> vector<64x8xf32>
    %14 = arith.addf %3, %13 : vector<64x8xf32>
    %c0_12 = arith.constant 0 : index
    %c0_13 = arith.constant 0 : index
    %c0_14 = arith.constant 0 : index
    %c0_15 = arith.constant 0 : index
    %c1 = arith.constant 1 : index
    %c0_16 = arith.constant 0 : index
    %15 = vector.load %arg3[%c0_12, %c0_13, %c0_14, %c0_15, %c1, %c0_16] : memref<1x1x1x10x10x8xbf16, #tpu.memory_space<vmem>>, vector<1x1x1x8x8x8xbf16>
    %16 = vector.shape_cast %15 : vector<1x1x1x8x8x8xbf16> to vector<8x8x8xbf16>
    %c9_i32_17 = arith.constant 9 : i32
    %17 = arith.muli %arg2, %c9_i32_17 : i32
    %c0_i32_18 = arith.constant 0 : i32
    %18 = arith.addi %17, %c0_i32_18 : i32
    %c1_i32 = arith.constant 1 : i32
    %19 = arith.addi %18, %c1_i32 : i32
    %20 = arith.index_cast %19 : i32 to index
    %c0_19 = arith.constant 0 : index
    %c0_20 = arith.constant 0 : index
    %21 = vector.load %arg4[%20, %c0_19, %c0_20] : memref<27x8x8xbf16, #tpu.memory_space<vmem>>, vector<1x8x8xbf16>
    %22 = vector.shape_cast %21 : vector<1x8x8xbf16> to vector<8x8xbf16>
    %23 = vector.shape_cast %16 : vector<8x8x8xbf16> to vector<64x8xbf16>
    %cst_21 = arith.constant dense<0.000000e+00> : vector<64x8xf32>
    %24 = tpu.matmul %23, %22, %cst_21 {dimension_numbers = #tpu.dot_dimension_numbers<[1], [0], [0], [1], [0, 0, 1, 1], [], []>} : vector<64x8xbf16>, vector<8x8xbf16>, vector<64x8xf32> -> vector<64x8xf32>
    %25 = arith.addf %14, %24 : vector<64x8xf32>
    %c0_22 = arith.constant 0 : index
    %c0_23 = arith.constant 0 : index
    %c0_24 = arith.constant 0 : index
    %c0_25 = arith.constant 0 : index
    %c2 = arith.constant 2 : index
    %c0_26 = arith.constant 0 : index
    %26 = vector.load %arg3[%c0_22, %c0_23, %c0_24, %c0_25, %c2, %c0_26] : memref<1x1x1x10x10x8xbf16, #tpu.memory_space<vmem>>, vector<1x1x1x8x8x8xbf16>
    %27 = vector.shape_cast %26 : vector<1x1x1x8x8x8xbf16> to vector<8x8x8xbf16>
    %c9_i32_27 = arith.constant 9 : i32
    %28 = arith.muli %arg2, %c9_i32_27 : i32
    %c0_i32_28 = arith.constant 0 : i32
    %29 = arith.addi %28, %c0_i32_28 : i32
    %c2_i32 = arith.constant 2 : i32
    %30 = arith.addi %29, %c2_i32 : i32
    %31 = arith.index_cast %30 : i32 to index
    %c0_29 = arith.constant 0 : index
    %c0_30 = arith.constant 0 : index
    %32 = vector.load %arg4[%31, %c0_29, %c0_30] : memref<27x8x8xbf16, #tpu.memory_space<vmem>>, vector<1x8x8xbf16>
    %33 = vector.shape_cast %32 : vector<1x8x8xbf16> to vector<8x8xbf16>
    %34 = vector.shape_cast %27 : vector<8x8x8xbf16> to vector<64x8xbf16>
    %cst_31 = arith.constant dense<0.000000e+00> : vector<64x8xf32>
    %35 = tpu.matmul %34, %33, %cst_31 {dimension_numbers = #tpu.dot_dimension_numbers<[1], [0], [0], [1], [0, 0, 1, 1], [], []>} : vector<64x8xbf16>, vector<8x8xbf16>, vector<64x8xf32> -> vector<64x8xf32>
    %36 = arith.addf %25, %35 : vector<64x8xf32>
    %c0_32 = arith.constant 0 : index
    %c0_33 = arith.constant 0 : index
    %c0_34 = arith.constant 0 : index
    %c1_35 = arith.constant 1 : index
    %c0_36 = arith.constant 0 : index
    %c0_37 = arith.constant 0 : index
    %37 = vector.load %arg3[%c0_32, %c0_33, %c0_34, %c1_35, %c0_36, %c0_37] : memref<1x1x1x10x10x8xbf16, #tpu.memory_space<vmem>>, vector<1x1x1x8x8x8xbf16>
    %38 = vector.shape_cast %37 : vector<1x1x1x8x8x8xbf16> to vector<8x8x8xbf16>
    %c9_i32_38 = arith.constant 9 : i32
    %39 = arith.muli %arg2, %c9_i32_38 : i32
    %c3_i32 = arith.constant 3 : i32
    %40 = arith.addi %39, %c3_i32 : i32
    %c0_i32_39 = arith.constant 0 : i32
    %41 = arith.addi %40, %c0_i32_39 : i32
    %42 = arith.index_cast %41 : i32 to index
    %c0_40 = arith.constant 0 : index
    %c0_41 = arith.constant 0 : index
    %43 = vector.load %arg4[%42, %c0_40, %c0_41] : memref<27x8x8xbf16, #tpu.memory_space<vmem>>, vector<1x8x8xbf16>
    %44 = vector.shape_cast %43 : vector<1x8x8xbf16> to vector<8x8xbf16>
    %45 = vector.shape_cast %38 : vector<8x8x8xbf16> to vector<64x8xbf16>
    %cst_42 = arith.constant dense<0.000000e+00> : vector<64x8xf32>
    %46 = tpu.matmul %45, %44, %cst_42 {dimension_numbers = #tpu.dot_dimension_numbers<[1], [0], [0], [1], [0, 0, 1, 1], [], []>} : vector<64x8xbf16>, vector<8x8xbf16>, vector<64x8xf32> -> vector<64x8xf32>
    %47 = arith.addf %36, %46 : vector<64x8xf32>
    %c0_43 = arith.constant 0 : index
    %c0_44 = arith.constant 0 : index
    %c0_45 = arith.constant 0 : index
    %c1_46 = arith.constant 1 : index
    %c1_47 = arith.constant 1 : index
    %c0_48 = arith.constant 0 : index
    %48 = vector.load %arg3[%c0_43, %c0_44, %c0_45, %c1_46, %c1_47, %c0_48] : memref<1x1x1x10x10x8xbf16, #tpu.memory_space<vmem>>, vector<1x1x1x8x8x8xbf16>
    %49 = vector.shape_cast %48 : vector<1x1x1x8x8x8xbf16> to vector<8x8x8xbf16>
    %c9_i32_49 = arith.constant 9 : i32
    %50 = arith.muli %arg2, %c9_i32_49 : i32
    %c3_i32_50 = arith.constant 3 : i32
    %51 = arith.addi %50, %c3_i32_50 : i32
    %c1_i32_51 = arith.constant 1 : i32
    %52 = arith.addi %51, %c1_i32_51 : i32
    %53 = arith.index_cast %52 : i32 to index
    %c0_52 = arith.constant 0 : index
    %c0_53 = arith.constant 0 : index
    %54 = vector.load %arg4[%53, %c0_52, %c0_53] : memref<27x8x8xbf16, #tpu.memory_space<vmem>>, vector<1x8x8xbf16>
    %55 = vector.shape_cast %54 : vector<1x8x8xbf16> to vector<8x8xbf16>
    %56 = vector.shape_cast %49 : vector<8x8x8xbf16> to vector<64x8xbf16>
    %cst_54 = arith.constant dense<0.000000e+00> : vector<64x8xf32>
    %57 = tpu.matmul %56, %55, %cst_54 {dimension_numbers = #tpu.dot_dimension_numbers<[1], [0], [0], [1], [0, 0, 1, 1], [], []>} : vector<64x8xbf16>, vector<8x8xbf16>, vector<64x8xf32> -> vector<64x8xf32>
    %58 = arith.addf %47, %57 : vector<64x8xf32>
    %c0_55 = arith.constant 0 : index
    %c0_56 = arith.constant 0 : index
    %c0_57 = arith.constant 0 : index
    %c1_58 = arith.constant 1 : index
    %c2_59 = arith.constant 2 : index
    %c0_60 = arith.constant 0 : index
    %59 = vector.load %arg3[%c0_55, %c0_56, %c0_57, %c1_58, %c2_59, %c0_60] : memref<1x1x1x10x10x8xbf16, #tpu.memory_space<vmem>>, vector<1x1x1x8x8x8xbf16>
    %60 = vector.shape_cast %59 : vector<1x1x1x8x8x8xbf16> to vector<8x8x8xbf16>
    %c9_i32_61 = arith.constant 9 : i32
    %61 = arith.muli %arg2, %c9_i32_61 : i32
    %c3_i32_62 = arith.constant 3 : i32
    %62 = arith.addi %61, %c3_i32_62 : i32
    %c2_i32_63 = arith.constant 2 : i32
    %63 = arith.addi %62, %c2_i32_63 : i32
    %64 = arith.index_cast %63 : i32 to index
    %c0_64 = arith.constant 0 : index
    %c0_65 = arith.constant 0 : index
    %65 = vector.load %arg4[%64, %c0_64, %c0_65] : memref<27x8x8xbf16, #tpu.memory_space<vmem>>, vector<1x8x8xbf16>
    %66 = vector.shape_cast %65 : vector<1x8x8xbf16> to vector<8x8xbf16>
    %67 = vector.shape_cast %60 : vector<8x8x8xbf16> to vector<64x8xbf16>
    %cst_66 = arith.constant dense<0.000000e+00> : vector<64x8xf32>
    %68 = tpu.matmul %67, %66, %cst_66 {dimension_numbers = #tpu.dot_dimension_numbers<[1], [0], [0], [1], [0, 0, 1, 1], [], []>} : vector<64x8xbf16>, vector<8x8xbf16>, vector<64x8xf32> -> vector<64x8xf32>
    %69 = arith.addf %58, %68 : vector<64x8xf32>
    %c0_67 = arith.constant 0 : index
    %c0_68 = arith.constant 0 : index
    %c0_69 = arith.constant 0 : index
    %c2_70 = arith.constant 2 : index
    %c0_71 = arith.constant 0 : index
    %c0_72 = arith.constant 0 : index
    %70 = vector.load %arg3[%c0_67, %c0_68, %c0_69, %c2_70, %c0_71, %c0_72] : memref<1x1x1x10x10x8xbf16, #tpu.memory_space<vmem>>, vector<1x1x1x8x8x8xbf16>
    %71 = vector.shape_cast %70 : vector<1x1x1x8x8x8xbf16> to vector<8x8x8xbf16>
    %c9_i32_73 = arith.constant 9 : i32
    %72 = arith.muli %arg2, %c9_i32_73 : i32
    %c6_i32 = arith.constant 6 : i32
    %73 = arith.addi %72, %c6_i32 : i32
    %c0_i32_74 = arith.constant 0 : i32
    %74 = arith.addi %73, %c0_i32_74 : i32
    %75 = arith.index_cast %74 : i32 to index
    %c0_75 = arith.constant 0 : index
    %c0_76 = arith.constant 0 : index
    %76 = vector.load %arg4[%75, %c0_75, %c0_76] : memref<27x8x8xbf16, #tpu.memory_space<vmem>>, vector<1x8x8xbf16>
    %77 = vector.shape_cast %76 : vector<1x8x8xbf16> to vector<8x8xbf16>
    %78 = vector.shape_cast %71 : vector<8x8x8xbf16> to vector<64x8xbf16>
    %cst_77 = arith.constant dense<0.000000e+00> : vector<64x8xf32>
    %79 = tpu.matmul %78, %77, %cst_77 {dimension_numbers = #tpu.dot_dimension_numbers<[1], [0], [0], [1], [0, 0, 1, 1], [], []>} : vector<64x8xbf16>, vector<8x8xbf16>, vector<64x8xf32> -> vector<64x8xf32>
    %80 = arith.addf %69, %79 : vector<64x8xf32>
    %c0_78 = arith.constant 0 : index
    %c0_79 = arith.constant 0 : index
    %c0_80 = arith.constant 0 : index
    %c2_81 = arith.constant 2 : index
    %c1_82 = arith.constant 1 : index
    %c0_83 = arith.constant 0 : index
    %81 = vector.load %arg3[%c0_78, %c0_79, %c0_80, %c2_81, %c1_82, %c0_83] : memref<1x1x1x10x10x8xbf16, #tpu.memory_space<vmem>>, vector<1x1x1x8x8x8xbf16>
    %82 = vector.shape_cast %81 : vector<1x1x1x8x8x8xbf16> to vector<8x8x8xbf16>
    %c9_i32_84 = arith.constant 9 : i32
    %83 = arith.muli %arg2, %c9_i32_84 : i32
    %c6_i32_85 = arith.constant 6 : i32
    %84 = arith.addi %83, %c6_i32_85 : i32
    %c1_i32_86 = arith.constant 1 : i32
    %85 = arith.addi %84, %c1_i32_86 : i32
    %86 = arith.index_cast %85 : i32 to index
    %c0_87 = arith.constant 0 : index
    %c0_88 = arith.constant 0 : index
    %87 = vector.load %arg4[%86, %c0_87, %c0_88] : memref<27x8x8xbf16, #tpu.memory_space<vmem>>, vector<1x8x8xbf16>
    %88 = vector.shape_cast %87 : vector<1x8x8xbf16> to vector<8x8xbf16>
    %89 = vector.shape_cast %82 : vector<8x8x8xbf16> to vector<64x8xbf16>
    %cst_89 = arith.constant dense<0.000000e+00> : vector<64x8xf32>
    %90 = tpu.matmul %89, %88, %cst_89 {dimension_numbers = #tpu.dot_dimension_numbers<[1], [0], [0], [1], [0, 0, 1, 1], [], []>} : vector<64x8xbf16>, vector<8x8xbf16>, vector<64x8xf32> -> vector<64x8xf32>
    %91 = arith.addf %80, %90 : vector<64x8xf32>
    %c0_90 = arith.constant 0 : index
    %c0_91 = arith.constant 0 : index
    %c0_92 = arith.constant 0 : index
    %c2_93 = arith.constant 2 : index
    %c2_94 = arith.constant 2 : index
    %c0_95 = arith.constant 0 : index
    %92 = vector.load %arg3[%c0_90, %c0_91, %c0_92, %c2_93, %c2_94, %c0_95] : memref<1x1x1x10x10x8xbf16, #tpu.memory_space<vmem>>, vector<1x1x1x8x8x8xbf16>
    %93 = vector.shape_cast %92 : vector<1x1x1x8x8x8xbf16> to vector<8x8x8xbf16>
    %c9_i32_96 = arith.constant 9 : i32
    %94 = arith.muli %arg2, %c9_i32_96 : i32
    %c6_i32_97 = arith.constant 6 : i32
    %95 = arith.addi %94, %c6_i32_97 : i32
    %c2_i32_98 = arith.constant 2 : i32
    %96 = arith.addi %95, %c2_i32_98 : i32
    %97 = arith.index_cast %96 : i32 to index
    %c0_99 = arith.constant 0 : index
    %c0_100 = arith.constant 0 : index
    %98 = vector.load %arg4[%97, %c0_99, %c0_100] : memref<27x8x8xbf16, #tpu.memory_space<vmem>>, vector<1x8x8xbf16>
    %99 = vector.shape_cast %98 : vector<1x8x8xbf16> to vector<8x8xbf16>
    %100 = vector.shape_cast %93 : vector<8x8x8xbf16> to vector<64x8xbf16>
    %cst_101 = arith.constant dense<0.000000e+00> : vector<64x8xf32>
    %101 = tpu.matmul %100, %99, %cst_101 {dimension_numbers = #tpu.dot_dimension_numbers<[1], [0], [0], [1], [0, 0, 1, 1], [], []>} : vector<64x8xbf16>, vector<8x8xbf16>, vector<64x8xf32> -> vector<64x8xf32>
    %102 = arith.addf %91, %101 : vector<64x8xf32>
    %c0_102 = arith.constant 0 : index
    %c0_103 = arith.constant 0 : index
    %103 = vector.load %arg7[%c0_102, %c0_103] : memref<64x8xf32, #tpu.memory_space<vmem>>, vector<64x8xf32>
    tpu.vector_store %arg7[%c0_102, %c0_103], %102 {strides = array<i32>} : memref<64x8xf32, #tpu.memory_space<vmem>>, vector<64x8xf32>,
    %c2_i32_104 = arith.constant 2 : i32
    %104 = arith.cmpi eq, %arg2, %c2_i32_104 : i32
    %105 = arith.extui %104 : i1 to i32
    %c0_i32_105 = arith.constant 0 : i32
    %106 = arith.cmpi ne, %105, %c0_i32_105 : i32
    scf.if %106 {
      %c0_106 = arith.constant 0 : index
      %c0_107 = arith.constant 0 : index
      %107 = vector.load %arg7[%c0_106, %c0_107] : memref<64x8xf32, #tpu.memory_space<vmem>>, vector<64x8xf32>
      %c0_108 = arith.constant 0 : index
      %c0_109 = arith.constant 0 : index
      %108 = vector.load %arg5[%c0_108, %c0_109] : memref<1x8xf32, #tpu.memory_space<vmem>>, vector<1x8xf32>
      %109 = vector.broadcast %108 : vector<1x8xf32> to vector<64x8xf32>
      %110 = arith.addf %107, %109 : vector<64x8xf32>
      %cst_110 = arith.constant 0.000000e+00 : f32
      %111 = vector.broadcast %cst_110 : f32 to vector<64x8xf32>
      %112 = arith.maximumf %110, %111 : vector<64x8xf32>
      %113 = vector.shape_cast %112 : vector<64x8xf32> to vector<8x8x8xf32>
      %114 = arith.truncf %113 : vector<8x8x8xf32> to vector<8x8x8xbf16>
      %c0_111 = arith.constant 0 : index
      %c0_112 = arith.constant 0 : index
      %c0_113 = arith.constant 0 : index
      %c0_114 = arith.constant 0 : index
      %c0_115 = arith.constant 0 : index
      %115 = vector.load %arg6[%c0_111, %c0_112, %c0_113, %c0_114, %c0_115] : memref<1x1x8x8x8xbf16, #tpu.memory_space<vmem>>, vector<1x1x8x8x8xbf16>
      %116 = vector.shape_cast %115 : vector<1x1x8x8x8xbf16> to vector<8x8x8xbf16>
      %117 = vector.shape_cast %114 : vector<8x8x8xbf16> to vector<1x1x8x8x8xbf16>
      tpu.vector_store %arg6[%c0_111, %c0_112, %c0_113, %c0_114, %c0_115], %117 {strides = array<i32>} : memref<1x1x8x8x8xbf16, #tpu.memory_space<vmem>>, vector<1x1x8x8x8xbf16>,
    } else {
    }
    return
  }
  func.func @transform_0(%arg0: i32, %arg1: i32, %arg2: i32) -> (i32, i32, i32, i32, i32, i32) {
    %c1_i32 = arith.constant 1 : i32
    %0 = arith.muli %c1_i32, %arg1 : i32
    %1 = arith.addi %0, %arg2 : i32
    %c0_i32 = arith.constant 0 : i32
    %c0_i32_0 = arith.constant 0 : i32
    %c0_i32_1 = arith.constant 0 : i32
    %c0_i32_2 = arith.constant 0 : i32
    %c0_i32_3 = arith.constant 0 : i32
    return %arg0, %1, %c0_i32, %c0_i32_0, %c0_i32_1, %c0_i32_2 : i32, i32, i32, i32, i32, i32
  }
  func.func @transform_1(%arg0: i32, %arg1: i32, %arg2: i32) -> (i32, i32, i32) {
    %c0_i32 = arith.constant 0 : i32
    %c0_i32_0 = arith.constant 0 : i32
    %c0_i32_1 = arith.constant 0 : i32
    %c0_i32_2 = arith.constant 0 : i32
    return %c0_i32, %c0_i32_0, %c0_i32_1 : i32, i32, i32
  }
  func.func @transform_2(%arg0: i32, %arg1: i32, %arg2: i32) -> (i32, i32) {
    %c0_i32 = arith.constant 0 : i32
    %c0_i32_0 = arith.constant 0 : i32
    %c0_i32_1 = arith.constant 0 : i32
    return %c0_i32, %c0_i32_0 : i32, i32
  }
  func.func @transform_3(%arg0: i32, %arg1: i32, %arg2: i32) -> (i32, i32, i32, i32, i32) {
    %c0_i32 = arith.constant 0 : i32
    %c0_i32_0 = arith.constant 0 : i32
    %c0_i32_1 = arith.constant 0 : i32
    %c0_i32_2 = arith.constant 0 : i32
    return %arg0, %arg1, %c0_i32, %c0_i32_0, %c0_i32_1 : i32, i32, i32, i32, i32
  }
}

</mosaic_0001>

<bundles_post_ra>
// kernel: res_block3d_forward.6
= control target key start
LH: loop header
LB: loop body
LE: loop exit
PB: predicated region body
PF: predicated region fallthrough
CT: control target
= control target key end

     0   :  { %s540_s12 = smov 0   ;;  %s542_s13 = smov 0   ;;  %s605_s0 = inlined_call_operand.vmem [shape: bf16[2,4,8,8,4], index: 0, kind: input, shape index: {}]   ;;  %s606_s1 = inlined_call_operand.vmem [shape: bf16[4,8], index: 1, kind: input, shape index: {}]   ;;  %s607_s2 = inlined_call_operand.vmem [shape: f32[1,8], index: 2, kind: input, shape index: {}]   ;;  %s608_s3 = inlined_call_operand.vmem [shape: bf16[2,4,8,8,8], index: 3, kind: output, shape index: {}]  }
   0x1   :  { %s544_s14 = smov 0   ;;  %s546_s15 = smov 0  }
   0x2   :  { %s548_s16 = smov 0  }
   0x3 LB: > { %s22_s17 = sadd.s32 1, %s510_s14  ;;  %s25_s18 = sadd.s32 1, %s514_s15  ;;  %s518_s16 = sphi %s548_s16, %s13_s16   ;;  %s514_s15 = sphi %s546_s15, %s612_s15   ;;  %s510_s14 = sphi %s544_s14, %s611_s14   ;;  %s506_s13 = sphi %s542_s13, %s610_s13   ;;  %s502_s12 = sphi %s540_s12, %s609_s12  }
   0x4   : > { %p23_p0 = scmp.ge.s32.totalorder %s22_s17, 4  ;;  %p403_p1 = scmp.ge.s32.totalorder %s518_s16, 1 }
   0x5   : > { %p157_p2 = scmp.lt.s32.totalorder %s518_s16, 9 }
   0x6   : > { %s614_s17 = smov (%p23_p0, %s22_s17), 0  ;;  %s616_s18 = smov (!%p23_p0, %s25_s18), %s514_s15 }
   0x7   : > { %p158_p3 = pnand %p403_p1, %p157_p2  ;;  %p27_p4 = scmp.ge.s32.totalorder %s616_s18, 2 }
   0x8   : > { %p189_p5 = scmp.lt.s32.totalorder (!%p158_p3), %s506_s13, 1  ;;  %p191_p6 = scmp.lt.s32.totalorder (!%p158_p3), %s502_s12, 3 }
   0x9   : > { %s618_s18 = smov (%p27_p4, %s616_s18), 0  ;;  %161 = sbr.rel (%p158_p3) target bundleno = 167 (0xa7), region = 32 }
   0xe   : > { %v216_v0 = vld [vmem:[%s606_s1] sm:$0x3]  ;;  %vm254_vm0 = vcmask 1041408   ;;  %s620_s13 = smov (!%p189_p5, %s506_s13), 1  ;;  %s622_s12 = smov (!%p191_p6, %s502_s12), 3  ;;  %vm241_vm1 = vcmask 31744  }
   0xf   : > { %v256_v1 = vsel %vm254_vm0, %v216_v0, 0  ;;  %s405_s21 = sshll.u32 %s620_s13, 5  ;;  %s404_s22 = sshll.u32 %s622_s12, 3  ;;  %v479_v6 = vld [vmem:[%s607_s2] ss:$0 sm:$0xff]  ;;  %vm295_vm2 = vcmask 60416  }
  0x10   : > { %265 = vmatpush.bf16.msra.mxu0 %v256_v1  ;;  %436 = vmatpush.bf16.msra.mxu1 %v256_v1  ;;  %s195_s23 = sadd.s32 %s405_s21, %s404_s22 }
  0x11   : > { %437 = vmatpush.bf16.msra.mxu2 %v256_v1  ;;  %438 = vmatpush.bf16.msra.mxu3 %v256_v1  ;;  %s406_s24 = sshll.u32 %s195_s23, 2 }
  0x12   : > { %s197_s27 = scalar_lea.vmem %s605_s0, %s406_s24  ;;  %s206_s5 = scalar_lea.vmem %s608_s3, %s406_s24 }
  0x13   : > { %v432_v2 = vld [vmem:[%s197_s27] sm:$0xff]  ;;  %v433_v3 = vld [vmem:[%s197_s27 + $0x8] sm:$0xff]  ;;  %v434_v4 = vld [vmem:[%s197_s27 + $0x10] sm:$0xff] }
  0x14   : > { %v435_v5 = vld [vmem:[%s197_s27 + $0x18] sm:$0xff]  ;;  %426 = vmatmul.msk.bf16.vlgmr.msra.gmra.mxu0 %vm241_vm1, %v432_v2  ;;  %427 = vmatmul.msk.bf16.vlgmr.msra.gmra.mxu1 %vm241_vm1, %v433_v3 }
  0x15   : > { %428 = vmatmul.msk.bf16.vlgmr.msra.gmra.mxu2 %vm241_vm1, %v434_v4  ;;  %429 = vmatmul.msk.bf16.vlgmr.msra.gmra.mxu3 %vm241_vm1, %v435_v5 }
  0x91   : > { %v267_v7 = vpop.f32.mrf.mxu0  ;;  %v272_v8 = vpop.f32.mrf.mxu1 }
  0x92   : > { %v268_v9 = vadd.f32 %v479_v6, %v267_v7  ;;  %v273_v10 = vadd.f32 %v479_v6, %v272_v8 }
  0x94   : > { %v287_v11 = vpack.c.bf16 %v268_v9, %v268_v9  ;;  %v289_v12 = vpack.c.bf16 %v273_v10, %v273_v10 }
  0x96   : > { %296 = vst.msk [vmem:[%s206_s5] sm:$0xf] %vm295_vm2, %v287_v11 }
  0x97   : > { %298 = vst.msk [vmem:[%s206_s5 + $0x8] sm:$0xf] %vm295_vm2, %v289_v12 }
  0x98   : > { %v277_v13 = vpop.f32.mrf.mxu2  ;;  %v282_v14 = vpop.f32.mrf.mxu3 }
  0x99   : > { %v278_v15 = vadd.f32 %v479_v6, %v277_v13  ;;  %v283_v16 = vadd.f32 %v479_v6, %v282_v14  ;;  %v269_v17 = vpop.f32.mrf.mxu0  ;;  %v274_v18 = vpop.f32.mrf.mxu1 }
  0x9a   : > { %v270_v19 = vadd.f32 %v479_v6, %v269_v17  ;;  %v275_v20 = vadd.f32 %v479_v6, %v274_v18 }
  0x9b   : > { %v291_v21 = vpack.c.bf16 %v278_v15, %v278_v15  ;;  %v293_v22 = vpack.c.bf16 %v283_v16, %v283_v16 }
  0x9c   : > { %v288_v23 = vpack.c.bf16 %v270_v19, %v270_v19  ;;  %v290_v24 = vpack.c.bf16 %v275_v20, %v275_v20 }
  0x9d   : > { %300 = vst.msk [vmem:[%s206_s5 + $0x10] sm:$0xf] %vm295_vm2, %v291_v21 }
  0x9e   : > { %302 = vst.msk [vmem:[%s206_s5 + $0x18] sm:$0xf] %vm295_vm2, %v293_v22 }
  0x9f   : > { %297 = vst.msk [vmem:[%s206_s5 + $0x4] sm:$0xf] %vm295_vm2, %v288_v23 }
  0xa0   : > { %299 = vst.msk [vmem:[%s206_s5 + $0xc] sm:$0xf] %vm295_vm2, %v290_v24  ;;  %v279_v25 = vpop.f32.mrf.mxu2  ;;  %v284_v26 = vpop.f32.mrf.mxu3 }
  0xa1   : > { %v280_v27 = vadd.f32 %v479_v6, %v279_v25  ;;  %v285_v28 = vadd.f32 %v479_v6, %v284_v26 }
  0xa3   : > { %v292_v29 = vpack.c.bf16 %v280_v27, %v280_v27  ;;  %v294_v30 = vpack.c.bf16 %v285_v28, %v285_v28 }
  0xa5   : > { %301 = vst.msk [vmem:[%s206_s5 + $0x14] sm:$0xf] %vm295_vm2, %v292_v29 }
  0xa6   : > { %303 = vst.msk [vmem:[%s206_s5 + $0x1c] sm:$0xf] %vm295_vm2, %v294_v30 }
  0xa7 PF: > { %s13_s16 = sadd.s32 1, %s518_s16   ;;  %s609_s12 = smov %s510_s14 }
  0xa8   : > { %p10_p7 = scmp.ge.s32.totalorder %s13_s16, 10   ;;  %s610_s13 = smov %s514_s15 }
  0xa9   : > { %s611_s14 = smov %s614_s17  ;;  %s612_s15 = smov %s618_s18 }
  0xaa   :  { %12 = sbr.rel (!%p10_p7) target bundleno = 3 (0x3), region = 62 }

// kernel: res_block3d_forward.5
= control target key start
LH: loop header
LB: loop body
LE: loop exit
PB: predicated region body
PF: predicated region fallthrough
CT: control target
= control target key end

     0   :  { %s1947_s12 = smov 0   ;;  %s1949_s13 = smov 0   ;;  %s2338_s0 = inlined_call_operand.vmem [shape: bf16[2,10,4,9,9,4], index: 0, kind: input, shape index: {}]   ;;  %s2339_s1 = inlined_call_operand.vmem [shape: bf16[27,4,8], index: 1, kind: input, shape index: {}]   ;;  %s2340_s2 = inlined_call_operand.vmem [shape: f32[1,8], index: 2, kind: input, shape index: {}]   ;;  %s2341_s3 = inlined_call_operand.vmem [shape: bf16[2,4,8,8,8], index: 3, kind: output, shape index: {}]  }
   0x1   :  { %s1951_s14 = smov 0   ;;  %s1953_s15 = smov 0  }
   0x2   :  { %s1955_s16 = smov 0   ;;  %s1957_s17 = smov 0  }
   0x3   :  { %s1959_s18 = smov 0  }
   0x4 LB: > { %s25_s19 = sadd.s32 1, %s1912_s15  ;;  %s28_s20 = sadd.s32 1, %s1916_s16  ;;  %s1924_s18 = sphi %s1959_s18, %s13_s18   ;;  %s1920_s17 = sphi %s1957_s17, %s2349_s17   ;;  %s1916_s16 = sphi %s1955_s16, %s2348_s16   ;;  %s1912_s15 = sphi %s1953_s15, %s2347_s15   ;;  %s1908_s14 = sphi %s1951_s14, %s2346_s14   ;;  %s1904_s13 = sphi %s1949_s13, %s2345_s13   ;;  %s1900_s12 = sphi %s1947_s12, %s2344_s12  }
   0x5   : > { %p26_p0 = scmp.ge.s32.totalorder %s25_s19, 3  ;;  %p1551_p1 = scmp.ge.s32.totalorder %s1924_s18, 1 }
   0x6   : > { %p172_p2 = scmp.lt.s32.totalorder %s1924_s18, 25  ;;  %s32_s21 = sadd.s32 1, %s1920_s17 }
   0x7   : > { %s2351_s19 = smov (%p26_p0, %s25_s19), 0  ;;  %s2353_s20 = smov (!%p26_p0, %s28_s20), %s1916_s16 }
   0x8   : > { %p173_p3 = pnand %p1551_p1, %p172_p2  ;;  %p30_p4 = scmp.ge.s32.totalorder %s2353_s20, 4 }
   0x9   : > { %s1552_s22 = sshll.u32 (!%p173_p3), %s1904_s13, 1  ;;  %p208_p6 = scmp.lt.s32.totalorder (!%p173_p3), %s1908_s14, 1 }
   0xa   : > { %s2355_s20 = smov (%p30_p4, %s2353_s20), 0  ;;  %s2357_s21 = smov (!%p30_p4, %s32_s21), %s1920_s17 }
   0xb   : > { %p34_p5 = scmp.ge.s32.totalorder %s2357_s21, 2  ;;  %176 = sbr.rel (%p173_p3) target bundleno = 332 (0x14c), region = 32 }
   0xc   : > { %s207_s23 = sadd.s32 (!%p173_p3), %s1900_s12, %s1552_s22  ;;  %p221_p7 = scmp.lt.s32.totalorder (!%p173_p3), %s1904_s13, 3 }
   0xd   : > { %s2359_s21 = smov (%p34_p5, %s2357_s21), 0  ;;  %p210_p8 = scmp.lt.s32.totalorder (!%p173_p3), %s207_s23, 9 }
   0xe   : > { %p1557_p9 = scmp.ne.s32.totalorder (!%p173_p3), %s1900_s12, 0 }
  0x10   : > { %s2361_s14 = smov (!%p208_p6, %s1908_s14), 1  ;;  %s2363_s23 = smov (!%p210_p8, %s207_s23), 9 }
  0x11   : > { %s1811_s24 = smul.u32 720, %s2361_s14  ;;  %s1555_s25 = sshll.u32 %s2361_s14, 5 }
  0x12   : > { %s2365_s13 = smov (!%p221_p7, %s1904_s13), 3  ;;  %s1810_s26 = smul.u32 72, %s2363_s23 }
  0x13   : > { %s1554_s27 = sshll.u32 %s2365_s13, 3  ;;  %232 = sbr.rel (%p1557_p9) target bundleno = 33 (0x21), region = 36 }
  0x14   : > { %s214_s28 = sadd.s32 %s1811_s24, %s1810_s26  ;;  %s225_s29 = sadd.s32 %s1555_s25, %s1554_s27 }
  0x15   : > { %s1553_s30 = sshll.u32 %s214_s28, 2  ;;  %s1556_s4 = sshll.u32 %s225_s29, 2 }
  0x16   : > { %s2000_s7 = scalar_lea.vmem %s2338_s0, %s1553_s30  ;;  %s2005_s10 = scalar_lea.vmem %s2341_s3, %s1556_s4 }
  0x18   : > { %vm233_vm0 = vcmask 64512   ;;  %v1926_v0 = vmov 0.0  }
  0x19   : > { %234 = vst.msk [vmem:[#allocation2] sm:$0xff] %vm233_vm0, %v1926_v0 }
  0x1a   : > { %235 = vst.msk [vmem:[#allocation2 + $0x8] sm:$0xff] %vm233_vm0, %v1926_v0 }
  0x1b   : > { %236 = vst.msk [vmem:[#allocation2 + $0x10] sm:$0xff] %vm233_vm0, %v1926_v0 }
  0x1c   : > { %237 = vst.msk [vmem:[#allocation2 + $0x18] sm:$0xff] %vm233_vm0, %v1926_v0 }
  0x1d   : > { %238 = vst.msk [vmem:[#allocation2 + $0x20] sm:$0xff] %vm233_vm0, %v1926_v0 }
  0x1e   : > { %239 = vst.msk [vmem:[#allocation2 + $0x28] sm:$0xff] %vm233_vm0, %v1926_v0 }
  0x1f   : > { %240 = vst.msk [vmem:[#allocation2 + $0x30] sm:$0xff] %vm233_vm0, %v1926_v0 }
  0x20   : > { %241 = vst.msk [vmem:[#allocation2 + $0x38] sm:$0xff] %vm233_vm0, %v1926_v0 }
  0x21 PF: > { %s1786_s11 = smul.u32 18, %s1900_s12  ;;  %vm295_vm1 = vcmask 1041408   ;;  %v1565_v1 = vld [vmem:[%s2000_s7 + $0x10] sm:$0xf]  ;;  %v1783_v2 = vld [vmem:[%s2000_s7 + $0x14] sm:$0xf0] }
  0x22   : > { %v1569_v3 = vld [vmem:[%s2000_s7 + $0x20] sm:$0xf]  ;;  %v1784_v4 = vld [vmem:[%s2000_s7 + $0x24] sm:$0xf0]  ;;  %v1573_v5 = vld [vmem:[%s2000_s7 + $0x30] sm:$0xf]  ;;  %v1566_v12 = vor.u32 %v1783_v2, %v1565_v1 }
  0x23   : > { %s2016_s22 = scalar_lea.vmem %s2339_s1, %s1786_s11  ;;  %v1785_v6 = vld [vmem:[%s2000_s7 + $0x34] sm:$0xf0]  ;;  %v1561_v7 = vld [vmem:[%s2000_s7] sm:$0xf]  ;;  %v1782_v10 = vld [vmem:[%s2000_s7 + $0x4] sm:$0xf0]  ;;  %v1570_v13 = vor.u32 %v1784_v4, %v1569_v3 }
  0x24   : > { %v261_v8 = vld [vmem:[%s2016_s22] sm:$0x3]  ;;  %v1610_v9 = vld [vmem:[%s2016_s22 + $0x4] sm:$0x3]  ;;  %v1624_v15 = vld [vmem:[%s2016_s22 + $0x6] sm:$0x3]  ;;  %v1574_v17 = vor.u32 %v1785_v6, %v1573_v5  ;;  %v1562_v18 = vor.u32 %v1782_v10, %v1561_v7 }
  0x25   : > { %v297_v11 = vsel %vm295_vm1, %v261_v8, 0  ;;  %v581_v14 = vsel %vm295_vm1, %v1610_v9, 0  ;;  %v1588_v16 = vld [vmem:[%s2016_s22 + $0x2] sm:$0x3]  ;;  %vm282_vm2 = vcmask 31744   ;;  %v666_v19 = vsel %vm295_vm1, %v1624_v15, 0 }
  0x26   : > { %1807 = vmatpush.bf16.msra.mxu1 %v297_v11  ;;  %1808 = vmatpush.bf16.msra.mxu2 %v297_v11  ;;  %v1654_v20 = vld [vmem:[%s2016_s22 + $0x8] sm:$0x3]  ;;  %v382_v21 = vsel %vm295_vm1, %v1588_v16, 0  ;;  %v421_v23 = vld [vmem:[%s2000_s7] sm:$0xf]  ;;  %vm1352_vm6 = vcmask 64512  }
  0x27   : > { %1809 = vmatpush.bf16.msra.mxu3 %v297_v11  ;;  %306 = vmatpush.bf16.msra.mxu0 %v297_v11  ;;  %v751_v22 = vsel %vm295_vm1, %v1654_v20, 0  ;;  %v422_v24 = vld [vmem:[%s2000_s7 + $0x4] sm:$0x1]  ;;  %v423_v25 = vld [vmem:[%s2000_s7 + $0x8] sm:$0xf]  ;;  %v445_v27 = vshrl.u32 %v421_v23, 16 }
  0x28   : > { %v424_v26 = vld [vmem:[%s2000_s7 + $0xc] sm:$0x1]  ;;  %vm441_vm3 = vsmask.f32 3328  ;;  %v448_v28 = vshll.u32 %v421_v23, 16  ;;  %v454_v29 = vshll.u32 %v422_v24, 16 }
  0x29   : > { %1576 = vmatmul.msk.bf16.vlgmr.msra.gmra.mxu1 %vm282_vm2, %v1566_v12  ;;  %1577 = vmatmul.msk.bf16.vlgmr.msra.gmra.mxu2 %vm282_vm2, %v1570_v13  ;;  %v459_v30 = vshrl.u32 %v423_v25, 16  ;;  %v462_v31 = vshll.u32 %v423_v25, 16  ;;  %v468_v32 = vshll.u32 %v424_v26, 16  ;;  %vm442_vm4 = vsmask.f32 7440  ;;  %p1779_p10 = scmp.ne.s32.totalorder %s1900_s12, 2 }
  0x2a   : > { %590 = vmatpush.bf16.msrb.mxu2 %v581_v14  ;;  %1578 = vmatmul.msk.bf16.vlgmr.msra.gmra.mxu3 %vm282_vm2, %v1574_v17  ;;  %v447_v33 = vrot.slane %v445_v27, 4  ;;  %v450_v34 = vrot.slane %v448_v28, 5  ;;  %v1706_v35 = vld [vmem:[%s2016_s22 + $0xc] sm:$0x3]  ;;  %v456_v39 = vrot.slane %v454_v29, 5  ;;  %vm2044_vm5 = vmor %vm441_vm3, %vm442_vm4 }
  0x2b   : > { %675 = vmatpush.bf16.msrb.mxu3 %v666_v19  ;;  %1575 = vmatmul.msk.bf16.vlgmr.msra.gmra.mxu0 %vm282_vm2, %v1562_v18  ;;  %v461_v36 = vrot.slane %v459_v30, 4  ;;  %v464_v37 = vrot.slane %v462_v31, 5  ;;  %v1032_v40 = vsel %vm295_vm1, %v1706_v35, 0  ;;  %v1736_v41 = vld [vmem:[%s2016_s22 + $0xe] sm:$0x3]  ;;  %v470_v44 = vrot.slane %v468_v32, 5 }
  0x2c   : > { %391 = vmatpush.bf16.msrb.mxu1 %v382_v21  ;;  %760 = vmatpush.bf16.msrb.mxu0 %v751_v22  ;;  %v451_v38 = vor.u32 %v450_v34, %v447_v33  ;;  %v1117_v45 = vsel %vm295_vm1, %v1736_v41, 0  ;;  %v1692_v46 = vld [vmem:[%s2016_s22 + $0xa] sm:$0x3]  ;;  %v1774_v47 = vld [vmem:[%s2016_s22 + $0x10] sm:$0x3] }
  0x2d   : > { %v465_v43 = vor.u32 %v464_v37, %v461_v36  ;;  %v1591_v48 = vld [vmem:[%s2000_s7 + $0x48] sm:$0xf]  ;;  %v947_v50 = vsel %vm295_vm1, %v1692_v46, 0  ;;  %v1313_v51 = vsel %vm295_vm1, %v1774_v47, 0  ;;  %v1787_v52 = vld [vmem:[%s2000_s7 + $0x4c] sm:$0xf0] }
  0x2e   : > { %1041 = vmatpush.bf16.msra.mxu2 %v1032_v40  ;;  %v452_v49 = vrot.slane %v451_v38, 4  ;;  %v425_v54 = vld [vmem:[%s2000_s7 + $0x10] sm:$0xf]  ;;  %v1791_v57 = vld [vmem:[%s2000_s7 + $0x94] sm:$0xf0]  ;;  %v1592_v6 = vor.u32 %v1787_v52, %v1591_v48 }
  0x2f   : > { %1126 = vmatpush.bf16.msra.mxu3 %v1117_v45  ;;  %v466_v53 = vrot.slane %v465_v43, 4  ;;  %v1627_v56 = vld [vmem:[%s2000_s7 + $0x90] sm:$0xf]  ;;  %v427_v58 = vld [vmem:[%s2000_s7 + $0x18] sm:$0xf]  ;;  %v473_v63 = vshrl.u32 %v425_v54, 16 }
  0x30   : > { %956 = vmatpush.bf16.msra.mxu1 %v947_v50  ;;  %1322 = vmatpush.bf16.msra.mxu0 %v1313_v51  ;;  %v457_v55 = vsel %vm2044_vm5, %v452_v49, %v456_v39  ;;  %v1657_v61 = vld [vmem:[%s2000_s7 + $0xd8] sm:$0xf]  ;;  %v1795_v62 = vld [vmem:[%s2000_s7 + $0xdc] sm:$0xf0]  ;;  %v476_v0 = vshll.u32 %v425_v54, 16  ;;  %v487_v4 = vshrl.u32 %v427_v58, 16  ;;  %v1628_v10 = vor.u32 %v1791_v57, %v1627_v56 }
  0x31   : > { %v471_v59 = vsel %vm2044_vm5, %v466_v53, %v470_v44  ;;  %v556_v60 = vunpack.c.l.b16 %v457_v55  ;;  %v426_v2 = vld [vmem:[%s2000_s7 + $0x14] sm:$0x1]  ;;  %v428_v3 = vld [vmem:[%s2000_s7 + $0x1c] sm:$0x1]  ;;  %v490_v5 = vshll.u32 %v427_v58, 16  ;;  %v475_v7 = vrot.slane %v473_v63, 4 }
  0x32   : > { %v557_v1 = vunpack.c.l.b16 %v471_v59  ;;  %v478_v8 = vrot.slane %v476_v0, 5  ;;  %v489_v11 = vrot.slane %v487_v4, 4  ;;  %v1658_v13 = vor.u32 %v1795_v62, %v1657_v61  ;;  %v429_v22 = vld [vmem:[%s2000_s7 + $0x20] sm:$0xf]  ;;  %v431_v23 = vld [vmem:[%s2000_s7 + $0x28] sm:$0xf] }
  0x33   : > { %v492_v12 = vrot.slane %v490_v5, 5  ;;  %v482_v15 = vshll.u32 %v426_v2, 16  ;;  %v496_v16 = vshll.u32 %v428_v3, 16  ;;  %v501_v24 = vshrl.u32 %v429_v22, 16  ;;  %v1595_v30 = vld [vmem:[%s2000_s7 + $0x58] sm:$0xf] }
  0x34   : > { %v564_v9 = vpack.c.b16 %v557_v1, %v556_v60  ;;  %v479_v14 = vor.u32 %v478_v8, %v475_v7  ;;  %v504_v25 = vshll.u32 %v429_v22, 16  ;;  %v515_v28 = vshrl.u32 %v431_v23, 16  ;;  %v1788_v31 = vld [vmem:[%s2000_s7 + $0x5c] sm:$0xf0]  ;;  %v1792_v35 = vld [vmem:[%s2000_s7 + $0xa4] sm:$0xf0] }
  0x35   : > { %v493_v17 = vor.u32 %v492_v12, %v489_v11  ;;  %v484_v19 = vrot.slane %v482_v15, 5  ;;  %v498_v21 = vrot.slane %v496_v16, 5  ;;  %v518_v29 = vshll.u32 %v431_v23, 16  ;;  %v1631_v34 = vld [vmem:[%s2000_s7 + $0xa0] sm:$0xf] }
  0x36   : > { %v480_v18 = vrot.slane %v479_v14, 4  ;;  %v1661_v36 = vld [vmem:[%s2000_s7 + $0xe8] sm:$0xf]  ;;  %v1796_v37 = vld [vmem:[%s2000_s7 + $0xec] sm:$0xf0]  ;;  %v503_v38 = vrot.slane %v501_v24, 4  ;;  %v1596_v45 = vor.u32 %v1788_v31, %v1595_v30  ;;  %v1632_v47 = vor.u32 %v1792_v35, %v1631_v34 }
  0x37   : > { %v494_v20 = vrot.slane %v493_v17, 4  ;;  %v506_v39 = vrot.slane %v504_v25, 5  ;;  %v517_v40 = vrot.slane %v515_v28, 4  ;;  %v520_v41 = vrot.slane %v518_v29, 5  ;;  %v430_v43 = vld [vmem:[%s2000_s7 + $0x24] sm:$0x1] }
  0x38   : > { %v485_v26 = vsel %vm2044_vm5, %v480_v18, %v484_v19  ;;  %v432_v44 = vld [vmem:[%s2000_s7 + $0x2c] sm:$0x1]  ;;  %v1662_v48 = vor.u32 %v1796_v37, %v1661_v36  ;;  %v510_v50 = vshll.u32 %v430_v43, 16  ;;  %v433_v53 = vld [vmem:[%s2000_s7 + $0x30] sm:$0xf] }
  0x39   : > { %1605 = vmatmul.msk.bf16.vlgmr.msrb.gmra.mxu1 %vm282_vm2, %v1592_v6  ;;  %1611 = vmatmul.msk.bf16.vlgmr.msrb.gmra.mxu2 %vm282_vm2, %v564_v9  ;;  %v499_v27 = vsel %vm2044_vm5, %v494_v20, %v498_v21  ;;  %v558_v32 = vunpack.c.l.b16 %v485_v26  ;;  %v507_v49 = vor.u32 %v506_v39, %v503_v38  ;;  %v521_v51 = vor.u32 %v520_v41, %v517_v40  ;;  %v435_v54 = vld [vmem:[%s2000_s7 + $0x38] sm:$0xf]  ;;  %v434_v5 = vld [vmem:[%s2000_s7 + $0x34] sm:$0x1]  ;;  %v436_v6 = vld [vmem:[%s2000_s7 + $0x3c] sm:$0x1] }
  0x3a   : > { %1641 = vmatmul.msk.bf16.vlgmr.msrb.gmra.mxu3 %vm282_vm2, %v1628_v10  ;;  %v559_v33 = vunpack.c.l.b16 %v499_v27  ;;  %v524_v52 = vshll.u32 %v432_v44, 16  ;;  %v512_v56 = vrot.slane %v510_v50, 5  ;;  %v529_v59 = vshrl.u32 %v433_v53, 16  ;;  %v1599_v7 = vld [vmem:[%s2000_s7 + $0x68] sm:$0xf] }
  0x3b   : > { %1671 = vmatmul.msk.bf16.vlgmr.msrb.gmra.mxu0 %vm282_vm2, %v1658_v13  ;;  %v508_v55 = vrot.slane %v507_v49, 4  ;;  %v522_v57 = vrot.slane %v521_v51, 4  ;;  %v532_v60 = vshll.u32 %v433_v53, 16  ;;  %v543_v61 = vshrl.u32 %v435_v54, 16  ;;  %v1789_v10 = vld [vmem:[%s2000_s7 + $0x6c] sm:$0xf0] }
  0x3c   : > { %v565_v46 = vpack.c.b16 %v559_v33, %v558_v32  ;;  %v526_v58 = vrot.slane %v524_v52, 5  ;;  %v546_v62 = vshll.u32 %v435_v54, 16  ;;  %v531_v1 = vrot.slane %v529_v59, 4  ;;  %v1635_v11 = vld [vmem:[%s2000_s7 + $0xb0] sm:$0xf] }
  0x3d   : > { %v513_v63 = vsel %vm2044_vm5, %v508_v55, %v512_v56  ;;  %v534_v2 = vrot.slane %v532_v60, 5  ;;  %v545_v3 = vrot.slane %v543_v61, 4  ;;  %v1793_v12 = vld [vmem:[%s2000_s7 + $0xb4] sm:$0xf0]  ;;  %v1797_v14 = vld [vmem:[%s2000_s7 + $0xfc] sm:$0xf0]  ;;  %v1600_v19 = vor.u32 %v1789_v10, %v1599_v7 }
  0x3e   : > { %v527_v0 = vsel %vm2044_vm5, %v522_v57, %v526_v58  ;;  %v548_v4 = vrot.slane %v546_v62, 5  ;;  %v560_v8 = vunpack.c.l.b16 %v513_v63  ;;  %v1665_v13 = vld [vmem:[%s2000_s7 + $0xf8] sm:$0xf]  ;;  %v538_v16 = vshll.u32 %v434_v5, 16  ;;  %v1675_v27 = vld [vmem:[%s2000_s7 + $0x90] sm:$0xf] }
  0x3f   : > { %v561_v9 = vunpack.c.l.b16 %v527_v0  ;;  %v535_v15 = vor.u32 %v534_v2, %v531_v1  ;;  %v552_v18 = vshll.u32 %v436_v6, 16  ;;  %v1636_v21 = vor.u32 %v1793_v12, %v1635_v11  ;;  %v1677_v28 = vld [vmem:[%s2000_s7 + $0x98] sm:$0xf]  ;;  %v1757_v29 = vld [vmem:[%s2000_s7 + $0x8] sm:$0xf] }
  0x40   : > { %v549_v17 = vor.u32 %v548_v4, %v545_v3  ;;  %v1666_v22 = vor.u32 %v1797_v14, %v1665_v13  ;;  %v540_v24 = vrot.slane %v538_v16, 5  ;;  %v1759_v30 = vld [vmem:[%s2000_s7 + $0x10] sm:$0xf]  ;;  %v811_v33 = vshrl.u32 %v1675_v27, 16  ;;  %v1603_v41 = vld [vmem:[%s2000_s7 + $0x78] sm:$0xf] }
  0x41   : > { %v566_v20 = vpack.c.b16 %v561_v9, %v560_v8  ;;  %v536_v23 = vrot.slane %v535_v15, 4  ;;  %v554_v26 = vrot.slane %v552_v18, 5  ;;  %v814_v34 = vshll.u32 %v1675_v27, 16  ;;  %v1790_v43 = vld [vmem:[%s2000_s7 + $0x7c] sm:$0xf0] }
  0x42   : > { %v550_v25 = vrot.slane %v549_v17, 4  ;;  %v825_v35 = vshrl.u32 %v1677_v28, 16  ;;  %v828_v36 = vshll.u32 %v1677_v28, 16  ;;  %v1177_v37 = vshrl.u32 %v1757_v29, 16  ;;  %v1678_v51 = vld [vmem:[%s2000_s7 + $0x9c] sm:$0x1] }
  0x43   : > { %v541_v31 = vsel %vm2044_vm5, %v536_v23, %v540_v24  ;;  %v1180_v38 = vshll.u32 %v1757_v29, 16  ;;  %v1191_v39 = vshrl.u32 %v1759_v30, 16  ;;  %v1194_v40 = vshll.u32 %v1759_v30, 16  ;;  %v1639_v56 = vld [vmem:[%s2000_s7 + $0xc0] sm:$0xf] }
  0x44   : > { %v555_v32 = vsel %vm2044_vm5, %v550_v25, %v554_v26  ;;  %v562_v44 = vunpack.c.l.b16 %v541_v31  ;;  %v827_v49 = vrot.slane %v825_v35, 4  ;;  %v830_v50 = vrot.slane %v828_v36, 5  ;;  %v1758_v57 = vld [vmem:[%s2000_s7 + $0xc] sm:$0x1]  ;;  %v1760_v58 = vld [vmem:[%s2000_s7 + $0x14] sm:$0x1] }
  0x45   : > { %v1179_v52 = vrot.slane %v1177_v37, 4  ;;  %v1182_v53 = vrot.slane %v1180_v38, 5  ;;  %v1193_v54 = vrot.slane %v1191_v39, 4  ;;  %v1196_v55 = vrot.slane %v1194_v40, 5  ;;  %v1794_v61 = vld [vmem:[%s2000_s7 + $0xc4] sm:$0xf0] }
  0x46   : > { %v1604_v59 = vor.u32 %v1790_v43, %v1603_v41  ;;  %v1669_v62 = vld [vmem:[%s2000_s7 + $0x108] sm:$0xf]  ;;  %v1798_v63 = vld [vmem:[%s2000_s7 + $0x10c] sm:$0xf0]  ;;  %v831_v2 = vor.u32 %v830_v50, %v827_v49  ;;  %v834_v3 = vshll.u32 %v1678_v51, 16  ;;  %v1186_v5 = vshll.u32 %v1758_v57, 16 }
  0x47   : > { %v1183_v4 = vor.u32 %v1182_v53, %v1179_v52  ;;  %v1197_v6 = vor.u32 %v1196_v55, %v1193_v54  ;;  %v1200_v7 = vshll.u32 %v1760_v58, 16  ;;  %v1640_v8 = vor.u32 %v1794_v61, %v1639_v56  ;;  %v1679_v10 = vld [vmem:[%s2000_s7 + $0xa0] sm:$0xf]  ;;  %v1681_v11 = vld [vmem:[%s2000_s7 + $0xa8] sm:$0xf] }
  0x48   : > { %v1670_v9 = vor.u32 %v1798_v63, %v1669_v62  ;;  %v832_v14 = vrot.slane %v831_v2, 4  ;;  %v836_v15 = vrot.slane %v834_v3, 5  ;;  %v1188_v17 = vrot.slane %v1186_v5, 5  ;;  %v1761_v24 = vld [vmem:[%s2000_s7 + $0x18] sm:$0xf] }
  0x49   : > { %1606 = vmatmul.msk.bf16.gmra.mxu1 %vm282_vm2, %v1596_v45  ;;  %1612 = vmatmul.msk.bf16.gmra.mxu2 %vm282_vm2, %v565_v46  ;;  %v563_v45 = vunpack.c.l.b16 %v555_v32  ;;  %v1676_v46 = vld [vmem:[%s2000_s7 + $0x94] sm:$0x1]  ;;  %v1184_v16 = vrot.slane %v1183_v4, 4  ;;  %v1198_v18 = vrot.slane %v1197_v6, 4  ;;  %v856_v23 = vshll.u32 %v1681_v11, 16 }
  0x4a   : > { %1642 = vmatmul.msk.bf16.gmra.mxu3 %vm282_vm2, %v1632_v47  ;;  %v813_v47 = vrot.slane %v811_v33, 4  ;;  %v820_v1 = vshll.u32 %v1676_v46, 16  ;;  %v1763_v25 = vld [vmem:[%s2000_s7 + $0x20] sm:$0xf]  ;;  %v837_v27 = vsel %vm2044_vm5, %v832_v14, %v836_v15  ;;  %v1680_v30 = vld [vmem:[%s2000_s7 + $0xa4] sm:$0x1] }
  0x4b   : > { %1672 = vmatmul.msk.bf16.gmra.mxu0 %vm282_vm2, %v1662_v48  ;;  %v816_v48 = vrot.slane %v814_v34, 5  ;;  %v567_v60 = vpack.c.b16 %v563_v45, %v562_v44  ;;  %v1189_v28 = vsel %vm2044_vm5, %v1184_v16, %v1188_v17  ;;  %v858_v34 = vrot.slane %v856_v23, 5  ;;  %v1682_v35 = vld [vmem:[%s2000_s7 + $0xac] sm:$0x1]  ;;  %v1709_v43 = vld [vmem:[%s2000_s7 + $0x8] sm:$0xf] }
  0x4c   : > { %v822_v13 = vrot.slane %v820_v1, 5  ;;  %v1205_v36 = vshrl.u32 %v1761_v24, 16  ;;  %v1208_v37 = vshll.u32 %v1761_v24, 16  ;;  %v1219_v38 = vshrl.u32 %v1763_v25, 16  ;;  %v1799_v44 = vld [vmem:[%s2000_s7 + $0xc] sm:$0xf0] }
  0x4d   : > { %v817_v0 = vor.u32 %v816_v48, %v813_v47  ;;  %v1222_v39 = vshll.u32 %v1763_v25, 16  ;;  %v923_v41 = vunpack.c.l.b16 %v837_v27  ;;  %v1288_v45 = vunpack.c.l.b16 %v1189_v28  ;;  %v1739_v47 = vld [vmem:[%s2000_s7 + $0x50] sm:$0xf]  ;;  %v1803_v48 = vld [vmem:[%s2000_s7 + $0x54] sm:$0xf0] }
  0x4e   : > { %v848_v50 = vshll.u32 %v1680_v30, 16  ;;  %v862_v52 = vshll.u32 %v1682_v35, 16  ;;  %v1207_v53 = vrot.slane %v1205_v36, 4  ;;  %v1210_v54 = vrot.slane %v1208_v37, 5  ;;  %v1762_v57 = vld [vmem:[%s2000_s7 + $0x1c] sm:$0x1] }
  0x4f   : > { %v818_v12 = vrot.slane %v817_v0, 4  ;;  %v1221_v55 = vrot.slane %v1219_v38, 4  ;;  %v1224_v56 = vrot.slane %v1222_v39, 5  ;;  %v1764_v58 = vld [vmem:[%s2000_s7 + $0x24] sm:$0x1]  ;;  %v1740_v61 = vor.u32 %v1803_v48, %v1739_v47 }
  0x50   : > { %v850_v0 = vrot.slane %v848_v50, 5  ;;  %v864_v2 = vrot.slane %v862_v52, 5  ;;  %v1211_v3 = vor.u32 %v1210_v54, %v1207_v53  ;;  %v1214_v4 = vshll.u32 %v1762_v57, 16  ;;  %v1713_v27 = vld [vmem:[%s2000_s7 + $0x18] sm:$0xf] }
  0x51   : > { %v823_v26 = vsel %vm2044_vm5, %v818_v12, %v822_v13  ;;  %v1225_v5 = vor.u32 %v1224_v56, %v1221_v55  ;;  %v1228_v6 = vshll.u32 %v1764_v58, 16  ;;  %v1767_v12 = vld [vmem:[%s2000_s7 + $0x30] sm:$0xf]  ;;  %v1800_v28 = vld [vmem:[%s2000_s7 + $0x1c] sm:$0xf0] }
  0x52   : > { %v922_v40 = vunpack.c.l.b16 %v823_v26  ;;  %v1212_v13 = vrot.slane %v1211_v3, 4  ;;  %v1216_v14 = vrot.slane %v1214_v4, 5  ;;  %v1247_v23 = vshrl.u32 %v1767_v12, 16  ;;  %v1686_v36 = vld [vmem:[%s2000_s7 + $0xbc] sm:$0x1] }
  0x53   : > { %v1226_v15 = vrot.slane %v1225_v5, 4  ;;  %v1230_v16 = vrot.slane %v1228_v6, 5  ;;  %v1250_v24 = vshll.u32 %v1767_v12, 16  ;;  %v1714_v47 = vor.u32 %v1800_v28, %v1713_v27  ;;  %v1743_v48 = vld [vmem:[%s2000_s7 + $0x60] sm:$0xf] }
  0x54   : > { %v1249_v39 = vrot.slane %v1247_v23, 4  ;;  %v890_v53 = vshll.u32 %v1686_v36, 16  ;;  %v1687_v4 = vld [vmem:[%s2000_s7 + $0xc0] sm:$0xf]  ;;  %v1689_v5 = vld [vmem:[%s2000_s7 + $0xc8] sm:$0xf] }
  0x55   : > { %v1231_v30 = vsel %vm2044_vm5, %v1226_v15, %v1230_v16  ;;  %v1769_v6 = vld [vmem:[%s2000_s7 + $0x38] sm:$0xf]  ;;  %v895_v12 = vshrl.u32 %v1687_v4, 16  ;;  %v912_v15 = vshll.u32 %v1689_v5, 16  ;;  %v1801_v23 = vld [vmem:[%s2000_s7 + $0x2c] sm:$0xf0] }
  0x56   : > { %v1261_v16 = vshrl.u32 %v1769_v6, 16  ;;  %v1688_v28 = vld [vmem:[%s2000_s7 + $0xc4] sm:$0x1] }
  0x59   : > { %1607 = vmatmul.msk.bf16.gmra.mxu1 %vm282_vm2, %v1600_v19  ;;  %1613 = vmatmul.msk.bf16.gmra.mxu2 %vm282_vm2, %v566_v20  ;;  %v1202_v19 = vrot.slane %v1200_v7, 5  ;;  %v839_v20 = vshrl.u32 %v1679_v10, 16  ;;  %v1683_v7 = vld [vmem:[%s2000_s7 + $0xb0] sm:$0xf] }
  0x5a   : > { %1643 = vmatmul.msk.bf16.gmra.mxu3 %vm282_vm2, %v1636_v21  ;;  %v842_v21 = vshll.u32 %v1679_v10, 16  ;;  %v867_v17 = vshrl.u32 %v1683_v7, 16 }
  0x5b   : > { %1673 = vmatmul.msk.bf16.gmra.mxu0 %vm282_vm2, %v1666_v22  ;;  %v853_v22 = vshrl.u32 %v1681_v11, 16  ;;  %v1203_v29 = vsel %vm2044_vm5, %v1198_v18, %v1202_v19  ;;  %v841_v31 = vrot.slane %v839_v20, 4  ;;  %v1765_v11 = vld [vmem:[%s2000_s7 + $0x28] sm:$0xf]  ;;  %v870_v18 = vshll.u32 %v1683_v7, 16 }
  0x5c   : > { %v844_v32 = vrot.slane %v842_v21, 5  ;;  %v1289_v46 = vunpack.c.l.b16 %v1203_v29  ;;  %v1233_v21 = vshrl.u32 %v1765_v11, 16  ;;  %v1217_v29 = vsel %vm2044_vm5, %v1212_v13, %v1216_v14  ;;  %v1771_v7 = vld [vmem:[%s2000_s7 + $0x40] sm:$0xf] }
  0x5d   : > { %v855_v33 = vrot.slane %v853_v22, 4  ;;  %v1236_v22 = vshll.u32 %v1765_v11, 16  ;;  %v898_v13 = vshll.u32 %v1687_v4, 16  ;;  %v909_v14 = vshrl.u32 %v1689_v5, 16  ;;  %v1802_v4 = vld [vmem:[%s2000_s7 + $0x3c] sm:$0xf0] }
  0x5e   : > { %v845_v49 = vor.u32 %v844_v32, %v841_v31  ;;  %v1296_v62 = vpack.c.b16 %v1289_v46, %v1288_v45  ;;  %v1684_v31 = vld [vmem:[%s2000_s7 + $0xb4] sm:$0x1]  ;;  %v869_v32 = vrot.slane %v867_v17, 4  ;;  %v1235_v37 = vrot.slane %v1233_v21, 4 }
  0x5f   : > { %v859_v51 = vor.u32 %v858_v34, %v855_v33  ;;  %v872_v33 = vrot.slane %v870_v18, 5  ;;  %v1238_v38 = vrot.slane %v1236_v22, 5  ;;  %v1768_v45 = vld [vmem:[%s2000_s7 + $0x34] sm:$0x1]  ;;  %v1264_v17 = vshll.u32 %v1769_v6, 16 }
  0x60   : > { %v846_v63 = vrot.slane %v845_v49, 4  ;;  %v1804_v49 = vld [vmem:[%s2000_s7 + $0x64] sm:$0xf0]  ;;  %v1256_v57 = vshll.u32 %v1768_v45, 16  ;;  %v1275_v18 = vshrl.u32 %v1771_v7, 16 }
  0x61   : > { %v860_v1 = vrot.slane %v859_v51, 4  ;;  %v873_v50 = vor.u32 %v872_v33, %v869_v32  ;;  %v876_v51 = vshll.u32 %v1684_v31, 16  ;;  %v1239_v54 = vor.u32 %v1238_v38, %v1235_v37  ;;  %v1690_v33 = vld [vmem:[%s2000_s7 + $0xcc] sm:$0x1]  ;;  %v1770_v38 = vld [vmem:[%s2000_s7 + $0x3c] sm:$0x1] }
  0x62   : > { %v1744_v58 = vor.u32 %v1804_v49, %v1743_v48  ;;  %v1258_v3 = vrot.slane %v1256_v57, 5  ;;  %v911_v31 = vrot.slane %v909_v14, 4  ;;  %v914_v32 = vrot.slane %v912_v15, 5 }
  0x63   : > { %v865_v10 = vsel %vm2044_vm5, %v860_v1, %v864_v2  ;;  %v1277_v36 = vrot.slane %v1275_v18, 4  ;;  %v918_v48 = vshll.u32 %v1690_v33, 16 }
  0x64   : > { %v925_v26 = vunpack.c.l.b16 %v865_v10 }
  0x69   : > { %1608 = vmatmul.msk.bf16.gmra.mxu1 %vm282_vm2, %v1604_v59  ;;  %1614 = vmatmul.msk.bf16.gmra.mxu2 %vm282_vm2, %v567_v60  ;;  %v930_v59 = vpack.c.b16 %v923_v41, %v922_v40  ;;  %v1710_v60 = vor.u32 %v1799_v44, %v1709_v43  ;;  %v1252_v40 = vrot.slane %v1250_v24, 5  ;;  %v1290_v41 = vunpack.c.l.b16 %v1217_v29  ;;  %v1766_v44 = vld [vmem:[%s2000_s7 + $0x2c] sm:$0x1]  ;;  %v1747_v24 = vld [vmem:[%s2000_s7 + $0x70] sm:$0xf] }
  0x6a   : > { %1644 = vmatmul.msk.bf16.gmra.mxu3 %vm282_vm2, %v1640_v8  ;;  %v1685_v8 = vld [vmem:[%s2000_s7 + $0xb8] sm:$0xf]  ;;  %v1291_v43 = vunpack.c.l.b16 %v1231_v30  ;;  %v1242_v55 = vshll.u32 %v1766_v44, 16  ;;  %v897_v29 = vrot.slane %v895_v12, 4  ;;  %v900_v30 = vrot.slane %v898_v13, 5 }
  0x6b   : > { %1674 = vmatmul.msk.bf16.gmra.mxu0 %vm282_vm2, %v1670_v9  ;;  %v851_v9 = vsel %vm2044_vm5, %v846_v63, %v850_v0  ;;  %v881_v19 = vshrl.u32 %v1685_v8, 16  ;;  %v884_v20 = vshll.u32 %v1685_v8, 16  ;;  %v1253_v56 = vor.u32 %v1252_v40, %v1249_v39  ;;  %v1772_v39 = vld [vmem:[%s2000_s7 + $0x44] sm:$0x1] }
  0x6c   : > { %v924_v25 = vunpack.c.l.b16 %v851_v9  ;;  %v892_v63 = vrot.slane %v890_v53, 5  ;;  %v1240_v0 = vrot.slane %v1239_v54, 4  ;;  %v1244_v1 = vrot.slane %v1242_v55, 5 }
  0x6d   : > { %v883_v34 = vrot.slane %v881_v19, 4  ;;  %v886_v35 = vrot.slane %v884_v20, 5  ;;  %v1254_v2 = vrot.slane %v1253_v56, 4  ;;  %v1278_v19 = vshll.u32 %v1771_v7, 16  ;;  %v1717_v20 = vld [vmem:[%s2000_s7 + $0x28] sm:$0xf] }
  0x6e   : > { %v931_v46 = vpack.c.b16 %v925_v26, %v924_v25  ;;  %v1245_v10 = vsel %vm2044_vm5, %v1240_v0, %v1244_v1  ;;  %v1805_v25 = vld [vmem:[%s2000_s7 + $0x74] sm:$0xf0]  ;;  %v901_v45 = vor.u32 %v900_v30, %v897_v29  ;;  %v920_v56 = vrot.slane %v918_v48, 5  ;;  %v1751_v7 = vld [vmem:[%s2000_s7 + $0x80] sm:$0xf] }
  0x6f   : > { %v887_v52 = vor.u32 %v886_v35, %v883_v34  ;;  %v1259_v11 = vsel %vm2044_vm5, %v1254_v2, %v1258_v3  ;;  %v1292_v26 = vunpack.c.l.b16 %v1245_v10  ;;  %v1263_v34 = vrot.slane %v1261_v16, 4  ;;  %v1721_v3 = vld [vmem:[%s2000_s7 + $0x38] sm:$0xf] }
  0x70   : > { %v1293_v27 = vunpack.c.l.b16 %v1259_v11  ;;  %v1266_v35 = vrot.slane %v1264_v17, 5  ;;  %v1280_v37 = vrot.slane %v1278_v19, 5  ;;  %v902_v53 = vrot.slane %v901_v45, 4 }
  0x71   : > { %v1722_v10 = vor.u32 %v1802_v4, %v1721_v3 }
  0x72   : > { %v1298_v44 = vpack.c.b16 %v1293_v27, %v1292_v26  ;;  %v1267_v49 = vor.u32 %v1266_v35, %v1263_v34 }
  0x74   : > { %v1268_v57 = vrot.slane %v1267_v49, 4 }
  0x79   : > { %1693 = vmatmul.msk.bf16.vlgmr.msra.gmra.mxu1 %vm282_vm2, %v930_v59  ;;  %1723 = vmatmul.msk.bf16.vlgmr.msra.gmra.mxu2 %vm282_vm2, %v1710_v60  ;;  %v1297_v59 = vpack.c.b16 %v1291_v43, %v1290_v41  ;;  %v874_v60 = vrot.slane %v873_v50, 4  ;;  %v1718_v41 = vor.u32 %v1801_v23, %v1717_v20  ;;  %v1748_v43 = vor.u32 %v1805_v25, %v1747_v24 }
  0x7a   : > { %1753 = vmatmul.msk.bf16.vlgmr.msra.gmra.mxu3 %vm282_vm2, %v1740_v61  ;;  %v878_v61 = vrot.slane %v876_v51, 5  ;;  %v1270_v50 = vshll.u32 %v1770_v38, 16  ;;  %v1281_v51 = vor.u32 %v1280_v37, %v1277_v36 }
  0x7b   : > { %1775 = vmatmul.msk.bf16.vlgmr.msra.gmra.mxu0 %vm282_vm2, %v1296_v62  ;;  %v888_v62 = vrot.slane %v887_v52, 4  ;;  %v1284_v52 = vshll.u32 %v1772_v39, 16 }
  0x7c   : > { %v879_v8 = vsel %vm2044_vm5, %v874_v60, %v878_v61 }
  0x7d   : > { %v893_v9 = vsel %vm2044_vm5, %v888_v62, %v892_v63  ;;  %v926_v21 = vunpack.c.l.b16 %v879_v8  ;;  %v1286_v60 = vrot.slane %v1284_v52, 5  ;;  %v1806_v8 = vld [vmem:[%s2000_s7 + $0x84] sm:$0xf0] }
  0x7e   : > { %v927_v22 = vunpack.c.l.b16 %v893_v9  ;;  %v1752_v12 = vor.u32 %v1806_v8, %v1751_v7 }
  0x80   : > { %v932_v40 = vpack.c.b16 %v927_v22, %v926_v21 }
  0x89   : > { %1694 = vmatmul.msk.bf16.gmra.mxu1 %vm282_vm2, %v931_v46  ;;  %1724 = vmatmul.msk.bf16.gmra.mxu2 %vm282_vm2, %v1714_v47  ;;  %v904_v46 = vshll.u32 %v1688_v28, 16  ;;  %v915_v47 = vor.u32 %v914_v32, %v911_v31 }
  0x8a   : > { %1754 = vmatmul.msk.bf16.gmra.mxu3 %vm282_vm2, %v1744_v58  ;;  %v1272_v58 = vrot.slane %v1270_v50, 5 }
  0x8b   : > { %1776 = vmatmul.msk.bf16.gmra.mxu0 %vm282_vm2, %v1297_v59  ;;  %v906_v54 = vrot.slane %v904_v46, 5  ;;  %v916_v55 = vrot.slane %v915_v47, 4  ;;  %v1282_v59 = vrot.slane %v1281_v51, 4  ;;  %v242_v47 = vld [vmem:[#allocation2] sm:$0xff] }
  0x8c   : > { %v1273_v63 = vsel %vm2044_vm5, %v1268_v57, %v1272_v58 }
  0x8d   : > { %v907_v61 = vsel %vm2044_vm5, %v902_v53, %v906_v54  ;;  %v921_v62 = vsel %vm2044_vm5, %v916_v55, %v920_v56  ;;  %v1287_v0 = vsel %vm2044_vm5, %v1282_v59, %v1286_v60  ;;  %v1294_v5 = vunpack.c.l.b16 %v1273_v63  ;;  %v243_v55 = vld [vmem:[#allocation2 + $0x8] sm:$0xff] }
  0x8e   : > { %v928_v1 = vunpack.c.l.b16 %v907_v61  ;;  %v929_v2 = vunpack.c.l.b16 %v921_v62  ;;  %v1295_v6 = vunpack.c.l.b16 %v1287_v0 }
  0x90   : > { %v933_v9 = vpack.c.b16 %v929_v2, %v928_v1  ;;  %v1299_v13 = vpack.c.b16 %v1295_v6, %v1294_v5  ;;  %v244_v1 = vld [vmem:[#allocation2 + $0x10] sm:$0xff] }
  0x99   : > { %1695 = vmatmul.msk.bf16.gmra.mxu1 %vm282_vm2, %v932_v40  ;;  %1725 = vmatmul.msk.bf16.gmra.mxu2 %vm282_vm2, %v1718_v41 }
  0x9a   : > { %1755 = vmatmul.msk.bf16.gmra.mxu3 %vm282_vm2, %v1748_v43 }
  0x9b   : > { %1777 = vmatmul.msk.bf16.gmra.mxu0 %vm282_vm2, %v1298_v44 }
  0xa6   : > { %v313_v11 = vpop.f32.mrf.mxu1 }
  0xa7   : > { %v330_v4 = vadd.f32 %v313_v11, %v244_v1  ;;  %v247_v1 = vld [vmem:[#allocation2 + $0x28] sm:$0xff] }
  0xa8   : > { %v308_v14 = vpop.f32.mrf.mxu0 }
  0xa9   : > { %1696 = vmatmul.msk.bf16.gmra.mxu1 %vm282_vm2, %v933_v9  ;;  %1726 = vmatmul.msk.bf16.gmra.mxu2 %vm282_vm2, %v1722_v10  ;;  %v328_v49 = vadd.f32 %v308_v14, %v242_v47 }
  0xaa   : > { %1756 = vmatmul.msk.bf16.gmra.mxu3 %vm282_vm2, %v1752_v12 }
  0xab   : > { %1778 = vmatmul.msk.bf16.gmra.mxu0 %vm282_vm2, %v1299_v13 }
  0xac   : > { %v2217_v42 = vpop.f32.mrf.mxu2 }
  0xad   : > { %v2219_v15 = vpop.f32.mrf.mxu3 }
  0xae   : > { %v2221_v16 = vpop.f32.mrf.mxu1 }
  0xb0   : > { %v310_v17 = vpop.f32.mrf.mxu0 }
  0xb1   : > { %v329_v57 = vadd.f32 %v310_v17, %v243_v55  ;;  %v246_v55 = vld [vmem:[#allocation2 + $0x20] sm:$0xff] }
  0xb4   : > { %v2223_v18 = vpop.f32.mrf.mxu2 }
  0xb5   : > { %v2225_v19 = vpop.f32.mrf.mxu3 }
  0xb6   : > { %v393_v20 = vpop.f32.mrf.mxu1 }
  0xb7   : > { %v413_v52 = vadd.f32 %v393_v20, %v328_v49  ;;  %v245_v20 = vld [vmem:[#allocation2 + $0x18] sm:$0xff] }
  0xb8   : > { %v762_v21 = vpop.f32.mrf.mxu0 }
  0xbc   : > { %v592_v22 = vpop.f32.mrf.mxu2 }
  0xbd   : > { %v677_v23 = vpop.f32.mrf.mxu3  ;;  %v612_v54 = vadd.f32 %v592_v22, %v413_v52 }
  0xbe   : > { %v395_v24 = vpop.f32.mrf.mxu1 }
  0xbf   : > { %v697_v58 = vadd.f32 %v677_v23, %v612_v54  ;;  %v414_v61 = vadd.f32 %v395_v24, %v329_v57  ;;  %v331_v23 = vadd.f32 %v2221_v16, %v245_v20 }
  0xc0   : > { %v764_v25 = vpop.f32.mrf.mxu0 }
  0xc1   : > { %v782_v0 = vadd.f32 %v762_v21, %v697_v58  ;;  %v332_v58 = vadd.f32 %v2217_v42, %v246_v55  ;;  %v333_v42 = vadd.f32 %v2223_v18, %v247_v1 }
  0xc4   : > { %v594_v26 = vpop.f32.mrf.mxu2 }
  0xc5   : > { %v679_v27 = vpop.f32.mrf.mxu3  ;;  %v613_v63 = vadd.f32 %v594_v26, %v414_v61 }
  0xc6   : > { %v398_v28 = vpop.f32.mrf.mxu1 }
  0xc7   : > { %v698_v5 = vadd.f32 %v679_v27, %v613_v63  ;;  %v415_v9 = vadd.f32 %v398_v28, %v330_v4 }
  0xc8   : > { %v2227_v29 = vpop.f32.mrf.mxu0 }
  0xc9   : > { %v783_v17 = vadd.f32 %v764_v25, %v698_v5 }
  0xcc   : > { %v597_v30 = vpop.f32.mrf.mxu2 }
  0xcd   : > { %v682_v31 = vpop.f32.mrf.mxu3  ;;  %v614_v13 = vadd.f32 %v597_v30, %v415_v9  ;;  %v248_v9 = vld [vmem:[#allocation2 + $0x30] sm:$0xff] }
  0xce   : > { %v400_v32 = vpop.f32.mrf.mxu1  ;;  %v334_v18 = vadd.f32 %v2219_v15, %v248_v9 }
  0xcf   : > { %v699_v24 = vadd.f32 %v682_v31, %v614_v13  ;;  %v416_v47 = vadd.f32 %v400_v32, %v331_v23  ;;  %v249_v23 = vld [vmem:[#allocation2 + $0x38] sm:$0xff] }
  0xd0   : > { %v2229_v33 = vpop.f32.mrf.mxu0  ;;  %v335_v15 = vadd.f32 %v2225_v19, %v249_v23 }
  0xd1   : > { %v784_v30 = vadd.f32 %v2227_v29, %v699_v24 }
  0xd4   : > { %v599_v34 = vpop.f32.mrf.mxu2 }
  0xd5   : > { %v2231_v35 = vpop.f32.mrf.mxu3  ;;  %v615_v52 = vadd.f32 %v599_v34, %v416_v47 }
  0xd6   : > { %v2233_v36 = vpop.f32.mrf.mxu1 }
  0xd7   : > { %v700_v16 = vadd.f32 %v2231_v35, %v615_v52  ;;  %v417_v32 = vadd.f32 %v2233_v36, %v332_v58 }
  0xd8   : > { %v2235_v37 = vpop.f32.mrf.mxu0 }
  0xd9   : > { %v785_v29 = vadd.f32 %v2229_v33, %v700_v16 }
  0xdc   : > { %v2237_v38 = vpop.f32.mrf.mxu2 }
  0xdd   : > { %v2239_v39 = vpop.f32.mrf.mxu3  ;;  %v616_v34 = vadd.f32 %v2237_v38, %v417_v32 }
  0xde   : > { %v2241_v40 = vpop.f32.mrf.mxu1 }
  0xdf   : > { %v701_v35 = vadd.f32 %v2239_v39, %v616_v34  ;;  %v418_v36 = vadd.f32 %v2241_v40, %v333_v42 }
  0xe0   : > { %v2243_v41 = vpop.f32.mrf.mxu0 }
  0xe1   : > { %v786_v33 = vadd.f32 %v2235_v37, %v701_v35 }
  0xe4   : > { %v2245_v43 = vpop.f32.mrf.mxu2 }
  0xe5   : > { %v2247_v44 = vpop.f32.mrf.mxu3  ;;  %v617_v38 = vadd.f32 %v2245_v43, %v418_v36 }
  0xe6   : > { %v2249_v45 = vpop.f32.mrf.mxu1 }
  0xe7   : > { %v702_v39 = vadd.f32 %v2247_v44, %v617_v38  ;;  %v419_v40 = vadd.f32 %v2249_v45, %v334_v18 }
  0xe8   : > { %v2251_v46 = vpop.f32.mrf.mxu0 }
  0xe9   : > { %v787_v37 = vadd.f32 %v2243_v41, %v702_v39 }
  0xec   : > { %v2253_v48 = vpop.f32.mrf.mxu2 }
  0xed   : > { %v2255_v50 = vpop.f32.mrf.mxu3  ;;  %v618_v43 = vadd.f32 %v2253_v48, %v419_v40 }
  0xee   : > { %v2257_v51 = vpop.f32.mrf.mxu1 }
  0xef   : > { %v703_v44 = vadd.f32 %v2255_v50, %v618_v43  ;;  %v420_v45 = vadd.f32 %v2257_v51, %v335_v15 }
  0xf0   : > { %v2259_v53 = vpop.f32.mrf.mxu0 }
  0xf1   : > { %v788_v41 = vadd.f32 %v2251_v46, %v703_v44 }
  0xf4   : > { %v2261_v56 = vpop.f32.mrf.mxu2 }
  0xf5   : > { %v2263_v59 = vpop.f32.mrf.mxu3  ;;  %v619_v48 = vadd.f32 %v2261_v56, %v420_v45 }
  0xf6   : > { %v958_v60 = vpop.f32.mrf.mxu1 }
  0xf7   : > { %v978_v2 = vadd.f32 %v958_v60, %v782_v0  ;;  %v704_v55 = vadd.f32 %v2263_v59, %v619_v48 }
  0xf8   : > { %v1324_v62 = vpop.f32.mrf.mxu0 }
  0xf9   : > { %v789_v51 = vadd.f32 %v2259_v53, %v704_v55 }
  0xfc   : > { %v1043_v3 = vpop.f32.mrf.mxu2 }
  0xfd   : > { %v1063_v6 = vadd.f32 %v1043_v3, %v978_v2  ;;  %v1128_v7 = vpop.f32.mrf.mxu3 }
  0xfe   : > { %v960_v8 = vpop.f32.mrf.mxu1 }
  0xff   : > { %v1148_v10 = vadd.f32 %v1128_v7, %v1063_v6  ;;  %v979_v22 = vadd.f32 %v960_v8, %v783_v17 }
 0x100   : > { %v1326_v12 = vpop.f32.mrf.mxu0 }
 0x101   : > { %v1344_v14 = vadd.f32 %v1324_v62, %v1148_v10 }
 0x103   : > { %1353 = vst.msk [vmem:[#allocation2] sm:$0xff] %vm1352_vm6, %v1344_v14 }
 0x104   : > { %v1045_v21 = vpop.f32.mrf.mxu2 }
 0x105   : > { %v1064_v11 = vadd.f32 %v1045_v21, %v979_v22  ;;  %v1130_v26 = vpop.f32.mrf.mxu3 }
 0x106   : > { %v963_v27 = vpop.f32.mrf.mxu1 }
 0x107   : > { %v1149_v49 = vadd.f32 %v1130_v26, %v1064_v11  ;;  %v980_v25 = vadd.f32 %v963_v27, %v784_v30 }
 0x108   : > { %v1329_v28 = vpop.f32.mrf.mxu0 }
 0x109   : > { %v1345_v54 = vadd.f32 %v1326_v12, %v1149_v49 }
 0x10b   : > { %1354 = vst.msk [vmem:[#allocation2 + $0x8] sm:$0xff] %vm1352_vm6, %v1345_v54 }
 0x10c   : > { %v1048_v57 = vpop.f32.mrf.mxu2 }
 0x10d   : > { %v1065_v31 = vadd.f32 %v1048_v57, %v980_v25  ;;  %v1133_v60 = vpop.f32.mrf.mxu3 }
 0x10e   : > { %v965_v61 = vpop.f32.mrf.mxu1 }
 0x10f   : > { %v1150_v62 = vadd.f32 %v1133_v60, %v1065_v31  ;;  %v981_v2 = vadd.f32 %v965_v61, %v785_v29 }
 0x110   : > { %v1331_v63 = vpop.f32.mrf.mxu0 }
 0x111   : > { %v1346_v0 = vadd.f32 %v1329_v28, %v1150_v62 }
 0x113   : > { %1355 = vst.msk [vmem:[#allocation2 + $0x10] sm:$0xff] %vm1352_vm6, %v1346_v0 }
 0x114   : > { %v1050_v3 = vpop.f32.mrf.mxu2 }
 0x115   : > { %v1066_v4 = vadd.f32 %v1050_v3, %v981_v2  ;;  %v1135_v5 = vpop.f32.mrf.mxu3 }
 0x116   : > { %v968_v6 = vpop.f32.mrf.mxu1 }
 0x117   : > { %v1151_v7 = vadd.f32 %v1135_v5, %v1066_v4  ;;  %v982_v12 = vadd.f32 %v968_v6, %v786_v33 }
 0x118   : > { %v1334_v10 = vpop.f32.mrf.mxu0 }
 0x119   : > { %v1347_v8 = vadd.f32 %v1331_v63, %v1151_v7 }
 0x11b   : > { %1356 = vst.msk [vmem:[#allocation2 + $0x18] sm:$0xff] %vm1352_vm6, %v1347_v8 }
 0x11c   : > { %v1053_v13 = vpop.f32.mrf.mxu2 }
 0x11d   : > { %v1067_v14 = vadd.f32 %v1053_v13, %v982_v12  ;;  %v1138_v17 = vpop.f32.mrf.mxu3 }
 0x11e   : > { %v970_v20 = vpop.f32.mrf.mxu1 }
 0x11f   : > { %v1152_v22 = vadd.f32 %v1138_v17, %v1067_v14  ;;  %v983_v24 = vadd.f32 %v970_v20, %v787_v37 }
 0x120   : > { %v1336_v11 = vpop.f32.mrf.mxu0 }
 0x121   : > { %v1348_v21 = vadd.f32 %v1334_v10, %v1152_v22 }
 0x123   : > { %1357 = vst.msk [vmem:[#allocation2 + $0x20] sm:$0xff] %vm1352_vm6, %v1348_v21 }
 0x124   : > { %v1055_v26 = vpop.f32.mrf.mxu2 }
 0x125   : > { %v1068_v27 = vadd.f32 %v1055_v26, %v983_v24  ;;  %v1140_v47 = vpop.f32.mrf.mxu3 }
 0x126   : > { %v973_v49 = vpop.f32.mrf.mxu1 }
 0x127   : > { %v1153_v28 = vadd.f32 %v1140_v47, %v1068_v27  ;;  %v984_v54 = vadd.f32 %v973_v49, %v788_v41 }
 0x128   : > { %v1339_v50 = vpop.f32.mrf.mxu0 }
 0x129   : > { %v1349_v52 = vadd.f32 %v1336_v11, %v1153_v28 }
 0x12b   : > { %1358 = vst.msk [vmem:[#allocation2 + $0x28] sm:$0xff] %vm1352_vm6, %v1349_v52 }
 0x12c   : > { %v1058_v30 = vpop.f32.mrf.mxu2 }
 0x12d   : > { %v1069_v19 = vadd.f32 %v1058_v30, %v984_v54  ;;  %v1143_v25 = vpop.f32.mrf.mxu3 }
 0x12e   : > { %v975_v58 = vpop.f32.mrf.mxu1 }
 0x12f   : > { %v1154_v57 = vadd.f32 %v1143_v25, %v1069_v19  ;;  %v985_v56 = vadd.f32 %v975_v58, %v789_v51 }
 0x130   : > { %v1341_v32 = vpop.f32.mrf.mxu0 }
 0x131   : > { %v1350_v16 = vadd.f32 %v1339_v50, %v1154_v57 }
 0x133   : > { %1359 = vst.msk [vmem:[#allocation2 + $0x30] sm:$0xff] %vm1352_vm6, %v1350_v16 }
 0x134   : > { %v1060_v31 = vpop.f32.mrf.mxu2 }
 0x135   : > { %v1070_v60 = vadd.f32 %v1060_v31, %v985_v56  ;;  %v1145_v46 = vpop.f32.mrf.mxu3 }
 0x137   : > { %v1155_v61 = vadd.f32 %v1145_v46, %v1070_v60  ;;  %1364 = sbr.rel (%p1779_p10) target bundleno = 332 (0x14c), region = 40 }
 0x139   : > { %v1351_v62 = vadd.f32 %v1341_v32, %v1155_v61 }
 0x13b   : > { %1360 = vst.msk [vmem:[#allocation2 + $0x38] sm:$0xff] %vm1352_vm6, %v1351_v62 }
 0x13c   : > { %v1365_v59 = vld [vmem:[#allocation2] sm:$0xff]  ;;  %v1366_v53 = vld [vmem:[#allocation2 + $0x8] sm:$0xff]  ;;  %v1367_v34 = vld [vmem:[#allocation2 + $0x10] sm:$0xff]  ;;  %vm1401_vm7 = vcmask 60416  }
 0x13d   : > { %v1869_v63 = vld [vmem:[%s2340_s2] ss:$0 sm:$0xff]  ;;  %v1368_v0 = vld [vmem:[#allocation2 + $0x18] sm:$0xff]  ;;  %v1370_v35 = vld [vmem:[#allocation2 + $0x28] sm:$0xff] }
 0x13e   : > { %v1377_v29 = vadd.f32 %v1869_v63, %v1365_v59  ;;  %v1378_v1 = vadd.f32 %v1869_v63, %v1366_v53  ;;  %v1379_v2 = vadd.f32 %v1869_v63, %v1367_v34  ;;  %v1380_v3 = vadd.f32 %v1869_v63, %v1368_v0  ;;  %v1369_v42 = vld [vmem:[#allocation2 + $0x20] sm:$0xff]  ;;  %v1371_v4 = vld [vmem:[#allocation2 + $0x30] sm:$0xff] }
 0x13f   : > { %v1381_v5 = vadd.f32 %v1869_v63, %v1369_v42  ;;  %v1382_v6 = vadd.f32 %v1869_v63, %v1370_v35  ;;  %v1383_v36 = vadd.f32 %v1869_v63, %v1371_v4 }
 0x140   : > { %v1385_v38 = vmax.f32 %v1377_v29, 0.0  ;;  %v1386_v8 = vmax.f32 %v1378_v1, 0.0  ;;  %v1387_v33 = vmax.f32 %v1379_v2, 0.0  ;;  %v1388_v9 = vmax.f32 %v1380_v3, 0.0 }
 0x141   : > { %v1389_v10 = vmax.f32 %v1381_v5, 0.0  ;;  %v1390_v12 = vmax.f32 %v1382_v6, 0.0  ;;  %v1391_v17 = vmax.f32 %v1383_v36, 0.0 }
 0x142   : > { %v1372_v7 = vld [vmem:[#allocation2 + $0x38] sm:$0xff]  ;;  %v1393_v18 = vpack.c.bf16 %v1385_v38, %v1385_v38  ;;  %v1394_v39 = vpack.c.bf16 %v1386_v8, %v1386_v8  ;;  %v1395_v14 = vpack.c.bf16 %v1387_v33, %v1387_v33  ;;  %v1396_v20 = vpack.c.bf16 %v1388_v9, %v1388_v9 }
 0x143   : > { %v1384_v13 = vadd.f32 %v1869_v63, %v1372_v7  ;;  %v1397_v22 = vpack.c.bf16 %v1389_v10, %v1389_v10  ;;  %v1398_v43 = vpack.c.bf16 %v1390_v12, %v1390_v12  ;;  %v1399_v21 = vpack.c.bf16 %v1391_v17, %v1391_v17 }
 0x144   : > { %1402 = vst.msk [vmem:[%s2005_s10] sm:$0xf] %vm1401_vm7, %v1393_v18 }
 0x145   : > { %v1392_v40 = vmax.f32 %v1384_v13, 0.0  ;;  %1403 = vst.msk [vmem:[%s2005_s10 + $0x4] sm:$0xf] %vm1401_vm7, %v1394_v39 }
 0x146   : > { %1404 = vst.msk [vmem:[%s2005_s10 + $0x8] sm:$0xf] %vm1401_vm7, %v1395_v14 }
 0x147   : > { %1405 = vst.msk [vmem:[%s2005_s10 + $0xc] sm:$0xf] %vm1401_vm7, %v1396_v20  ;;  %v1400_v37 = vpack.c.bf16 %v1392_v40, %v1392_v40 }
 0x148   : > { %1406 = vst.msk [vmem:[%s2005_s10 + $0x10] sm:$0xf] %vm1401_vm7, %v1397_v22 }
 0x149   : > { %1407 = vst.msk [vmem:[%s2005_s10 + $0x14] sm:$0xf] %vm1401_vm7, %v1398_v43 }
 0x14a   : > { %1408 = vst.msk [vmem:[%s2005_s10 + $0x18] sm:$0xf] %vm1401_vm7, %v1399_v21 }
 0x14b   : > { %1409 = vst.msk [vmem:[%s2005_s10 + $0x1c] sm:$0xf] %vm1401_vm7, %v1400_v37 }
 0x14c PF: > { %s13_s18 = sadd.s32 1, %s1924_s18   ;;  %s2344_s12 = smov %s1912_s15 }
 0x14d   : > { %p10_p11 = scmp.ge.s32.totalorder %s13_s18, 26   ;;  %s2345_s13 = smov %s1916_s16 }
 0x14e   : > { %s2346_s14 = smov %s1920_s17  ;;  %s2347_s15 = smov %s2351_s19 }
 0x14f   : > { %s2348_s16 = smov %s2355_s20  ;;  %s2349_s17 = smov %s2359_s21 }
 0x150   :  { %12 = sbr.rel (!%p10_p11) target bundleno = 4 (0x4), region = 84 }

// kernel: res_block3d_forward.7
= control target key start
LH: loop header
LB: loop body
LE: loop exit
PB: predicated region body
PF: predicated region fallthrough
CT: control target
= control target key end

     0   :  { %s2145_s15 = smov 0   ;;  %s2147_s16 = smov 0   ;;  %s2640_s0 = inlined_call_operand.vmem [shape: bf16[2,6,1,10,10,8], index: 0, kind: input, shape index: {}]   ;;  %s2641_s1 = inlined_call_operand.vmem [shape: bf16[27,8,8], index: 1, kind: input, shape index: {}]   ;;  %s2642_s2 = inlined_call_operand.vmem [shape: f32[1,8], index: 2, kind: input, shape index: {}]   ;;  %s2643_s3 = inlined_call_operand.vmem [shape: bf16[2,4,8,8,8], index: 3, kind: input, shape index: {}]   ;;  %s2644_s4 = inlined_call_operand.vmem [shape: bf16[2,4,8,8,8], index: 4, kind: output, shape index: {}]  }
   0x1   :  { %s2149_s17 = smov 0   ;;  %s2151_s18 = smov 0  }
   0x2   :  { %s2153_s19 = smov 0   ;;  %s2155_s20 = smov 0  }
   0x3   :  { %s2157_s21 = smov 0  }
   0x4 LB: > { %s26_s22 = sadd.s32 1, %s2105_s18  ;;  %s29_s23 = sadd.s32 1, %s2109_s19  ;;  %s2117_s21 = sphi %s2157_s21, %s14_s21   ;;  %s2113_s20 = sphi %s2155_s20, %s2656_s20   ;;  %s2109_s19 = sphi %s2153_s19, %s2655_s19   ;;  %s2105_s18 = sphi %s2151_s18, %s2654_s18   ;;  %s2101_s17 = sphi %s2149_s17, %s2653_s17   ;;  %s2097_s16 = sphi %s2147_s16, %s2652_s16   ;;  %s2093_s15 = sphi %s2145_s15, %s2651_s15  }
   0x5   : > { %p27_p0 = scmp.ge.s32.totalorder %s26_s22, 3  ;;  %p1767_p1 = scmp.ge.s32.totalorder %s2117_s21, 1 }
   0x6   : > { %p209_p2 = scmp.lt.s32.totalorder %s2117_s21, 25  ;;  %s33_s24 = sadd.s32 1, %s2113_s20 }
   0x7   : > { %s2658_s22 = smov (%p27_p0, %s26_s22), 0  ;;  %s2660_s23 = smov (!%p27_p0, %s29_s23), %s2109_s19 }
   0x8   : > { %p210_p3 = pnand %p1767_p1, %p209_p2  ;;  %p31_p4 = scmp.ge.s32.totalorder %s2660_s23, 4 }
   0x9   : > { %s253_s25 = sadd.s32 (!%p210_p3), %s2093_s15, %s2097_s16  ;;  %p254_p6 = scmp.lt.s32.totalorder (!%p210_p3), %s2101_s17, 1 }
   0xa   : > { %s2662_s23 = smov (%p31_p4, %s2660_s23), 0  ;;  %s2664_s24 = smov (!%p31_p4, %s33_s24), %s2113_s20 }
   0xb   : > { %p35_p5 = scmp.ge.s32.totalorder %s2664_s24, 2  ;;  %213 = sbr.rel (%p210_p3) target bundleno = 335 (0x14f), region = 36 }
   0xc   : > { %p256_p7 = scmp.lt.s32.totalorder (!%p210_p3), %s253_s25, 5  ;;  %p266_p8 = scmp.lt.s32.totalorder (!%p210_p3), %s2097_s16, 3 }
   0xd   : > { %s2666_s24 = smov (%p35_p5, %s2664_s24), 0  ;;  %p1775_p9 = scmp.ne.s32.totalorder (!%p210_p3), %s2093_s15, 0 }
   0xe   : > { %2645 = sst [smem:[#allocation3_spill]] %s2666_s24 }
  0x10   : > { %s2668_s17 = smov (!%p254_p6, %s2101_s17), 1  ;;  %s2670_s25 = smov (!%p256_p7, %s253_s25), 5 }
  0x11   : > { %s2004_s26 = smul.u32 120, %s2668_s17  ;;  %s1770_s28 = sshll.u32 %s2668_s17, 5 }
  0x12   : > { %s2003_s27 = smul.u32 20, %s2670_s25  ;;  %s2672_s16 = smov (!%p266_p8, %s2097_s16), 3 }
  0x13   : > { %s1769_s5 = sshll.u32 %s2672_s16, 3  ;;  %286 = sbr.rel (%p1775_p9) target bundleno = 33 (0x21), region = 40 }
  0x14   : > { %s260_s29 = sadd.s32 %s2004_s26, %s2003_s27  ;;  %s270_s9 = sadd.s32 %s1770_s28, %s1769_s5 }
  0x15   : > { %s1768_s30 = sshll.u32 %s260_s29, 2  ;;  %s1771_s10 = sshll.u32 %s270_s9, 2 }
  0x16   : > { %s2198_s8 = scalar_lea.vmem %s2640_s0, %s1768_s30  ;;  %s2203_s13 = scalar_lea.vmem %s2643_s3, %s1771_s10 }
  0x17   : > { %s2208_s17 = scalar_lea.vmem %s2644_s4, %s1771_s10 }
  0x18   : > { %vm287_vm0 = vcmask 64512   ;;  %v2119_v0 = vmov 0.0  }
  0x19   : > { %288 = vst.msk [vmem:[#allocation2] sm:$0xff] %vm287_vm0, %v2119_v0 }
  0x1a   : > { %289 = vst.msk [vmem:[#allocation2 + $0x8] sm:$0xff] %vm287_vm0, %v2119_v0 }
  0x1b   : > { %290 = vst.msk [vmem:[#allocation2 + $0x10] sm:$0xff] %vm287_vm0, %v2119_v0 }
  0x1c   : > { %291 = vst.msk [vmem:[#allocation2 + $0x18] sm:$0xff] %vm287_vm0, %v2119_v0 }
  0x1d   : > { %292 = vst.msk [vmem:[#allocation2 + $0x20] sm:$0xff] %vm287_vm0, %v2119_v0 }
  0x1e   : > { %293 = vst.msk [vmem:[#allocation2 + $0x28] sm:$0xff] %vm287_vm0, %v2119_v0 }
  0x1f   : > { %294 = vst.msk [vmem:[#allocation2 + $0x30] sm:$0xff] %vm287_vm0, %v2119_v0 }
  0x20   : > { %295 = vst.msk [vmem:[#allocation2 + $0x38] sm:$0xff] %vm287_vm0, %v2119_v0 }
  0x21 PF: > { %s1972_s16 = smul.u32 36, %s2093_s15  ;;  %vm349_vm1 = vcmask 1043456   ;;  %v1783_v1 = vld [vmem:[%s2198_s8 + $0x10] sm:$0xf]  ;;  %v1969_v2 = vld [vmem:[%s2198_s8 + $0x14] sm:$0xf0] }
  0x22   : > { %vm336_vm2 = vcmask 64512   ;;  %v1787_v3 = vld [vmem:[%s2198_s8 + $0x20] sm:$0xf]  ;;  %v1970_v4 = vld [vmem:[%s2198_s8 + $0x24] sm:$0xf0]  ;;  %vm617_vm3 = vcmask 1042432   ;;  %v1784_v12 = vor.u32 %v1969_v2, %v1783_v1 }
  0x23   : > { %s2219_s26 = scalar_lea.vmem %s2641_s1, %s1972_s16  ;;  %v1791_v5 = vld [vmem:[%s2198_s8 + $0x30] sm:$0xf]  ;;  %v1971_v6 = vld [vmem:[%s2198_s8 + $0x34] sm:$0xf0]  ;;  %v1779_v7 = vld [vmem:[%s2198_s8] sm:$0xf]  ;;  %v1788_v13 = vor.u32 %v1970_v4, %v1787_v3 }
  0x24   : > { %v315_v8 = vld [vmem:[%s2219_s26] sm:$0xf]  ;;  %v1804_v9 = vld [vmem:[%s2219_s26 + $0x8] sm:$0xf]  ;;  %v1826_v15 = vld [vmem:[%s2219_s26 + $0xc] sm:$0xf]  ;;  %v1792_v17 = vor.u32 %v1971_v6, %v1791_v5 }
  0x25   : > { %v1968_v10 = vld [vmem:[%s2198_s8 + $0x4] sm:$0xf0]  ;;  %v351_v11 = vsel %vm349_vm1, %v315_v8, 0  ;;  %v677_v14 = vsel %vm349_vm1, %v1804_v9, 0  ;;  %v1798_v16 = vld [vmem:[%s2219_s26 + $0x4] sm:$0xf] }
  0x26   : > { %2000 = vmatpush.bf16.msra.mxu1 %v351_v11  ;;  %2001 = vmatpush.bf16.msra.mxu2 %v351_v11  ;;  %v1780_v18 = vor.u32 %v1968_v10, %v1779_v7  ;;  %v762_v19 = vsel %vm349_vm1, %v1826_v15, 0  ;;  %v550_v20 = vsel %vm349_vm1, %v1798_v16, 0  ;;  %v1864_v21 = vld [vmem:[%s2219_s26 + $0x10] sm:$0xf]  ;;  %v390_v22 = vld [vmem:[%s2198_s8] sm:$0xf] }
  0x27   : > { %2002 = vmatpush.bf16.msra.mxu3 %v351_v11  ;;  %360 = vmatpush.bf16.msra.mxu0 %v351_v11  ;;  %v958_v23 = vsel %vm349_vm1, %v1864_v21, 0  ;;  %v391_v24 = vld [vmem:[%s2198_s8 + $0x4] sm:$0x1]  ;;  %v392_v25 = vld [vmem:[%s2198_s8 + $0x8] sm:$0xf]  ;;  %v414_v26 = vshrl.u32 %v390_v22, 16 }
  0x28   : > { %v393_v27 = vld [vmem:[%s2198_s8 + $0xc] sm:$0x1]  ;;  %vm410_vm4 = vsmask.f32 3328  ;;  %vm411_vm5 = vsmask.f32 7440 }
  0x29   : > { %1794 = vmatmul.msk.bf16.vlgmr.msra.gmra.mxu1 %vm336_vm2, %v1784_v12  ;;  %1795 = vmatmul.msk.bf16.vlgmr.msra.gmra.mxu2 %vm336_vm2, %v1788_v13  ;;  %v416_v28 = vrot.slane %v414_v26, 4  ;;  %v417_v29 = vshll.u32 %v390_v22, 16  ;;  %v423_v30 = vshll.u32 %v391_v24, 16  ;;  %v428_v31 = vshrl.u32 %v392_v25, 16  ;;  %v589_v32 = vld [vmem:[%s2198_s8] sm:$0xe]  ;;  %vm2259_vm8 = vmor %vm410_vm4, %vm411_vm5 }
  0x2a   : > { %686 = vmatpush.bf16.msrb.mxu2 %v677_v14  ;;  %1796 = vmatmul.msk.bf16.vlgmr.msra.gmra.mxu3 %vm336_vm2, %v1792_v17  ;;  %v431_v33 = vshll.u32 %v392_v25, 16  ;;  %v437_v34 = vshll.u32 %v393_v27, 16  ;;  %v590_v35 = vld [vmem:[%s2198_s8 + $0x8] sm:$0xe]  ;;  %vm618_vm6 = vcmask 1046532   ;;  %v1805_v36 = vrot.slane %v589_v32, 9 }
  0x2b   : > { %771 = vmatpush.bf16.msrb.mxu3 %v762_v19  ;;  %1793 = vmatmul.msk.bf16.vlgmr.msra.gmra.mxu0 %vm336_vm2, %v1780_v18  ;;  %v419_v37 = vrot.slane %v417_v29, 5  ;;  %v425_v38 = vrot.slane %v423_v30, 5  ;;  %v430_v39 = vrot.slane %v428_v31, 4  ;;  %vm2246_vm7 = vmor %vm617_vm3, %vm618_vm6  ;;  %v622_v41 = vrot.slane %v391_v24, 5  ;;  %v1900_v48 = vld [vmem:[%s2219_s26 + $0x18] sm:$0xf] }
  0x2c   : > { %559 = vmatpush.bf16.msrb.mxu1 %v550_v20  ;;  %967 = vmatpush.bf16.msrb.mxu0 %v958_v23  ;;  %v433_v42 = vrot.slane %v431_v33, 5  ;;  %v439_v43 = vrot.slane %v437_v34, 5  ;;  %v1806_v44 = vrot.slane %v590_v35, 9  ;;  %v626_v45 = vrot.slane %v393_v27, 5  ;;  %v1847_v49 = vld [vmem:[%s2198_s8 + $0x8] sm:$0xf] }
  0x2d   : > { %v420_v46 = vor.u32 %v419_v37, %v416_v28  ;;  %v623_v47 = vsel %vm2246_vm7, %v1805_v36, %v622_v41  ;;  %v2255_v50 = vld [vmem:[%s2198_s8 + $0xc] sm:$0x1]  ;;  %v1167_v55 = vsel %vm349_vm1, %v1900_v48, 0  ;;  %v1849_v56 = vld [vmem:[%s2198_s8 + $0x10] sm:$0xf]  ;;  %v822_v61 = vshrl.u32 %v1847_v49, 16 }
  0x2e   : > { %v434_v52 = vor.u32 %v433_v42, %v430_v39  ;;  %v627_v53 = vsel %vm2246_vm7, %v1806_v44, %v626_v45  ;;  %v652_v54 = vunpack.c.l.b16 %v623_v47  ;;  %v1829_v59 = vld [vmem:[%s2198_s8 + $0x8] sm:$0xf]  ;;  %v1973_v60 = vld [vmem:[%s2198_s8 + $0xc] sm:$0xf0]  ;;  %1176 = vmatpush.bf16.msra.mxu2 %v1167_v55  ;;  %v825_v62 = vshll.u32 %v1847_v49, 16  ;;  %p1965_p10 = scmp.ne.s32.totalorder %s2093_s15, 2 }
  0x2f   : > { %v421_v57 = vrot.slane %v420_v46, 4  ;;  %v653_v58 = vunpack.c.l.b16 %v627_v53  ;;  %v2270_v0 = vld [vmem:[%s2198_s8 + $0x14] sm:$0x1]  ;;  %v831_v1 = vshll.u32 %v2255_v50, 16  ;;  %v836_v2 = vshrl.u32 %v1849_v56, 16 }
  0x30   : > { %v435_v63 = vrot.slane %v434_v52, 4  ;;  %v839_v3 = vshll.u32 %v1849_v56, 16  ;;  %v824_v5 = vrot.slane %v822_v61, 4  ;;  %v827_v6 = vrot.slane %v825_v62, 5  ;;  %v1938_v7 = vld [vmem:[%s2219_s26 + $0x1c] sm:$0xf] }
  0x31   : > { %v426_v4 = vsel %vm2259_vm8, %v421_v57, %v425_v38  ;;  %v1878_v8 = vld [vmem:[%s2219_s26 + $0x14] sm:$0xf]  ;;  %v833_v11 = vrot.slane %v831_v1, 5  ;;  %v838_v12 = vrot.slane %v836_v2, 4  ;;  %v1952_v13 = vld [vmem:[%s2219_s26 + $0x20] sm:$0xf]  ;;  %v660_v20 = vpack.c.b16 %v653_v58, %v652_v54 }
  0x32   : > { %v440_v9 = vsel %vm2259_vm8, %v435_v63, %v439_v43  ;;  %v525_v10 = vunpack.c.l.b16 %v426_v4  ;;  %v828_v15 = vor.u32 %v827_v6, %v824_v5  ;;  %v841_v16 = vrot.slane %v839_v3, 5  ;;  %v394_v18 = vld [vmem:[%s2198_s8 + $0x10] sm:$0xf]  ;;  %v395_v19 = vld [vmem:[%s2198_s8 + $0x14] sm:$0x1] }
  0x33   : > { %v526_v14 = vunpack.c.l.b16 %v440_v9  ;;  %v845_v17 = vshll.u32 %v2270_v0, 16  ;;  %v1830_v21 = vor.u32 %v1973_v60, %v1829_v59  ;;  %v1363_v22 = vsel %vm349_vm1, %v1938_v7, 0  ;;  %v396_v24 = vld [vmem:[%s2198_s8 + $0x18] sm:$0xf]  ;;  %v397_v29 = vld [vmem:[%s2198_s8 + $0x1c] sm:$0x1] }
  0x34   : > { %v1082_v23 = vsel %vm349_vm1, %v1878_v8, 0  ;;  %v829_v26 = vrot.slane %v828_v15, 4  ;;  %v842_v27 = vor.u32 %v841_v16, %v838_v12  ;;  %1372 = vmatpush.bf16.msra.mxu3 %v1363_v22  ;;  %v1487_v30 = vsel %vm349_vm1, %v1952_v13, 0  ;;  %v591_v34 = vld [vmem:[%s2198_s8 + $0x10] sm:$0xe] }
  0x35   : > { %v533_v25 = vpack.c.b16 %v526_v14, %v525_v10  ;;  %v847_v28 = vrot.slane %v845_v17, 5  ;;  %1091 = vmatpush.bf16.msra.mxu1 %v1082_v23  ;;  %v442_v31 = vshrl.u32 %v394_v18, 16  ;;  %v445_v32 = vshll.u32 %v394_v18, 16  ;;  %1496 = vmatpush.bf16.msra.mxu0 %v1487_v30  ;;  %v592_v39 = vld [vmem:[%s2198_s8 + $0x18] sm:$0xe] }
  0x36   : > { %v451_v33 = vshll.u32 %v395_v19, 16  ;;  %v834_v35 = vsel %vm2259_vm8, %v829_v26, %v833_v11  ;;  %v843_v36 = vrot.slane %v842_v27, 4  ;;  %v456_v37 = vshrl.u32 %v396_v24, 16  ;;  %v2293_v45 = vld [vmem:[%s2198_s8 + $0x18] sm:$0xf] }
  0x37   : > { %v459_v38 = vshll.u32 %v396_v24, 16  ;;  %v933_v41 = vunpack.c.l.b16 %v834_v35  ;;  %v444_v42 = vrot.slane %v442_v31, 4  ;;  %v447_v43 = vrot.slane %v445_v32, 5  ;;  %v2300_v52 = vld [vmem:[%s2198_s8 + $0x1c] sm:$0xf0] }
  0x38   : > { %v453_v44 = vrot.slane %v451_v33, 5  ;;  %v848_v46 = vsel %vm2259_vm8, %v843_v36, %v847_v28  ;;  %v458_v47 = vrot.slane %v456_v37, 4  ;;  %v465_v49 = vshll.u32 %v397_v29, 16  ;;  %v1851_v57 = vld [vmem:[%s2198_s8 + $0x18] sm:$0xf] }
  0x39   : > { %1799 = vmatmul.msk.bf16.vlgmr.msrb.gmra.mxu1 %vm336_vm2, %v533_v25  ;;  %1813 = vmatmul.msk.bf16.vlgmr.msrb.gmra.mxu2 %vm336_vm2, %v660_v20  ;;  %v461_v48 = vrot.slane %v459_v38, 5  ;;  %v934_v53 = vunpack.c.l.b16 %v848_v46  ;;  %v448_v54 = vor.u32 %v447_v43, %v444_v42  ;;  %v1807_v55 = vrot.slane %v591_v34, 9  ;;  %v2305_v62 = vld [vmem:[%s2198_s8 + $0x1c] sm:$0x1]  ;;  %v1853_v4 = vld [vmem:[%s2198_s8 + $0x20] sm:$0xf] }
  0x3a   : > { %1843 = vmatmul.msk.bf16.vlgmr.msrb.gmra.mxu3 %vm336_vm2, %v1830_v21  ;;  %v630_v56 = vrot.slane %v395_v19, 5  ;;  %v467_v59 = vrot.slane %v465_v49, 5  ;;  %v1808_v60 = vrot.slane %v592_v39, 9  ;;  %v634_v61 = vrot.slane %v397_v29, 5  ;;  %v2318_v11 = vld [vmem:[%s2198_s8 + $0x24] sm:$0x1] }
  0x3b   : > { %v462_v58 = vor.u32 %v461_v48, %v458_v47  ;;  %v941_v63 = vpack.c.b16 %v934_v53, %v933_v41  ;;  %v449_v1 = vrot.slane %v448_v54, 4  ;;  %v1834_v3 = vor.u32 %v2300_v52, %v2293_v45  ;;  %v398_v14 = vld [vmem:[%s2198_s8 + $0x20] sm:$0xf]  ;;  %v399_v19 = vld [vmem:[%s2198_s8 + $0x24] sm:$0x1] }
  0x3c   : > { %v631_v2 = vsel %vm2246_vm7, %v1807_v55, %v630_v56  ;;  %v635_v6 = vsel %vm2246_vm7, %v1808_v60, %v634_v61  ;;  %v850_v8 = vshrl.u32 %v1851_v57, 16  ;;  %v853_v12 = vshll.u32 %v1851_v57, 16  ;;  %v400_v24 = vld [vmem:[%s2198_s8 + $0x28] sm:$0xf]  ;;  %v401_v31 = vld [vmem:[%s2198_s8 + $0x2c] sm:$0x1] }
  0x3d   : > { %v463_v5 = vrot.slane %v462_v58, 4  ;;  %v654_v7 = vunpack.c.l.b16 %v631_v2  ;;  %1865 = vmatmul.msk.bf16.vlgmr.msrb.gmra.mxu0 %vm336_vm2, %v941_v63  ;;  %v454_v9 = vsel %vm2259_vm8, %v449_v1, %v453_v44  ;;  %v655_v10 = vunpack.c.l.b16 %v635_v6  ;;  %v593_v34 = vld [vmem:[%s2198_s8 + $0x20] sm:$0xe]  ;;  %v594_v44 = vld [vmem:[%s2198_s8 + $0x28] sm:$0xe] }
  0x3e   : > { %v859_v13 = vshll.u32 %v2305_v62, 16  ;;  %v527_v16 = vunpack.c.l.b16 %v454_v9  ;;  %v852_v17 = vrot.slane %v850_v8, 4  ;;  %v864_v18 = vshrl.u32 %v1853_v4, 16  ;;  %v1855_v57 = vld [vmem:[%s2198_s8 + $0x28] sm:$0xf] }
  0x3f   : > { %v468_v15 = vsel %vm2259_vm8, %v463_v5, %v467_v59  ;;  %v661_v21 = vpack.c.b16 %v655_v10, %v654_v7  ;;  %v855_v22 = vrot.slane %v853_v12, 5  ;;  %v867_v26 = vshll.u32 %v1853_v4, 16  ;;  %v2340_v6 = vld [vmem:[%s2198_s8 + $0x2c] sm:$0x1]  ;;  %v1857_v7 = vld [vmem:[%s2198_s8 + $0x30] sm:$0xf] }
  0x40   : > { %v528_v20 = vunpack.c.l.b16 %v468_v15  ;;  %v861_v23 = vrot.slane %v859_v13, 5  ;;  %v866_v25 = vrot.slane %v864_v18, 4  ;;  %v873_v27 = vshll.u32 %v2318_v11, 16 }
  0x41   : > { %v470_v28 = vshrl.u32 %v398_v14, 16  ;;  %v856_v30 = vor.u32 %v855_v22, %v852_v17  ;;  %v473_v32 = vshll.u32 %v398_v14, 16  ;;  %v479_v33 = vshll.u32 %v399_v19, 16  ;;  %v2352_v14 = vld [vmem:[%s2198_s8 + $0x34] sm:$0x1] }
  0x42   : > { %v534_v29 = vpack.c.b16 %v528_v20, %v527_v16  ;;  %v869_v35 = vrot.slane %v867_v26, 5  ;;  %v875_v36 = vrot.slane %v873_v27, 5  ;;  %v484_v38 = vshrl.u32 %v400_v24, 16  ;;  %v402_v17 = vld [vmem:[%s2198_s8 + $0x30] sm:$0xf] }
  0x43   : > { %v472_v37 = vrot.slane %v470_v28, 4  ;;  %v857_v39 = vrot.slane %v856_v30, 4  ;;  %v475_v41 = vrot.slane %v473_v32, 5  ;;  %v481_v42 = vrot.slane %v479_v33, 5  ;;  %v1837_v28 = vld [vmem:[%s2198_s8 + $0x28] sm:$0xf] }
  0x44   : > { %v487_v43 = vshll.u32 %v400_v24, 16  ;;  %v870_v46 = vor.u32 %v869_v35, %v866_v25  ;;  %v486_v47 = vrot.slane %v484_v38, 4  ;;  %v493_v48 = vshll.u32 %v401_v31, 16  ;;  %v403_v35 = vld [vmem:[%s2198_s8 + $0x34] sm:$0x1] }
  0x45   : > { %v1809_v49 = vrot.slane %v593_v34, 9  ;;  %v862_v53 = vsel %vm2259_vm8, %v857_v39, %v861_v23  ;;  %v476_v54 = vor.u32 %v475_v41, %v472_v37  ;;  %v638_v56 = vrot.slane %v399_v19, 5  ;;  %v404_v23 = vld [vmem:[%s2198_s8 + $0x38] sm:$0xf]  ;;  %v1975_v38 = vld [vmem:[%s2198_s8 + $0x2c] sm:$0xf0] }
  0x46   : > { %v489_v55 = vrot.slane %v487_v43, 5  ;;  %v871_v58 = vrot.slane %v870_v46, 4  ;;  %v1810_v59 = vrot.slane %v594_v44, 9  ;;  %v935_v60 = vunpack.c.l.b16 %v862_v53  ;;  %v405_v44 = vld [vmem:[%s2198_s8 + $0x3c] sm:$0x1] }
  0x47   : > { %v477_v61 = vrot.slane %v476_v54, 4  ;;  %v642_v1 = vrot.slane %v401_v31, 5  ;;  %v495_v4 = vrot.slane %v493_v48, 5  ;;  %v639_v5 = vsel %vm2246_vm7, %v1809_v49, %v638_v56  ;;  %v1859_v54 = vld [vmem:[%s2198_s8 + $0x38] sm:$0xf] }
  0x48   : > { %v490_v63 = vor.u32 %v489_v55, %v486_v47  ;;  %v876_v2 = vsel %vm2259_vm8, %v871_v58, %v875_v36  ;;  %v878_v8 = vshrl.u32 %v1855_v57, 16  ;;  %v881_v16 = vshll.u32 %v1855_v57, 16 }
  0x49   : > { %1800 = vmatmul.msk.bf16.gmra.mxu1 %vm336_vm2, %v534_v29  ;;  %1814 = vmatmul.msk.bf16.gmra.mxu2 %vm336_vm2, %v661_v21  ;;  %v936_v9 = vunpack.c.l.b16 %v876_v2  ;;  %v482_v10 = vsel %vm2259_vm8, %v477_v61, %v481_v42  ;;  %v643_v13 = vsel %vm2246_vm7, %v1810_v59, %v642_v1  ;;  %v656_v19 = vunpack.c.l.b16 %v639_v5  ;;  %v595_v61 = vld [vmem:[%s2198_s8 + $0x30] sm:$0xe]  ;;  %v1861_v5 = vld [vmem:[%s2198_s8 + $0x40] sm:$0xf] }
  0x4a   : > { %1844 = vmatmul.msk.bf16.gmra.mxu3 %vm336_vm2, %v1834_v3  ;;  %v491_v12 = vrot.slane %v490_v63, 4  ;;  %v880_v15 = vrot.slane %v878_v8, 4  ;;  %v887_v45 = vshll.u32 %v2340_v6, 16  ;;  %v892_v52 = vshrl.u32 %v1857_v7, 16  ;;  %v596_v63 = vld [vmem:[%s2198_s8 + $0x38] sm:$0xe] }
  0x4b   : > { %v942_v18 = vpack.c.b16 %v936_v9, %v935_v60  ;;  %v529_v20 = vunpack.c.l.b16 %v482_v10  ;;  %v883_v21 = vrot.slane %v881_v16, 5  ;;  %v895_v22 = vshll.u32 %v1857_v7, 16  ;;  %v2374_v9 = vld [vmem:[%s2198_s8 + $0x3c] sm:$0x1]  ;;  %v2377_v16 = vld [vmem:[%s2198_s8 + $0x44] sm:$0x1] }
  0x4c   : > { %v496_v3 = vsel %vm2259_vm8, %v491_v12, %v495_v4  ;;  %v657_v24 = vunpack.c.l.b16 %v643_v13  ;;  %v894_v25 = vrot.slane %v892_v52, 4  ;;  %v901_v26 = vshll.u32 %v2352_v14, 16 }
  0x4d   : > { %1866 = vmatmul.msk.bf16.gmra.mxu0 %vm336_vm2, %v942_v18  ;;  %v498_v27 = vshrl.u32 %v402_v17, 16  ;;  %v884_v29 = vor.u32 %v883_v21, %v880_v15  ;;  %v889_v30 = vrot.slane %v887_v45, 5  ;;  %v897_v31 = vrot.slane %v895_v22, 5 }
  0x4e   : > { %v501_v32 = vshll.u32 %v402_v17, 16  ;;  %v530_v33 = vunpack.c.l.b16 %v496_v3  ;;  %v903_v34 = vrot.slane %v901_v26, 5  ;;  %v512_v37 = vshrl.u32 %v404_v23, 16  ;;  %v1921_v26 = vld [vmem:[%s2198_s8 + $0x10] sm:$0xf] }
  0x4f   : > { %v500_v36 = vrot.slane %v498_v27, 4  ;;  %v885_v39 = vrot.slane %v884_v29, 4  ;;  %v898_v41 = vor.u32 %v897_v31, %v894_v25  ;;  %v515_v43 = vshll.u32 %v404_v23, 16 }
  0x50   : > { %v503_v42 = vrot.slane %v501_v32, 5  ;;  %v514_v46 = vrot.slane %v512_v37, 4  ;;  %v507_v49 = vshll.u32 %v403_v35, 16  ;;  %v1838_v55 = vor.u32 %v1975_v38, %v1837_v28  ;;  %v1923_v32 = vld [vmem:[%s2198_s8 + $0x18] sm:$0xf] }
  0x51   : > { %v890_v47 = vsel %vm2259_vm8, %v885_v39, %v889_v30  ;;  %v899_v48 = vrot.slane %v898_v41, 4  ;;  %v517_v53 = vrot.slane %v515_v43, 5  ;;  %v535_v57 = vpack.c.b16 %v530_v33, %v529_v20 }
  0x52   : > { %v504_v56 = vor.u32 %v503_v42, %v500_v36  ;;  %v662_v58 = vpack.c.b16 %v657_v24, %v656_v19  ;;  %v521_v60 = vshll.u32 %v405_v44, 16  ;;  %v937_v1 = vunpack.c.l.b16 %v890_v47 }
  0x53   : > { %v904_v59 = vsel %vm2259_vm8, %v899_v48, %v903_v34  ;;  %v518_v4 = vor.u32 %v517_v53, %v514_v46  ;;  %v906_v7 = vshrl.u32 %v1859_v54, 16  ;;  %v509_v8 = vrot.slane %v507_v49, 5 }
  0x54   : > { %v938_v2 = vunpack.c.l.b16 %v904_v59  ;;  %v505_v10 = vrot.slane %v504_v56, 4  ;;  %v1811_v12 = vrot.slane %v595_v61, 9  ;;  %v646_v13 = vrot.slane %v403_v35, 5  ;;  %v1924_v61 = vld [vmem:[%s2198_s8 + $0x1c] sm:$0x1] }
  0x55   : > { %v1812_v15 = vrot.slane %v596_v63, 9  ;;  %v650_v17 = vrot.slane %v405_v44, 5  ;;  %v908_v18 = vrot.slane %v906_v7, 4  ;;  %v909_v19 = vshll.u32 %v1859_v54, 16  ;;  %v1841_v54 = vld [vmem:[%s2198_s8 + $0x38] sm:$0xf] }
  0x56   : > { %v920_v45 = vshrl.u32 %v1861_v5, 16  ;;  %v943_v52 = vpack.c.b16 %v938_v2, %v937_v1  ;;  %v519_v3 = vrot.slane %v518_v4, 4  ;;  %v523_v20 = vrot.slane %v521_v60, 5  ;;  %v1922_v60 = vld [vmem:[%s2198_s8 + $0x14] sm:$0x1] }
  0x57   : > { %v923_v21 = vshll.u32 %v1861_v5, 16  ;;  %v911_v22 = vrot.slane %v909_v19, 5  ;;  %v915_v23 = vshll.u32 %v2374_v9, 16  ;;  %v929_v25 = vshll.u32 %v2377_v16, 16  ;;  %v1869_v7 = vld [vmem:[%s2198_s8 + $0x8] sm:$0xe] }
  0x58   : > { %v922_v24 = vrot.slane %v920_v45, 4  ;;  %v510_v28 = vsel %vm2259_vm8, %v505_v10, %v509_v8  ;;  %v647_v29 = vsel %vm2246_vm7, %v1811_v12, %v646_v13  ;;  %v651_v30 = vsel %vm2246_vm7, %v1812_v15, %v650_v17  ;;  %v1870_v8 = vld [vmem:[%s2198_s8 + $0x10] sm:$0xe] }
  0x59   : > { %1801 = vmatmul.msk.bf16.gmra.mxu1 %vm336_vm2, %v535_v57  ;;  %1815 = vmatmul.msk.bf16.gmra.mxu2 %vm336_vm2, %v662_v58  ;;  %v925_v27 = vrot.slane %v923_v21, 5  ;;  %v912_v31 = vor.u32 %v911_v22, %v908_v18  ;;  %v524_v33 = vsel %vm2259_vm8, %v519_v3, %v523_v20  ;;  %v1227_v35 = vshrl.u32 %v1921_v26, 16  ;;  %v1943_v3 = vld [vmem:[%s2198_s8 + $0x10] sm:$0xe]  ;;  %v1944_v20 = vld [vmem:[%s2198_s8 + $0x18] sm:$0xe] }
  0x5a   : > { %1845 = vmatmul.msk.bf16.gmra.mxu3 %vm336_vm2, %v1838_v55  ;;  %v1230_v36 = vshll.u32 %v1921_v26, 16  ;;  %v917_v38 = vrot.slane %v915_v23, 5  ;;  %v931_v39 = vrot.slane %v929_v25, 5  ;;  %v1241_v42 = vshrl.u32 %v1923_v32, 16  ;;  %v1976_v55 = vld [vmem:[%s2198_s8 + $0x3c] sm:$0xf0] }
  0x5b   : > { %v926_v34 = vor.u32 %v925_v27, %v922_v24  ;;  %v913_v37 = vrot.slane %v912_v31, 4  ;;  %v1244_v43 = vshll.u32 %v1923_v32, 16  ;;  %v531_v44 = vunpack.c.l.b16 %v510_v28  ;;  %v1925_v25 = vld [vmem:[%s2198_s8 + $0x20] sm:$0xf]  ;;  %v1927_v26 = vld [vmem:[%s2198_s8 + $0x28] sm:$0xf] }
  0x5c   : > { %v532_v46 = vunpack.c.l.b16 %v524_v33  ;;  %v658_v47 = vunpack.c.l.b16 %v647_v29  ;;  %v659_v48 = vunpack.c.l.b16 %v651_v30  ;;  %v1229_v49 = vrot.slane %v1227_v35, 4 }
  0x5d   : > { %1867 = vmatmul.msk.bf16.gmra.mxu0 %vm336_vm2, %v943_v52  ;;  %v927_v41 = vrot.slane %v926_v34, 4  ;;  %v1232_v53 = vrot.slane %v1230_v36, 5  ;;  %v918_v56 = vsel %vm2259_vm8, %v913_v37, %v917_v38  ;;  %v1243_v58 = vrot.slane %v1241_v42, 4  ;;  %v1977_v42 = vld [vmem:[%s2198_s8 + $0x14] sm:$0xf0] }
  0x5e   : > { %v1246_v59 = vrot.slane %v1244_v43, 5  ;;  %v536_v63 = vpack.c.b16 %v532_v46, %v531_v44  ;;  %v663_v1 = vpack.c.b16 %v659_v48, %v658_v47  ;;  %v1842_v2 = vor.u32 %v1976_v55, %v1841_v54  ;;  %v1928_v55 = vld [vmem:[%s2198_s8 + $0x2c] sm:$0x1] }
  0x5f   : > { %v932_v57 = vsel %vm2259_vm8, %v927_v41, %v931_v39  ;;  %v939_v4 = vunpack.c.l.b16 %v918_v56  ;;  %v1233_v10 = vor.u32 %v1232_v53, %v1229_v49  ;;  %v1236_v12 = vshll.u32 %v1922_v60, 16  ;;  %v1903_v41 = vld [vmem:[%s2198_s8 + $0x10] sm:$0xf]  ;;  %v1926_v49 = vld [vmem:[%s2198_s8 + $0x24] sm:$0x1] }
  0x60   : > { %v940_v5 = vunpack.c.l.b16 %v932_v57  ;;  %v1247_v13 = vor.u32 %v1246_v59, %v1243_v58  ;;  %v1250_v15 = vshll.u32 %v1924_v61, 16  ;;  %v1027_v17 = vrot.slane %v2255_v50, 5  ;;  %v1871_v59 = vld [vmem:[%s2198_s8 + $0x18] sm:$0xe] }
  0x61   : > { %v1031_v18 = vrot.slane %v2270_v0, 5  ;;  %v1879_v19 = vrot.slane %v1869_v7, 9  ;;  %v1880_v45 = vrot.slane %v1870_v8, 9  ;;  %v1234_v21 = vrot.slane %v1233_v10, 4 }
  0x62   : > { %v944_v52 = vpack.c.b16 %v940_v5, %v939_v4  ;;  %v1238_v22 = vrot.slane %v1236_v12, 5  ;;  %v1248_v23 = vrot.slane %v1247_v13, 4  ;;  %v1252_v24 = vrot.slane %v1250_v15, 5  ;;  %v1945_v13 = vld [vmem:[%s2198_s8 + $0x20] sm:$0xe] }
  0x63   : > { %v1028_v50 = vsel %vm2246_vm7, %v1879_v19, %v1027_v17  ;;  %v1032_v0 = vsel %vm2246_vm7, %v1880_v45, %v1031_v18  ;;  %v1953_v27 = vrot.slane %v1943_v3, 9  ;;  %v1432_v28 = vrot.slane %v1922_v60, 5  ;;  %v1872_v60 = vld [vmem:[%s2198_s8 + $0x20] sm:$0xe]  ;;  %v1946_v19 = vld [vmem:[%s2198_s8 + $0x28] sm:$0xe] }
  0x64   : > { %v1954_v29 = vrot.slane %v1944_v20, 9  ;;  %v1436_v30 = vrot.slane %v1924_v61, 5  ;;  %v1255_v31 = vshrl.u32 %v1925_v25, 16  ;;  %v1258_v32 = vshll.u32 %v1925_v25, 16  ;;  %v1929_v45 = vld [vmem:[%s2198_s8 + $0x30] sm:$0xf] }
  0x65   : > { %v1239_v33 = vsel %vm2259_vm8, %v1234_v21, %v1238_v22  ;;  %v1253_v34 = vsel %vm2259_vm8, %v1248_v23, %v1252_v24  ;;  %v1269_v35 = vshrl.u32 %v1927_v26, 16  ;;  %v1272_v36 = vshll.u32 %v1927_v26, 16  ;;  %v1931_v20 = vld [vmem:[%s2198_s8 + $0x38] sm:$0xf] }
  0x66   : > { %v1057_v37 = vunpack.c.l.b16 %v1028_v50  ;;  %v1058_v38 = vunpack.c.l.b16 %v1032_v0  ;;  %v1433_v39 = vsel %vm2246_vm7, %v1953_v27, %v1432_v28  ;;  %v1338_v43 = vunpack.c.l.b16 %v1239_v33 }
  0x67   : > { %v1339_v44 = vunpack.c.l.b16 %v1253_v34  ;;  %v1257_v46 = vrot.slane %v1255_v31, 4  ;;  %v1260_v47 = vrot.slane %v1258_v32, 5  ;;  %v1437_v48 = vsel %vm2246_vm7, %v1954_v29, %v1436_v30  ;;  %v1907_v31 = vld [vmem:[%s2198_s8 + $0x20] sm:$0xf]  ;;  %v1978_v32 = vld [vmem:[%s2198_s8 + $0x24] sm:$0xf0] }
  0x68   : > { %v1271_v53 = vrot.slane %v1269_v35, 4  ;;  %v1274_v54 = vrot.slane %v1272_v36, 5  ;;  %v1065_v56 = vpack.c.b16 %v1058_v38, %v1057_v37  ;;  %v1904_v57 = vor.u32 %v1977_v42, %v1903_v41  ;;  %v1930_v38 = vld [vmem:[%s2198_s8 + $0x34] sm:$0x1] }
  0x69   : > { %1802 = vmatmul.msk.bf16.gmra.mxu1 %vm336_vm2, %v536_v63  ;;  %1816 = vmatmul.msk.bf16.gmra.mxu2 %vm336_vm2, %v663_v1  ;;  %v1462_v58 = vunpack.c.l.b16 %v1433_v39  ;;  %v1346_v61 = vpack.c.b16 %v1339_v44, %v1338_v43  ;;  %v1463_v63 = vunpack.c.l.b16 %v1437_v48  ;;  %v1261_v1 = vor.u32 %v1260_v47, %v1257_v46  ;;  %v1932_v43 = vld [vmem:[%s2198_s8 + $0x3c] sm:$0x1] }
  0x6a   : > { %1846 = vmatmul.msk.bf16.gmra.mxu3 %vm336_vm2, %v1842_v2  ;;  %v1264_v2 = vshll.u32 %v1926_v49, 16  ;;  %v1275_v4 = vor.u32 %v1274_v54, %v1271_v53  ;;  %v1278_v5 = vshll.u32 %v1928_v55, 16  ;;  %v1881_v7 = vrot.slane %v1871_v59, 9 }
  0x6b   : > { %v1035_v8 = vrot.slane %v2305_v62, 5  ;;  %v1882_v10 = vrot.slane %v1872_v60, 9  ;;  %v1039_v12 = vrot.slane %v2318_v11, 5  ;;  %v1470_v15 = vpack.c.b16 %v1463_v63, %v1462_v58 }
  0x6c   : > { %v1262_v17 = vrot.slane %v1261_v1, 4  ;;  %v1266_v18 = vrot.slane %v1264_v2, 5  ;;  %v1280_v3 = vrot.slane %v1278_v5, 5  ;;  %v1955_v21 = vrot.slane %v1945_v13, 9  ;;  %v1935_v13 = vld [vmem:[%s2198_s8 + $0x48] sm:$0xf] }
  0x6d   : > { %1868 = vmatmul.msk.bf16.gmra.mxu0 %vm336_vm2, %v944_v52  ;;  %v1276_v52 = vrot.slane %v1275_v4, 4  ;;  %v1036_v62 = vsel %vm2246_vm7, %v1881_v7, %v1035_v8  ;;  %v1040_v11 = vsel %vm2246_vm7, %v1882_v10, %v1039_v12  ;;  %v1440_v22 = vrot.slane %v1926_v49, 5  ;;  %v1873_v49 = vld [vmem:[%s2198_s8 + $0x28] sm:$0xe]  ;;  %v1947_v8 = vld [vmem:[%s2198_s8 + $0x30] sm:$0xe] }
  0x6e   : > { %v1956_v23 = vrot.slane %v1946_v19, 9  ;;  %v1444_v24 = vrot.slane %v1928_v55, 5  ;;  %v1283_v25 = vshrl.u32 %v1929_v45, 16  ;;  %v1267_v26 = vsel %vm2259_vm8, %v1262_v17, %v1266_v18  ;;  %v1874_v55 = vld [vmem:[%s2198_s8 + $0x30] sm:$0xe] }
  0x6f   : > { %v1286_v50 = vshll.u32 %v1929_v45, 16  ;;  %v1297_v0 = vshrl.u32 %v1931_v20, 16  ;;  %v1300_v27 = vshll.u32 %v1931_v20, 16  ;;  %v1281_v28 = vsel %vm2259_vm8, %v1276_v52, %v1280_v3  ;;  %v1948_v10 = vld [vmem:[%s2198_s8 + $0x38] sm:$0xe] }
  0x70   : > { %v1059_v29 = vunpack.c.l.b16 %v1036_v62  ;;  %v1060_v30 = vunpack.c.l.b16 %v1040_v11  ;;  %v1340_v33 = vunpack.c.l.b16 %v1267_v26  ;;  %v1441_v34 = vsel %vm2246_vm7, %v1955_v21, %v1440_v22  ;;  %v1933_v12 = vld [vmem:[%s2198_s8 + $0x40] sm:$0xf] }
  0x71   : > { %v1445_v35 = vsel %vm2246_vm7, %v1956_v23, %v1444_v24  ;;  %v1285_v36 = vrot.slane %v1283_v25, 4  ;;  %v1341_v37 = vunpack.c.l.b16 %v1281_v28  ;;  %v1288_v39 = vrot.slane %v1286_v50, 5  ;;  %v1911_v23 = vld [vmem:[%s2198_s8 + $0x30] sm:$0xf]  ;;  %v1979_v24 = vld [vmem:[%s2198_s8 + $0x34] sm:$0xf0] }
  0x72   : > { %v1299_v41 = vrot.slane %v1297_v0, 4  ;;  %v1302_v42 = vrot.slane %v1300_v27, 5  ;;  %v1908_v44 = vor.u32 %v1978_v32, %v1907_v31  ;;  %v1066_v46 = vpack.c.b16 %v1060_v30, %v1059_v29  ;;  %v1934_v31 = vld [vmem:[%s2198_s8 + $0x44] sm:$0x1]  ;;  %v1936_v32 = vld [vmem:[%s2198_s8 + $0x4c] sm:$0x1] }
  0x73   : > { %v1464_v47 = vunpack.c.l.b16 %v1441_v34  ;;  %v1465_v48 = vunpack.c.l.b16 %v1445_v35  ;;  %v1292_v53 = vshll.u32 %v1930_v38, 16  ;;  %v1347_v54 = vpack.c.b16 %v1341_v37, %v1340_v33 }
  0x74   : > { %v1306_v58 = vshll.u32 %v1932_v43, 16  ;;  %v1883_v59 = vrot.slane %v1873_v49, 9  ;;  %v1884_v63 = vrot.slane %v1874_v55, 9  ;;  %v1047_v1 = vrot.slane %v2352_v14, 5 }
  0x75   : > { %v1471_v60 = vpack.c.b16 %v1465_v48, %v1464_v47  ;;  %v1294_v4 = vrot.slane %v1292_v53, 5  ;;  %v1957_v17 = vrot.slane %v1947_v8, 9  ;;  %v1448_v14 = vrot.slane %v1930_v38, 5  ;;  %v1875_v38 = vld [vmem:[%s2198_s8 + $0x38] sm:$0xe] }
  0x76   : > { %v1308_v7 = vrot.slane %v1306_v58, 5  ;;  %v1958_v45 = vrot.slane %v1948_v10, 9  ;;  %v1452_v52 = vrot.slane %v1932_v43, 5  ;;  %v1311_v3 = vshrl.u32 %v1933_v12, 16  ;;  %v1949_v58 = vld [vmem:[%s2198_s8 + $0x40] sm:$0xe] }
  0x77   : > { %v1314_v20 = vshll.u32 %v1933_v12, 16  ;;  %v1325_v62 = vshrl.u32 %v1935_v13, 16  ;;  %v1328_v11 = vshll.u32 %v1935_v13, 16  ;;  %v1449_v50 = vsel %vm2246_vm7, %v1957_v17, %v1448_v14  ;;  %v1915_v8 = vld [vmem:[%s2198_s8 + $0x40] sm:$0xf] }
  0x78   : > { %v1453_v0 = vsel %vm2246_vm7, %v1958_v45, %v1452_v52  ;;  %v1313_v27 = vrot.slane %v1311_v3, 4  ;;  %v1912_v34 = vor.u32 %v1979_v24, %v1911_v23  ;;  %v1466_v35 = vunpack.c.l.b16 %v1449_v50  ;;  %v1980_v10 = vld [vmem:[%s2198_s8 + $0x44] sm:$0xf0] }
  0x79   : > { %1887 = vmatmul.msk.bf16.vlgmr.msra.gmra.mxu1 %vm336_vm2, %v1065_v56  ;;  %1917 = vmatmul.msk.bf16.vlgmr.msra.gmra.mxu2 %vm336_vm2, %v1904_v57  ;;  %v1289_v56 = vor.u32 %v1288_v39, %v1285_v36  ;;  %v1303_v57 = vor.u32 %v1302_v42, %v1299_v41  ;;  %v1316_v28 = vrot.slane %v1314_v20, 5  ;;  %v1327_v29 = vrot.slane %v1325_v62, 4  ;;  %v1876_v39 = vld [vmem:[%s2198_s8 + $0x40] sm:$0xe] }
  0x7a   : > { %1939 = vmatmul.msk.bf16.vlgmr.msra.gmra.mxu3 %vm336_vm2, %v1346_v61  ;;  %v1043_v61 = vrot.slane %v2340_v6, 5  ;;  %v1048_v6 = vsel %vm2246_vm7, %v1884_v63, %v1047_v1  ;;  %v1330_v30 = vrot.slane %v1328_v11, 5  ;;  %v1467_v36 = vunpack.c.l.b16 %v1453_v0 }
  0x7b   : > { %v1290_v2 = vrot.slane %v1289_v56, 4  ;;  %v1304_v5 = vrot.slane %v1303_v57, 4  ;;  %v1062_v22 = vunpack.c.l.b16 %v1048_v6  ;;  %v1317_v41 = vor.u32 %v1316_v28, %v1313_v27 }
  0x7c   : > { %v1320_v42 = vshll.u32 %v1934_v31, 16  ;;  %v1331_v43 = vor.u32 %v1330_v30, %v1327_v29  ;;  %v1885_v47 = vrot.slane %v1875_v38, 9  ;;  %v1051_v48 = vrot.slane %v2374_v9, 5 }
  0x7d   : > { %1961 = vmatmul.msk.bf16.vlgmr.msra.gmra.mxu0 %vm336_vm2, %v1470_v15  ;;  %v1044_v15 = vsel %vm2246_vm7, %v1883_v59, %v1043_v61  ;;  %v1295_v18 = vsel %vm2259_vm8, %v1290_v2, %v1294_v4  ;;  %v1309_v19 = vsel %vm2259_vm8, %v1304_v5, %v1308_v7  ;;  %v1886_v49 = vrot.slane %v1876_v39, 9  ;;  %v1950_v59 = vld [vmem:[%s2198_s8 + $0x48] sm:$0xe] }
  0x7e   : > { %v1061_v21 = vunpack.c.l.b16 %v1044_v15  ;;  %v1342_v25 = vunpack.c.l.b16 %v1295_v18  ;;  %v1343_v26 = vunpack.c.l.b16 %v1309_v19  ;;  %v1055_v53 = vrot.slane %v2377_v16, 5 }
  0x7f   : > { %v1322_v55 = vrot.slane %v1320_v42, 5  ;;  %v1332_v56 = vrot.slane %v1331_v43, 4  ;;  %v1959_v9 = vrot.slane %v1949_v58, 9  ;;  %v1456_v63 = vrot.slane %v1934_v31, 5 }
  0x80   : > { %v1067_v33 = vpack.c.b16 %v1062_v22, %v1061_v21  ;;  %v1348_v37 = vpack.c.b16 %v1343_v26, %v1342_v25  ;;  %v1056_v61 = vsel %vm2246_vm7, %v1886_v49, %v1055_v53  ;;  %v1960_v2 = vrot.slane %v1950_v59, 9  ;;  %v297_v59 = vld [vmem:[#allocation2 + $0x8] sm:$0xff] }
  0x81   : > { %v1460_v4 = vrot.slane %v1936_v32, 5  ;;  %v1064_v7 = vunpack.c.l.b16 %v1056_v61  ;;  %v1457_v15 = vsel %vm2246_vm7, %v1959_v9, %v1456_v63  ;;  %v1916_v14 = vor.u32 %v1980_v10, %v1915_v8 }
  0x82   : > { %v1468_v19 = vunpack.c.l.b16 %v1457_v15 }
  0x83   : > { %v1461_v6 = vsel %vm2246_vm7, %v1960_v2, %v1460_v4 }
  0x84   : > { %v1469_v45 = vunpack.c.l.b16 %v1461_v6 }
  0x86   : > { %v1473_v3 = vpack.c.b16 %v1469_v45, %v1468_v19 }
  0x89   : > { %1888 = vmatmul.msk.bf16.gmra.mxu1 %vm336_vm2, %v1066_v46  ;;  %1918 = vmatmul.msk.bf16.gmra.mxu2 %vm336_vm2, %v1908_v44  ;;  %v1334_v44 = vshll.u32 %v1936_v32, 16  ;;  %v1472_v46 = vpack.c.b16 %v1467_v36, %v1466_v35 }
  0x8a   : > { %1940 = vmatmul.msk.bf16.gmra.mxu3 %vm336_vm2, %v1347_v54  ;;  %v1318_v54 = vrot.slane %v1317_v41, 4 }
  0x8b   : > { %v1336_v57 = vrot.slane %v1334_v44, 5 }
  0x8c   : > { %v1323_v16 = vsel %vm2259_vm8, %v1318_v54, %v1322_v55 }
  0x8d   : > { %1962 = vmatmul.msk.bf16.gmra.mxu0 %vm336_vm2, %v1471_v60  ;;  %v1052_v60 = vsel %vm2246_vm7, %v1885_v47, %v1051_v48  ;;  %v1337_v1 = vsel %vm2259_vm8, %v1332_v56, %v1336_v57  ;;  %v1344_v12 = vunpack.c.l.b16 %v1323_v16  ;;  %v296_v48 = vld [vmem:[#allocation2] sm:$0xff] }
  0x8e   : > { %v1063_v5 = vunpack.c.l.b16 %v1052_v60  ;;  %v1345_v13 = vunpack.c.l.b16 %v1337_v1 }
  0x90   : > { %v1068_v17 = vpack.c.b16 %v1064_v7, %v1063_v5  ;;  %v1349_v51 = vpack.c.b16 %v1345_v13, %v1344_v12  ;;  %v298_v7 = vld [vmem:[#allocation2 + $0x10] sm:$0xff] }
  0x99   : > { %1889 = vmatmul.msk.bf16.gmra.mxu1 %vm336_vm2, %v1067_v33  ;;  %1919 = vmatmul.msk.bf16.gmra.mxu2 %vm336_vm2, %v1912_v34 }
  0x9a   : > { %1941 = vmatmul.msk.bf16.gmra.mxu3 %vm336_vm2, %v1348_v37 }
  0x9d   : > { %1963 = vmatmul.msk.bf16.gmra.mxu0 %vm336_vm2, %v1472_v46 }
  0xa6   : > { %v2511_v18 = vpop.f32.mrf.mxu1 }
  0xa7   : > { %v384_v13 = vadd.f32 %v2511_v18, %v298_v7  ;;  %v301_v7 = vld [vmem:[#allocation2 + $0x28] sm:$0xff] }
  0xa8   : > { %v362_v52 = vpop.f32.mrf.mxu0 }
  0xa9   : > { %1890 = vmatmul.msk.bf16.gmra.mxu1 %vm336_vm2, %v1068_v17  ;;  %1920 = vmatmul.msk.bf16.gmra.mxu2 %vm336_vm2, %v1916_v14  ;;  %v382_v54 = vadd.f32 %v362_v52, %v296_v48 }
  0xaa   : > { %1942 = vmatmul.msk.bf16.gmra.mxu3 %vm336_vm2, %v1349_v51 }
  0xac   : > { %v2516_v20 = vpop.f32.mrf.mxu2 }
  0xad   : > { %v2518_v62 = vpop.f32.mrf.mxu3  ;;  %1964 = vmatmul.msk.bf16.gmra.mxu0 %vm336_vm2, %v1473_v3 }
  0xae   : > { %v2521_v40 = vpop.f32.mrf.mxu1 }
  0xb0   : > { %v364_v11 = vpop.f32.mrf.mxu0 }
  0xb1   : > { %v383_v9 = vadd.f32 %v364_v11, %v297_v59  ;;  %v299_v11 = vld [vmem:[#allocation2 + $0x18] sm:$0xff] }
  0xb4   : > { %v2523_v21 = vpop.f32.mrf.mxu2 }
  0xb5   : > { %v2525_v22 = vpop.f32.mrf.mxu3 }
  0xb6   : > { %v561_v23 = vpop.f32.mrf.mxu1 }
  0xb7   : > { %v581_v57 = vadd.f32 %v561_v23, %v382_v54 }
  0xba   : > { %v969_v24 = vpop.f32.mrf.mxu0 }
  0xbc   : > { %v688_v25 = vpop.f32.mrf.mxu2 }
  0xbd   : > { %v773_v26 = vpop.f32.mrf.mxu3  ;;  %v708_v58 = vadd.f32 %v688_v25, %v581_v57 }
  0xbe   : > { %v563_v50 = vpop.f32.mrf.mxu1 }
  0xbf   : > { %v793_v63 = vadd.f32 %v773_v26, %v708_v58  ;;  %v582_v2 = vadd.f32 %v563_v50, %v383_v9  ;;  %v385_v26 = vadd.f32 %v2521_v40, %v299_v11 }
  0xc1   : > { %v989_v5 = vadd.f32 %v969_v24, %v793_v63 }
  0xc2   : > { %v971_v0 = vpop.f32.mrf.mxu0 }
  0xc4   : > { %v690_v27 = vpop.f32.mrf.mxu2 }
  0xc5   : > { %v775_v28 = vpop.f32.mrf.mxu3  ;;  %v709_v4 = vadd.f32 %v690_v27, %v582_v2 }
  0xc6   : > { %v566_v29 = vpop.f32.mrf.mxu1 }
  0xc7   : > { %v794_v15 = vadd.f32 %v775_v28, %v709_v4  ;;  %v583_v51 = vadd.f32 %v566_v29, %v384_v13 }
  0xc9   : > { %v990_v3 = vadd.f32 %v971_v0, %v794_v15 }
  0xca   : > { %v974_v30 = vpop.f32.mrf.mxu0 }
  0xcc   : > { %v693_v31 = vpop.f32.mrf.mxu2 }
  0xcd   : > { %v778_v32 = vpop.f32.mrf.mxu3  ;;  %v710_v45 = vadd.f32 %v693_v31, %v583_v51  ;;  %v300_v31 = vld [vmem:[#allocation2 + $0x20] sm:$0xff]  ;;  %v302_v51 = vld [vmem:[#allocation2 + $0x30] sm:$0xff] }
  0xce   : > { %v568_v33 = vpop.f32.mrf.mxu1  ;;  %v386_v63 = vadd.f32 %v2516_v20, %v300_v31  ;;  %v387_v20 = vadd.f32 %v2523_v21, %v301_v7  ;;  %v388_v21 = vadd.f32 %v2518_v62, %v302_v51 }
  0xcf   : > { %v795_v50 = vadd.f32 %v778_v32, %v710_v45  ;;  %v584_v48 = vadd.f32 %v568_v33, %v385_v26  ;;  %v303_v26 = vld [vmem:[#allocation2 + $0x38] sm:$0xff] }
  0xd0   : > { %v389_v62 = vadd.f32 %v2525_v22, %v303_v26 }
  0xd1   : > { %v991_v58 = vadd.f32 %v974_v30, %v795_v50 }
  0xd2   : > { %v2527_v34 = vpop.f32.mrf.mxu0 }
  0xd4   : > { %v695_v35 = vpop.f32.mrf.mxu2 }
  0xd5   : > { %v2529_v36 = vpop.f32.mrf.mxu3  ;;  %v711_v57 = vadd.f32 %v695_v35, %v584_v48 }
  0xd6   : > { %v2531_v37 = vpop.f32.mrf.mxu1 }
  0xd7   : > { %v585_v4 = vadd.f32 %v2531_v37, %v386_v63 }
  0xda   : > { %v2533_v38 = vpop.f32.mrf.mxu0 }
  0xdc   : > { %v2535_v39 = vpop.f32.mrf.mxu2 }
  0xdd   : > { %v2537_v41 = vpop.f32.mrf.mxu3  ;;  %v712_v35 = vadd.f32 %v2535_v39, %v585_v4 }
  0xde   : > { %v2539_v42 = vpop.f32.mrf.mxu1 }
  0xdf   : > { %v586_v37 = vadd.f32 %v2539_v42, %v387_v20 }
  0xe2   : > { %v2541_v43 = vpop.f32.mrf.mxu0 }
  0xe4   : > { %v2543_v44 = vpop.f32.mrf.mxu2 }
  0xe5   : > { %v2545_v46 = vpop.f32.mrf.mxu3  ;;  %v713_v39 = vadd.f32 %v2543_v44, %v586_v37 }
  0xe6   : > { %v2547_v47 = vpop.f32.mrf.mxu1 }
  0xe7   : > { %v587_v42 = vadd.f32 %v2547_v47, %v388_v21 }
  0xea   : > { %v2549_v49 = vpop.f32.mrf.mxu0 }
  0xec   : > { %v2551_v53 = vpop.f32.mrf.mxu2 }
  0xed   : > { %v2553_v55 = vpop.f32.mrf.mxu3  ;;  %v714_v44 = vadd.f32 %v2551_v53, %v587_v42 }
  0xee   : > { %v2555_v56 = vpop.f32.mrf.mxu1 }
  0xef   : > { %v588_v47 = vadd.f32 %v2555_v56, %v389_v62 }
  0xf2   : > { %v2557_v60 = vpop.f32.mrf.mxu0 }
  0xf4   : > { %v2559_v61 = vpop.f32.mrf.mxu2 }
  0xf5   : > { %v2561_v16 = vpop.f32.mrf.mxu3  ;;  %v715_v53 = vadd.f32 %v2559_v61, %v588_v47 }
  0xf6   : > { %v1093_v1 = vpop.f32.mrf.mxu1 }
  0xf7   : > { %v1113_v8 = vadd.f32 %v1093_v1, %v989_v5  ;;  %v796_v1 = vadd.f32 %v2529_v36, %v711_v57  ;;  %v797_v36 = vadd.f32 %v2537_v41, %v712_v35  ;;  %v798_v41 = vadd.f32 %v2545_v46, %v713_v39 }
  0xf8   : > { %v799_v46 = vadd.f32 %v2553_v55, %v714_v44 }
  0xf9   : > { %v992_v30 = vadd.f32 %v2527_v34, %v796_v1  ;;  %v993_v34 = vadd.f32 %v2533_v38, %v797_v36  ;;  %v994_v38 = vadd.f32 %v2541_v43, %v798_v41 }
  0xfa   : > { %v1498_v10 = vpop.f32.mrf.mxu0  ;;  %v995_v43 = vadd.f32 %v2549_v49, %v799_v46 }
  0xfc   : > { %v1178_v12 = vpop.f32.mrf.mxu2 }
  0xfd   : > { %v1198_v6 = vadd.f32 %v1178_v12, %v1113_v8  ;;  %v1374_v17 = vpop.f32.mrf.mxu3 }
  0xfe   : > { %v1095_v14 = vpop.f32.mrf.mxu1 }
  0xff   : > { %v1394_v19 = vadd.f32 %v1374_v17, %v1198_v6  ;;  %v1114_v23 = vadd.f32 %v1095_v14, %v990_v3 }
 0x101   : > { %v1518_v52 = vadd.f32 %v1498_v10, %v1394_v19 }
 0x102   : > { %v1500_v24 = vpop.f32.mrf.mxu0 }
 0x103   : > { %1526 = vst.msk [vmem:[#allocation2] sm:$0xff] %vm336_vm2, %v1518_v52 }
 0x104   : > { %v1180_v25 = vpop.f32.mrf.mxu2 }
 0x105   : > { %v1199_v27 = vadd.f32 %v1180_v25, %v1114_v23  ;;  %v1376_v18 = vpop.f32.mrf.mxu3 }
 0x106   : > { %v1098_v28 = vpop.f32.mrf.mxu1 }
 0x107   : > { %v1395_v54 = vadd.f32 %v1376_v18, %v1199_v27  ;;  %v1115_v0 = vadd.f32 %v1098_v28, %v991_v58 }
 0x109   : > { %v1519_v29 = vadd.f32 %v1500_v24, %v1395_v54 }
 0x10a   : > { %v1503_v59 = vpop.f32.mrf.mxu0 }
 0x10b   : > { %1527 = vst.msk [vmem:[#allocation2 + $0x8] sm:$0xff] %vm336_vm2, %v1519_v29 }
 0x10c   : > { %v1183_v9 = vpop.f32.mrf.mxu2 }
 0x10d   : > { %v1200_v40 = vadd.f32 %v1183_v9, %v1115_v0  ;;  %v1379_v32 = vpop.f32.mrf.mxu3  ;;  %v800_v0 = vadd.f32 %v2561_v16, %v715_v53 }
 0x10e   : > { %v1100_v2 = vpop.f32.mrf.mxu1 }
 0x10f   : > { %v1396_v33 = vadd.f32 %v1379_v32, %v1200_v40  ;;  %v1116_v8 = vadd.f32 %v1100_v2, %v992_v30  ;;  %v996_v56 = vadd.f32 %v2557_v60, %v800_v0 }
 0x111   : > { %v1520_v5 = vadd.f32 %v1503_v59, %v1396_v33 }
 0x112   : > { %v1505_v10 = vpop.f32.mrf.mxu0 }
 0x113   : > { %1528 = vst.msk [vmem:[#allocation2 + $0x10] sm:$0xff] %vm336_vm2, %v1520_v5 }
 0x114   : > { %v1185_v12 = vpop.f32.mrf.mxu2 }
 0x115   : > { %v1201_v13 = vadd.f32 %v1185_v12, %v1116_v8  ;;  %v1381_v15 = vpop.f32.mrf.mxu3 }
 0x116   : > { %v1103_v6 = vpop.f32.mrf.mxu1 }
 0x117   : > { %v1397_v17 = vadd.f32 %v1381_v15, %v1201_v13  ;;  %v1117_v19 = vadd.f32 %v1103_v6, %v993_v34 }
 0x119   : > { %v1521_v14 = vadd.f32 %v1505_v10, %v1397_v17 }
 0x11a   : > { %v1508_v45 = vpop.f32.mrf.mxu0 }
 0x11b   : > { %1529 = vst.msk [vmem:[#allocation2 + $0x18] sm:$0xff] %vm336_vm2, %v1521_v14 }
 0x11c   : > { %v1188_v52 = vpop.f32.mrf.mxu2 }
 0x11d   : > { %v1202_v3 = vadd.f32 %v1188_v52, %v1117_v19  ;;  %v1384_v11 = vpop.f32.mrf.mxu3 }
 0x11e   : > { %v1105_v23 = vpop.f32.mrf.mxu1 }
 0x11f   : > { %v1398_v24 = vadd.f32 %v1384_v11, %v1202_v3  ;;  %v1118_v50 = vadd.f32 %v1105_v23, %v994_v38 }
 0x121   : > { %v1522_v25 = vadd.f32 %v1508_v45, %v1398_v24 }
 0x122   : > { %v1510_v27 = vpop.f32.mrf.mxu0 }
 0x123   : > { %1530 = vst.msk [vmem:[#allocation2 + $0x20] sm:$0xff] %vm336_vm2, %v1522_v25 }
 0x124   : > { %v1190_v18 = vpop.f32.mrf.mxu2 }
 0x125   : > { %v1203_v28 = vadd.f32 %v1190_v18, %v1118_v50  ;;  %v1386_v48 = vpop.f32.mrf.mxu3 }
 0x126   : > { %v1108_v54 = vpop.f32.mrf.mxu1 }
 0x127   : > { %v1399_v57 = vadd.f32 %v1386_v48, %v1203_v28  ;;  %v1119_v58 = vadd.f32 %v1108_v54, %v995_v43 }
 0x129   : > { %v1523_v29 = vadd.f32 %v1510_v27, %v1399_v57 }
 0x12a   : > { %v1513_v55 = vpop.f32.mrf.mxu0 }
 0x12b   : > { %1531 = vst.msk [vmem:[#allocation2 + $0x28] sm:$0xff] %vm336_vm2, %v1523_v29 }
 0x12c   : > { %v1193_v31 = vpop.f32.mrf.mxu2 }
 0x12d   : > { %v1204_v22 = vadd.f32 %v1193_v31, %v1119_v58  ;;  %v1389_v59 = vpop.f32.mrf.mxu3 }
 0x12e   : > { %v1110_v63 = vpop.f32.mrf.mxu1 }
 0x12f   : > { %v1400_v9 = vadd.f32 %v1389_v59, %v1204_v22  ;;  %v1120_v61 = vadd.f32 %v1110_v63, %v996_v56 }
 0x131   : > { %v1524_v1 = vadd.f32 %v1513_v55, %v1400_v9 }
 0x132   : > { %v1515_v4 = vpop.f32.mrf.mxu0 }
 0x133   : > { %1532 = vst.msk [vmem:[#allocation2 + $0x30] sm:$0xff] %vm336_vm2, %v1524_v1 }
 0x134   : > { %v1195_v40 = vpop.f32.mrf.mxu2 }
 0x135   : > { %v1205_v32 = vadd.f32 %v1195_v40, %v1120_v61  ;;  %v1391_v49 = vpop.f32.mrf.mxu3 }
 0x137   : > { %v1401_v2 = vadd.f32 %v1391_v49, %v1205_v32  ;;  %1537 = sbr.rel (%p1965_p10) target bundleno = 335 (0x14f), region = 44 }
 0x139   : > { %v1525_v33 = vadd.f32 %v1515_v4, %v1401_v2 }
 0x13b   : > { %1533 = vst.msk [vmem:[#allocation2 + $0x38] sm:$0xff] %vm336_vm2, %v1525_v33 }
 0x13c   : > { %v1538_v16 = vld [vmem:[#allocation2] sm:$0xff]  ;;  %vm1598_vm9 = vcmask 60416   ;;  %v1539_v5 = vld [vmem:[#allocation2 + $0x8] sm:$0xff]  ;;  %v1540_v30 = vld [vmem:[#allocation2 + $0x10] sm:$0xff] }
 0x13d   : > { %v2062_v60 = vld [vmem:[%s2642_s2] ss:$0 sm:$0xff]  ;;  %v1997_v20 = vld [vmem:[%s2203_s13 + $0x8] sm:$0xff]   ;;  %v1541_v36 = vld [vmem:[#allocation2 + $0x18] sm:$0xff] }
 0x13e   : > { %v1982_v35 = vld [vmem:[%s2203_s13] sm:$0xff]   ;;  %v1550_v7 = vadd.f32 %v2062_v60, %v1538_v16  ;;  %v1551_v10 = vadd.f32 %v2062_v60, %v1539_v5  ;;  %v1552_v15 = vadd.f32 %v2062_v60, %v1540_v30  ;;  %v1987_v6 = vunpack.c.l.bf16 %v1997_v20  ;;  %v1998_v39 = vld [vmem:[%s2203_s13 + $0x10] sm:$0xff]   ;;  %v1543_v14 = vld [vmem:[#allocation2 + $0x28] sm:$0xff] }
 0x13f   : > { %v1983_v8 = vunpack.c.l.bf16 %v1982_v35  ;;  %v1984_v12 = vunpack.c.h.bf16 %v1982_v35  ;;  %v1542_v13 = vld [vmem:[#allocation2 + $0x20] sm:$0xff]  ;;  %v1553_v37 = vadd.f32 %v2062_v60, %v1541_v36  ;;  %v1988_v17 = vunpack.c.h.bf16 %v1997_v20  ;;  %v1544_v34 = vld [vmem:[#allocation2 + $0x30] sm:$0xff]  ;;  %v1999_v21 = vld [vmem:[%s2203_s13 + $0x18] sm:$0xff]  }
 0x140   : > { %v1554_v45 = vadd.f32 %v2062_v60, %v1542_v13  ;;  %v1991_v52 = vunpack.c.l.bf16 %v1998_v39  ;;  %v1576_v41 = vadd.f32 %v1987_v6, %v1552_v15  ;;  %v1555_v11 = vadd.f32 %v2062_v60, %v1543_v14 }
 0x141   : > { %v1574_v51 = vadd.f32 %v1983_v8, %v1550_v7  ;;  %v1575_v19 = vadd.f32 %v1984_v12, %v1551_v10  ;;  %v1577_v3 = vadd.f32 %v1988_v17, %v1553_v37  ;;  %v1992_v23 = vunpack.c.h.bf16 %v1998_v39 }
 0x142   : > { %v1545_v42 = vld [vmem:[#allocation2 + $0x38] sm:$0xff]  ;;  %v1578_v25 = vadd.f32 %v1991_v52, %v1554_v45  ;;  %v1556_v38 = vadd.f32 %v2062_v60, %v1544_v34  ;;  %v1584_v26 = vmax.f32 %v1576_v41, 0.0  ;;  %v1995_v18 = vunpack.c.l.bf16 %v1999_v21 }
 0x143   : > { %v1582_v24 = vmax.f32 %v1574_v51, 0.0  ;;  %v1583_v44 = vmax.f32 %v1575_v19, 0.0  ;;  %v1585_v50 = vmax.f32 %v1577_v3, 0.0  ;;  %v1579_v27 = vadd.f32 %v1992_v23, %v1555_v11 }
 0x144   : > { %v1586_v28 = vmax.f32 %v1578_v25, 0.0  ;;  %v1557_v48 = vadd.f32 %v2062_v60, %v1545_v42  ;;  %v1592_v54 = vpack.c.bf16 %v1584_v26, %v1584_v26  ;;  %v1580_v53 = vadd.f32 %v1995_v18, %v1556_v38 }
 0x145   : > { %v1590_v62 = vpack.c.bf16 %v1582_v24, %v1582_v24  ;;  %v1591_v46 = vpack.c.bf16 %v1583_v44, %v1583_v44  ;;  %v1593_v47 = vpack.c.bf16 %v1585_v50, %v1585_v50  ;;  %v1587_v57 = vmax.f32 %v1579_v27, 0.0 }
 0x146   : > { %v1594_v29 = vpack.c.bf16 %v1586_v28, %v1586_v28  ;;  %v1996_v43 = vunpack.c.h.bf16 %v1999_v21  ;;  %v1588_v31 = vmax.f32 %v1580_v53, 0.0  ;;  %1601 = vst.msk [vmem:[%s2208_s17 + $0x8] sm:$0xf] %vm1598_vm9, %v1592_v54 }
 0x147   : > { %1599 = vst.msk [vmem:[%s2208_s17] sm:$0xf] %vm1598_vm9, %v1590_v62  ;;  %v1595_v58 = vpack.c.bf16 %v1587_v57, %v1587_v57 }
 0x148   : > { %1600 = vst.msk [vmem:[%s2208_s17 + $0x4] sm:$0xf] %vm1598_vm9, %v1591_v46  ;;  %v1581_v0 = vadd.f32 %v1996_v43, %v1557_v48  ;;  %v1596_v22 = vpack.c.bf16 %v1588_v31, %v1588_v31 }
 0x149   : > { %1602 = vst.msk [vmem:[%s2208_s17 + $0xc] sm:$0xf] %vm1598_vm9, %v1593_v47 }
 0x14a   : > { %1603 = vst.msk [vmem:[%s2208_s17 + $0x10] sm:$0xf] %vm1598_vm9, %v1594_v29  ;;  %v1589_v59 = vmax.f32 %v1581_v0, 0.0 }
 0x14b   : > { %1604 = vst.msk [vmem:[%s2208_s17 + $0x14] sm:$0xf] %vm1598_vm9, %v1595_v58 }
 0x14c   : > { %1605 = vst.msk [vmem:[%s2208_s17 + $0x18] sm:$0xf] %vm1598_vm9, %v1596_v22  ;;  %v1597_v55 = vpack.c.bf16 %v1589_v59, %v1589_v59 }
 0x14e   : > { %1606 = vst.msk [vmem:[%s2208_s17 + $0x1c] sm:$0xf] %vm1598_vm9, %v1597_v55 }
 0x14f PF: > { %s14_s21 = sadd.s32 1, %s2117_s21   ;;  %s2650_s29 = sld [smem:[#allocation3_spill]] }
 0x150   : > { %p11_p11 = scmp.ge.s32.totalorder %s14_s21, 26   ;;  %s2651_s15 = smov %s2105_s18 }
 0x151   : > { %s2652_s16 = smov %s2109_s19  ;;  %s2653_s17 = smov %s2113_s20 }
 0x152   : > { %s2654_s18 = smov %s2658_s22  ;;  %s2655_s19 = smov %s2662_s23 }
 0x153   :  { %13 = sbr.rel (!%p11_p11) target bundleno = 4 (0x4), region = 88 }
 0x155   : > { %s2656_s20 = smov %s2650_s29 }

// kernel: res_block3d_forward.8
= control target key start
LH: loop header
LB: loop body
LE: loop exit
PB: predicated region body
PF: predicated region fallthrough
CT: control target
= control target key end

     0   :  { %s2012_s12 = smov 0   ;;  %s2014_s13 = smov 0   ;;  %s2498_s0 = inlined_call_operand.vmem [shape: bf16[2,6,1,10,10,8], index: 0, kind: input, shape index: {}]   ;;  %s2499_s1 = inlined_call_operand.vmem [shape: bf16[27,8,8], index: 1, kind: input, shape index: {}]   ;;  %s2500_s2 = inlined_call_operand.vmem [shape: f32[1,8], index: 2, kind: input, shape index: {}]   ;;  %s2501_s3 = inlined_call_operand.vmem [shape: bf16[2,4,8,8,8], index: 3, kind: output, shape index: {}]  }
   0x1   :  { %s2016_s14 = smov 0   ;;  %s2018_s15 = smov 0  }
   0x2   :  { %s2020_s16 = smov 0   ;;  %s2022_s17 = smov 0  }
   0x3   :  { %s2024_s18 = smov 0  }
   0x4 LB: > { %s25_s19 = sadd.s32 1, %s1977_s15  ;;  %s28_s20 = sadd.s32 1, %s1981_s16  ;;  %s1989_s18 = sphi %s2024_s18, %s13_s18   ;;  %s1985_s17 = sphi %s2022_s17, %s2511_s17   ;;  %s1981_s16 = sphi %s2020_s16, %s2510_s16   ;;  %s1977_s15 = sphi %s2018_s15, %s2509_s15   ;;  %s1973_s14 = sphi %s2016_s14, %s2508_s14   ;;  %s1969_s13 = sphi %s2014_s13, %s2507_s13   ;;  %s1965_s12 = sphi %s2012_s12, %s2506_s12  }
   0x5   : > { %p26_p0 = scmp.ge.s32.totalorder %s25_s19, 3  ;;  %p1661_p1 = scmp.ge.s32.totalorder %s1989_s18, 1 }
   0x6   : > { %p168_p2 = scmp.lt.s32.totalorder %s1989_s18, 25  ;;  %s32_s21 = sadd.s32 1, %s1985_s17 }
   0x7   : > { %s2513_s19 = smov (%p26_p0, %s25_s19), 0  ;;  %s2515_s20 = smov (!%p26_p0, %s28_s20), %s1981_s16 }
   0x8   : > { %p169_p3 = pnand %p1661_p1, %p168_p2  ;;  %p30_p4 = scmp.ge.s32.totalorder %s2515_s20, 4 }
   0x9   : > { %s201_s22 = sadd.s32 (!%p169_p3), %s1965_s12, %s1969_s13  ;;  %p202_p6 = scmp.lt.s32.totalorder (!%p169_p3), %s1973_s14, 1 }
   0xa   : > { %s2517_s20 = smov (%p30_p4, %s2515_s20), 0  ;;  %s2519_s21 = smov (!%p30_p4, %s32_s21), %s1985_s17 }
   0xb   : > { %p34_p5 = scmp.ge.s32.totalorder %s2519_s21, 2  ;;  %172 = sbr.rel (%p169_p3) target bundleno = 332 (0x14c), region = 32 }
   0xc   : > { %p204_p7 = scmp.lt.s32.totalorder (!%p169_p3), %s201_s22, 5  ;;  %p214_p8 = scmp.lt.s32.totalorder (!%p169_p3), %s1969_s13, 3 }
   0xd   : > { %s2521_s21 = smov (%p34_p5, %s2519_s21), 0  ;;  %p1666_p9 = scmp.ne.s32.totalorder (!%p169_p3), %s1965_s12, 0 }
  0x10   : > { %s2523_s14 = smov (!%p202_p6, %s1973_s14), 1  ;;  %s2525_s22 = smov (!%p204_p7, %s201_s22), 5 }
  0x11   : > { %s1876_s23 = smul.u32 120, %s2523_s14  ;;  %s1664_s25 = sshll.u32 %s2523_s14, 5 }
  0x12   : > { %s1875_s24 = smul.u32 20, %s2525_s22  ;;  %s2527_s13 = smov (!%p214_p8, %s1969_s13), 3 }
  0x13   : > { %s1663_s28 = sshll.u32 %s2527_s13, 3  ;;  %225 = sbr.rel (%p1666_p9) target bundleno = 33 (0x21), region = 36 }
  0x14   : > { %s208_s26 = sadd.s32 %s1876_s23, %s1875_s24  ;;  %s218_s5 = sadd.s32 %s1664_s25, %s1663_s28 }
  0x15   : > { %s1662_s27 = sshll.u32 %s208_s26, 2  ;;  %s1665_s6 = sshll.u32 %s218_s5, 2 }
  0x16   : > { %s2065_s4 = scalar_lea.vmem %s2498_s0, %s1662_s27  ;;  %s2070_s9 = scalar_lea.vmem %s2501_s3, %s1665_s6 }
  0x18   : > { %vm226_vm0 = vcmask 64512   ;;  %v1991_v0 = vmov 0.0  }
  0x19   : > { %227 = vst.msk [vmem:[#allocation2] sm:$0xff] %vm226_vm0, %v1991_v0 }
  0x1a   : > { %228 = vst.msk [vmem:[#allocation2 + $0x8] sm:$0xff] %vm226_vm0, %v1991_v0 }
  0x1b   : > { %229 = vst.msk [vmem:[#allocation2 + $0x10] sm:$0xff] %vm226_vm0, %v1991_v0 }
  0x1c   : > { %230 = vst.msk [vmem:[#allocation2 + $0x18] sm:$0xff] %vm226_vm0, %v1991_v0 }
  0x1d   : > { %231 = vst.msk [vmem:[#allocation2 + $0x20] sm:$0xff] %vm226_vm0, %v1991_v0 }
  0x1e   : > { %232 = vst.msk [vmem:[#allocation2 + $0x28] sm:$0xff] %vm226_vm0, %v1991_v0 }
  0x1f   : > { %233 = vst.msk [vmem:[#allocation2 + $0x30] sm:$0xff] %vm226_vm0, %v1991_v0 }
  0x20   : > { %234 = vst.msk [vmem:[#allocation2 + $0x38] sm:$0xff] %vm226_vm0, %v1991_v0 }
  0x21 PF: > { %s1863_s10 = smul.u32 36, %s1965_s12  ;;  %vm288_vm1 = vcmask 1043456   ;;  %v1674_v1 = vld [vmem:[%s2065_s4 + $0x10] sm:$0xf]  ;;  %v1860_v2 = vld [vmem:[%s2065_s4 + $0x14] sm:$0xf0] }
  0x22   : > { %vm275_vm2 = vcmask 64512   ;;  %v1678_v3 = vld [vmem:[%s2065_s4 + $0x20] sm:$0xf]  ;;  %v1861_v4 = vld [vmem:[%s2065_s4 + $0x24] sm:$0xf0]  ;;  %vm556_vm3 = vcmask 1042432   ;;  %v1675_v12 = vor.u32 %v1860_v2, %v1674_v1 }
  0x23   : > { %s2081_s14 = scalar_lea.vmem %s2499_s1, %s1863_s10  ;;  %v1682_v5 = vld [vmem:[%s2065_s4 + $0x30] sm:$0xf]  ;;  %v1862_v6 = vld [vmem:[%s2065_s4 + $0x34] sm:$0xf0]  ;;  %v1670_v7 = vld [vmem:[%s2065_s4] sm:$0xf]  ;;  %v1679_v13 = vor.u32 %v1861_v4, %v1678_v3 }
  0x24   : > { %v254_v8 = vld [vmem:[%s2081_s14] sm:$0xf]  ;;  %v1695_v9 = vld [vmem:[%s2081_s14 + $0x8] sm:$0xf]  ;;  %v1717_v15 = vld [vmem:[%s2081_s14 + $0xc] sm:$0xf]  ;;  %v1683_v17 = vor.u32 %v1862_v6, %v1682_v5 }
  0x25   : > { %v1859_v10 = vld [vmem:[%s2065_s4 + $0x4] sm:$0xf0]  ;;  %v290_v11 = vsel %vm288_vm1, %v254_v8, 0  ;;  %v616_v14 = vsel %vm288_vm1, %v1695_v9, 0  ;;  %v1689_v16 = vld [vmem:[%s2081_s14 + $0x4] sm:$0xf] }
  0x26   : > { %1872 = vmatpush.bf16.msra.mxu1 %v290_v11  ;;  %1873 = vmatpush.bf16.msra.mxu2 %v290_v11  ;;  %v1671_v18 = vor.u32 %v1859_v10, %v1670_v7  ;;  %v701_v19 = vsel %vm288_vm1, %v1717_v15, 0  ;;  %v489_v20 = vsel %vm288_vm1, %v1689_v16, 0  ;;  %v1755_v21 = vld [vmem:[%s2081_s14 + $0x10] sm:$0xf]  ;;  %v329_v22 = vld [vmem:[%s2065_s4] sm:$0xf] }
  0x27   : > { %1874 = vmatpush.bf16.msra.mxu3 %v290_v11  ;;  %299 = vmatpush.bf16.msra.mxu0 %v290_v11  ;;  %v897_v23 = vsel %vm288_vm1, %v1755_v21, 0  ;;  %v330_v24 = vld [vmem:[%s2065_s4 + $0x4] sm:$0x1]  ;;  %v331_v25 = vld [vmem:[%s2065_s4 + $0x8] sm:$0xf]  ;;  %v353_v26 = vshrl.u32 %v329_v22, 16 }
  0x28   : > { %v332_v27 = vld [vmem:[%s2065_s4 + $0xc] sm:$0x1]  ;;  %vm349_vm4 = vsmask.f32 3328  ;;  %vm350_vm5 = vsmask.f32 7440 }
  0x29   : > { %1685 = vmatmul.msk.bf16.vlgmr.msra.gmra.mxu1 %vm275_vm2, %v1675_v12  ;;  %1686 = vmatmul.msk.bf16.vlgmr.msra.gmra.mxu2 %vm275_vm2, %v1679_v13  ;;  %v355_v28 = vrot.slane %v353_v26, 4  ;;  %v356_v29 = vshll.u32 %v329_v22, 16  ;;  %v362_v30 = vshll.u32 %v330_v24, 16  ;;  %v367_v31 = vshrl.u32 %v331_v25, 16  ;;  %v528_v32 = vld [vmem:[%s2065_s4] sm:$0xe]  ;;  %vm2121_vm8 = vmor %vm349_vm4, %vm350_vm5 }
  0x2a   : > { %625 = vmatpush.bf16.msrb.mxu2 %v616_v14  ;;  %1687 = vmatmul.msk.bf16.vlgmr.msra.gmra.mxu3 %vm275_vm2, %v1683_v17  ;;  %v370_v33 = vshll.u32 %v331_v25, 16  ;;  %v376_v34 = vshll.u32 %v332_v27, 16  ;;  %v529_v35 = vld [vmem:[%s2065_s4 + $0x8] sm:$0xe]  ;;  %vm557_vm6 = vcmask 1046532   ;;  %v1696_v36 = vrot.slane %v528_v32, 9 }
  0x2b   : > { %710 = vmatpush.bf16.msrb.mxu3 %v701_v19  ;;  %1684 = vmatmul.msk.bf16.vlgmr.msra.gmra.mxu0 %vm275_vm2, %v1671_v18  ;;  %v358_v37 = vrot.slane %v356_v29, 5  ;;  %v364_v38 = vrot.slane %v362_v30, 5  ;;  %v369_v39 = vrot.slane %v367_v31, 4  ;;  %vm2108_vm7 = vmor %vm556_vm3, %vm557_vm6  ;;  %v561_v41 = vrot.slane %v330_v24, 5  ;;  %v1791_v48 = vld [vmem:[%s2081_s14 + $0x18] sm:$0xf] }
  0x2c   : > { %498 = vmatpush.bf16.msrb.mxu1 %v489_v20  ;;  %906 = vmatpush.bf16.msrb.mxu0 %v897_v23  ;;  %v372_v42 = vrot.slane %v370_v33, 5  ;;  %v378_v43 = vrot.slane %v376_v34, 5  ;;  %v1697_v44 = vrot.slane %v529_v35, 9  ;;  %v565_v45 = vrot.slane %v332_v27, 5  ;;  %v1738_v49 = vld [vmem:[%s2065_s4 + $0x8] sm:$0xf] }
  0x2d   : > { %v359_v46 = vor.u32 %v358_v37, %v355_v28  ;;  %v562_v47 = vsel %vm2108_vm7, %v1696_v36, %v561_v41  ;;  %v2117_v50 = vld [vmem:[%s2065_s4 + $0xc] sm:$0x1]  ;;  %v1106_v55 = vsel %vm288_vm1, %v1791_v48, 0  ;;  %v1740_v56 = vld [vmem:[%s2065_s4 + $0x10] sm:$0xf]  ;;  %v761_v61 = vshrl.u32 %v1738_v49, 16 }
  0x2e   : > { %v373_v52 = vor.u32 %v372_v42, %v369_v39  ;;  %v566_v53 = vsel %vm2108_vm7, %v1697_v44, %v565_v45  ;;  %v591_v54 = vunpack.c.l.b16 %v562_v47  ;;  %v1720_v59 = vld [vmem:[%s2065_s4 + $0x8] sm:$0xf]  ;;  %v1864_v60 = vld [vmem:[%s2065_s4 + $0xc] sm:$0xf0]  ;;  %1115 = vmatpush.bf16.msra.mxu2 %v1106_v55  ;;  %v764_v62 = vshll.u32 %v1738_v49, 16  ;;  %p1856_p10 = scmp.ne.s32.totalorder %s1965_s12, 2 }
  0x2f   : > { %v360_v57 = vrot.slane %v359_v46, 4  ;;  %v592_v58 = vunpack.c.l.b16 %v566_v53  ;;  %v2132_v0 = vld [vmem:[%s2065_s4 + $0x14] sm:$0x1]  ;;  %v770_v1 = vshll.u32 %v2117_v50, 16  ;;  %v775_v2 = vshrl.u32 %v1740_v56, 16 }
  0x30   : > { %v374_v63 = vrot.slane %v373_v52, 4  ;;  %v778_v3 = vshll.u32 %v1740_v56, 16  ;;  %v763_v5 = vrot.slane %v761_v61, 4  ;;  %v766_v6 = vrot.slane %v764_v62, 5  ;;  %v1829_v7 = vld [vmem:[%s2081_s14 + $0x1c] sm:$0xf] }
  0x31   : > { %v365_v4 = vsel %vm2121_vm8, %v360_v57, %v364_v38  ;;  %v1769_v8 = vld [vmem:[%s2081_s14 + $0x14] sm:$0xf]  ;;  %v772_v11 = vrot.slane %v770_v1, 5  ;;  %v777_v12 = vrot.slane %v775_v2, 4  ;;  %v1843_v13 = vld [vmem:[%s2081_s14 + $0x20] sm:$0xf]  ;;  %v599_v20 = vpack.c.b16 %v592_v58, %v591_v54 }
  0x32   : > { %v379_v9 = vsel %vm2121_vm8, %v374_v63, %v378_v43  ;;  %v464_v10 = vunpack.c.l.b16 %v365_v4  ;;  %v767_v15 = vor.u32 %v766_v6, %v763_v5  ;;  %v780_v16 = vrot.slane %v778_v3, 5  ;;  %v333_v18 = vld [vmem:[%s2065_s4 + $0x10] sm:$0xf]  ;;  %v334_v19 = vld [vmem:[%s2065_s4 + $0x14] sm:$0x1] }
  0x33   : > { %v465_v14 = vunpack.c.l.b16 %v379_v9  ;;  %v784_v17 = vshll.u32 %v2132_v0, 16  ;;  %v1721_v21 = vor.u32 %v1864_v60, %v1720_v59  ;;  %v1302_v22 = vsel %vm288_vm1, %v1829_v7, 0  ;;  %v335_v24 = vld [vmem:[%s2065_s4 + $0x18] sm:$0xf]  ;;  %v336_v29 = vld [vmem:[%s2065_s4 + $0x1c] sm:$0x1] }
  0x34   : > { %v1021_v23 = vsel %vm288_vm1, %v1769_v8, 0  ;;  %v768_v26 = vrot.slane %v767_v15, 4  ;;  %v781_v27 = vor.u32 %v780_v16, %v777_v12  ;;  %1311 = vmatpush.bf16.msra.mxu3 %v1302_v22  ;;  %v1426_v30 = vsel %vm288_vm1, %v1843_v13, 0  ;;  %v530_v34 = vld [vmem:[%s2065_s4 + $0x10] sm:$0xe] }
  0x35   : > { %v472_v25 = vpack.c.b16 %v465_v14, %v464_v10  ;;  %v786_v28 = vrot.slane %v784_v17, 5  ;;  %1030 = vmatpush.bf16.msra.mxu1 %v1021_v23  ;;  %v381_v31 = vshrl.u32 %v333_v18, 16  ;;  %v384_v32 = vshll.u32 %v333_v18, 16  ;;  %1435 = vmatpush.bf16.msra.mxu0 %v1426_v30  ;;  %v531_v39 = vld [vmem:[%s2065_s4 + $0x18] sm:$0xe] }
  0x36   : > { %v390_v33 = vshll.u32 %v334_v19, 16  ;;  %v773_v35 = vsel %vm2121_vm8, %v768_v26, %v772_v11  ;;  %v782_v36 = vrot.slane %v781_v27, 4  ;;  %v395_v37 = vshrl.u32 %v335_v24, 16  ;;  %v2155_v45 = vld [vmem:[%s2065_s4 + $0x18] sm:$0xf] }
  0x37   : > { %v398_v38 = vshll.u32 %v335_v24, 16  ;;  %v872_v41 = vunpack.c.l.b16 %v773_v35  ;;  %v383_v42 = vrot.slane %v381_v31, 4  ;;  %v386_v43 = vrot.slane %v384_v32, 5  ;;  %v2162_v52 = vld [vmem:[%s2065_s4 + $0x1c] sm:$0xf0] }
  0x38   : > { %v392_v44 = vrot.slane %v390_v33, 5  ;;  %v787_v46 = vsel %vm2121_vm8, %v782_v36, %v786_v28  ;;  %v397_v47 = vrot.slane %v395_v37, 4  ;;  %v404_v49 = vshll.u32 %v336_v29, 16  ;;  %v1742_v57 = vld [vmem:[%s2065_s4 + $0x18] sm:$0xf] }
  0x39   : > { %1690 = vmatmul.msk.bf16.vlgmr.msrb.gmra.mxu1 %vm275_vm2, %v472_v25  ;;  %1704 = vmatmul.msk.bf16.vlgmr.msrb.gmra.mxu2 %vm275_vm2, %v599_v20  ;;  %v400_v48 = vrot.slane %v398_v38, 5  ;;  %v873_v53 = vunpack.c.l.b16 %v787_v46  ;;  %v387_v54 = vor.u32 %v386_v43, %v383_v42  ;;  %v1698_v55 = vrot.slane %v530_v34, 9  ;;  %v2167_v62 = vld [vmem:[%s2065_s4 + $0x1c] sm:$0x1]  ;;  %v1744_v4 = vld [vmem:[%s2065_s4 + $0x20] sm:$0xf] }
  0x3a   : > { %1734 = vmatmul.msk.bf16.vlgmr.msrb.gmra.mxu3 %vm275_vm2, %v1721_v21  ;;  %v569_v56 = vrot.slane %v334_v19, 5  ;;  %v406_v59 = vrot.slane %v404_v49, 5  ;;  %v1699_v60 = vrot.slane %v531_v39, 9  ;;  %v573_v61 = vrot.slane %v336_v29, 5  ;;  %v2180_v11 = vld [vmem:[%s2065_s4 + $0x24] sm:$0x1] }
  0x3b   : > { %v401_v58 = vor.u32 %v400_v48, %v397_v47  ;;  %v880_v63 = vpack.c.b16 %v873_v53, %v872_v41  ;;  %v388_v1 = vrot.slane %v387_v54, 4  ;;  %v1725_v3 = vor.u32 %v2162_v52, %v2155_v45  ;;  %v337_v14 = vld [vmem:[%s2065_s4 + $0x20] sm:$0xf]  ;;  %v338_v19 = vld [vmem:[%s2065_s4 + $0x24] sm:$0x1] }
  0x3c   : > { %v570_v2 = vsel %vm2108_vm7, %v1698_v55, %v569_v56  ;;  %v574_v6 = vsel %vm2108_vm7, %v1699_v60, %v573_v61  ;;  %v789_v8 = vshrl.u32 %v1742_v57, 16  ;;  %v792_v12 = vshll.u32 %v1742_v57, 16  ;;  %v339_v24 = vld [vmem:[%s2065_s4 + $0x28] sm:$0xf]  ;;  %v340_v31 = vld [vmem:[%s2065_s4 + $0x2c] sm:$0x1] }
  0x3d   : > { %v402_v5 = vrot.slane %v401_v58, 4  ;;  %v593_v7 = vunpack.c.l.b16 %v570_v2  ;;  %1756 = vmatmul.msk.bf16.vlgmr.msrb.gmra.mxu0 %vm275_vm2, %v880_v63  ;;  %v393_v9 = vsel %vm2121_vm8, %v388_v1, %v392_v44  ;;  %v594_v10 = vunpack.c.l.b16 %v574_v6  ;;  %v532_v34 = vld [vmem:[%s2065_s4 + $0x20] sm:$0xe]  ;;  %v533_v44 = vld [vmem:[%s2065_s4 + $0x28] sm:$0xe] }
  0x3e   : > { %v798_v13 = vshll.u32 %v2167_v62, 16  ;;  %v466_v16 = vunpack.c.l.b16 %v393_v9  ;;  %v791_v17 = vrot.slane %v789_v8, 4  ;;  %v803_v18 = vshrl.u32 %v1744_v4, 16  ;;  %v1746_v57 = vld [vmem:[%s2065_s4 + $0x28] sm:$0xf] }
  0x3f   : > { %v407_v15 = vsel %vm2121_vm8, %v402_v5, %v406_v59  ;;  %v600_v21 = vpack.c.b16 %v594_v10, %v593_v7  ;;  %v794_v22 = vrot.slane %v792_v12, 5  ;;  %v806_v26 = vshll.u32 %v1744_v4, 16  ;;  %v2202_v6 = vld [vmem:[%s2065_s4 + $0x2c] sm:$0x1]  ;;  %v1748_v7 = vld [vmem:[%s2065_s4 + $0x30] sm:$0xf] }
  0x40   : > { %v467_v20 = vunpack.c.l.b16 %v407_v15  ;;  %v800_v23 = vrot.slane %v798_v13, 5  ;;  %v805_v25 = vrot.slane %v803_v18, 4  ;;  %v812_v27 = vshll.u32 %v2180_v11, 16 }
  0x41   : > { %v409_v28 = vshrl.u32 %v337_v14, 16  ;;  %v795_v30 = vor.u32 %v794_v22, %v791_v17  ;;  %v412_v32 = vshll.u32 %v337_v14, 16  ;;  %v418_v33 = vshll.u32 %v338_v19, 16  ;;  %v2214_v14 = vld [vmem:[%s2065_s4 + $0x34] sm:$0x1] }
  0x42   : > { %v473_v29 = vpack.c.b16 %v467_v20, %v466_v16  ;;  %v808_v35 = vrot.slane %v806_v26, 5  ;;  %v814_v36 = vrot.slane %v812_v27, 5  ;;  %v423_v38 = vshrl.u32 %v339_v24, 16  ;;  %v341_v17 = vld [vmem:[%s2065_s4 + $0x30] sm:$0xf] }
  0x43   : > { %v411_v37 = vrot.slane %v409_v28, 4  ;;  %v796_v39 = vrot.slane %v795_v30, 4  ;;  %v414_v41 = vrot.slane %v412_v32, 5  ;;  %v420_v42 = vrot.slane %v418_v33, 5  ;;  %v1728_v28 = vld [vmem:[%s2065_s4 + $0x28] sm:$0xf] }
  0x44   : > { %v426_v43 = vshll.u32 %v339_v24, 16  ;;  %v809_v46 = vor.u32 %v808_v35, %v805_v25  ;;  %v425_v47 = vrot.slane %v423_v38, 4  ;;  %v432_v48 = vshll.u32 %v340_v31, 16  ;;  %v342_v35 = vld [vmem:[%s2065_s4 + $0x34] sm:$0x1] }
  0x45   : > { %v1700_v49 = vrot.slane %v532_v34, 9  ;;  %v801_v53 = vsel %vm2121_vm8, %v796_v39, %v800_v23  ;;  %v415_v54 = vor.u32 %v414_v41, %v411_v37  ;;  %v577_v56 = vrot.slane %v338_v19, 5  ;;  %v343_v23 = vld [vmem:[%s2065_s4 + $0x38] sm:$0xf]  ;;  %v1866_v38 = vld [vmem:[%s2065_s4 + $0x2c] sm:$0xf0] }
  0x46   : > { %v428_v55 = vrot.slane %v426_v43, 5  ;;  %v810_v58 = vrot.slane %v809_v46, 4  ;;  %v1701_v59 = vrot.slane %v533_v44, 9  ;;  %v874_v60 = vunpack.c.l.b16 %v801_v53  ;;  %v344_v44 = vld [vmem:[%s2065_s4 + $0x3c] sm:$0x1] }
  0x47   : > { %v416_v61 = vrot.slane %v415_v54, 4  ;;  %v581_v1 = vrot.slane %v340_v31, 5  ;;  %v434_v4 = vrot.slane %v432_v48, 5  ;;  %v578_v5 = vsel %vm2108_vm7, %v1700_v49, %v577_v56  ;;  %v1750_v54 = vld [vmem:[%s2065_s4 + $0x38] sm:$0xf] }
  0x48   : > { %v429_v63 = vor.u32 %v428_v55, %v425_v47  ;;  %v815_v2 = vsel %vm2121_vm8, %v810_v58, %v814_v36  ;;  %v817_v8 = vshrl.u32 %v1746_v57, 16  ;;  %v820_v16 = vshll.u32 %v1746_v57, 16 }
  0x49   : > { %1691 = vmatmul.msk.bf16.gmra.mxu1 %vm275_vm2, %v473_v29  ;;  %1705 = vmatmul.msk.bf16.gmra.mxu2 %vm275_vm2, %v600_v21  ;;  %v875_v9 = vunpack.c.l.b16 %v815_v2  ;;  %v421_v10 = vsel %vm2121_vm8, %v416_v61, %v420_v42  ;;  %v582_v13 = vsel %vm2108_vm7, %v1701_v59, %v581_v1  ;;  %v595_v19 = vunpack.c.l.b16 %v578_v5  ;;  %v534_v61 = vld [vmem:[%s2065_s4 + $0x30] sm:$0xe]  ;;  %v1752_v5 = vld [vmem:[%s2065_s4 + $0x40] sm:$0xf] }
  0x4a   : > { %1735 = vmatmul.msk.bf16.gmra.mxu3 %vm275_vm2, %v1725_v3  ;;  %v430_v12 = vrot.slane %v429_v63, 4  ;;  %v819_v15 = vrot.slane %v817_v8, 4  ;;  %v826_v45 = vshll.u32 %v2202_v6, 16  ;;  %v831_v52 = vshrl.u32 %v1748_v7, 16  ;;  %v535_v63 = vld [vmem:[%s2065_s4 + $0x38] sm:$0xe] }
  0x4b   : > { %v881_v18 = vpack.c.b16 %v875_v9, %v874_v60  ;;  %v468_v20 = vunpack.c.l.b16 %v421_v10  ;;  %v822_v21 = vrot.slane %v820_v16, 5  ;;  %v834_v22 = vshll.u32 %v1748_v7, 16  ;;  %v2236_v9 = vld [vmem:[%s2065_s4 + $0x3c] sm:$0x1]  ;;  %v2239_v16 = vld [vmem:[%s2065_s4 + $0x44] sm:$0x1] }
  0x4c   : > { %v435_v3 = vsel %vm2121_vm8, %v430_v12, %v434_v4  ;;  %v596_v24 = vunpack.c.l.b16 %v582_v13  ;;  %v833_v25 = vrot.slane %v831_v52, 4  ;;  %v840_v26 = vshll.u32 %v2214_v14, 16 }
  0x4d   : > { %1757 = vmatmul.msk.bf16.gmra.mxu0 %vm275_vm2, %v881_v18  ;;  %v437_v27 = vshrl.u32 %v341_v17, 16  ;;  %v823_v29 = vor.u32 %v822_v21, %v819_v15  ;;  %v828_v30 = vrot.slane %v826_v45, 5  ;;  %v836_v31 = vrot.slane %v834_v22, 5 }
  0x4e   : > { %v440_v32 = vshll.u32 %v341_v17, 16  ;;  %v469_v33 = vunpack.c.l.b16 %v435_v3  ;;  %v842_v34 = vrot.slane %v840_v26, 5  ;;  %v451_v37 = vshrl.u32 %v343_v23, 16  ;;  %v1812_v26 = vld [vmem:[%s2065_s4 + $0x10] sm:$0xf] }
  0x4f   : > { %v439_v36 = vrot.slane %v437_v27, 4  ;;  %v824_v39 = vrot.slane %v823_v29, 4  ;;  %v837_v41 = vor.u32 %v836_v31, %v833_v25  ;;  %v454_v43 = vshll.u32 %v343_v23, 16 }
  0x50   : > { %v442_v42 = vrot.slane %v440_v32, 5  ;;  %v453_v46 = vrot.slane %v451_v37, 4  ;;  %v446_v49 = vshll.u32 %v342_v35, 16  ;;  %v1729_v55 = vor.u32 %v1866_v38, %v1728_v28  ;;  %v1814_v32 = vld [vmem:[%s2065_s4 + $0x18] sm:$0xf] }
  0x51   : > { %v829_v47 = vsel %vm2121_vm8, %v824_v39, %v828_v30  ;;  %v838_v48 = vrot.slane %v837_v41, 4  ;;  %v456_v53 = vrot.slane %v454_v43, 5  ;;  %v474_v57 = vpack.c.b16 %v469_v33, %v468_v20 }
  0x52   : > { %v443_v56 = vor.u32 %v442_v42, %v439_v36  ;;  %v601_v58 = vpack.c.b16 %v596_v24, %v595_v19  ;;  %v460_v60 = vshll.u32 %v344_v44, 16  ;;  %v876_v1 = vunpack.c.l.b16 %v829_v47 }
  0x53   : > { %v843_v59 = vsel %vm2121_vm8, %v838_v48, %v842_v34  ;;  %v457_v4 = vor.u32 %v456_v53, %v453_v46  ;;  %v845_v7 = vshrl.u32 %v1750_v54, 16  ;;  %v448_v8 = vrot.slane %v446_v49, 5 }
  0x54   : > { %v877_v2 = vunpack.c.l.b16 %v843_v59  ;;  %v444_v10 = vrot.slane %v443_v56, 4  ;;  %v1702_v12 = vrot.slane %v534_v61, 9  ;;  %v585_v13 = vrot.slane %v342_v35, 5  ;;  %v1815_v61 = vld [vmem:[%s2065_s4 + $0x1c] sm:$0x1] }
  0x55   : > { %v1703_v15 = vrot.slane %v535_v63, 9  ;;  %v589_v17 = vrot.slane %v344_v44, 5  ;;  %v847_v18 = vrot.slane %v845_v7, 4  ;;  %v848_v19 = vshll.u32 %v1750_v54, 16  ;;  %v1732_v54 = vld [vmem:[%s2065_s4 + $0x38] sm:$0xf] }
  0x56   : > { %v859_v45 = vshrl.u32 %v1752_v5, 16  ;;  %v882_v52 = vpack.c.b16 %v877_v2, %v876_v1  ;;  %v458_v3 = vrot.slane %v457_v4, 4  ;;  %v462_v20 = vrot.slane %v460_v60, 5  ;;  %v1813_v60 = vld [vmem:[%s2065_s4 + $0x14] sm:$0x1] }
  0x57   : > { %v862_v21 = vshll.u32 %v1752_v5, 16  ;;  %v850_v22 = vrot.slane %v848_v19, 5  ;;  %v854_v23 = vshll.u32 %v2236_v9, 16  ;;  %v868_v25 = vshll.u32 %v2239_v16, 16  ;;  %v1760_v7 = vld [vmem:[%s2065_s4 + $0x8] sm:$0xe] }
  0x58   : > { %v861_v24 = vrot.slane %v859_v45, 4  ;;  %v449_v28 = vsel %vm2121_vm8, %v444_v10, %v448_v8  ;;  %v586_v29 = vsel %vm2108_vm7, %v1702_v12, %v585_v13  ;;  %v590_v30 = vsel %vm2108_vm7, %v1703_v15, %v589_v17  ;;  %v1761_v8 = vld [vmem:[%s2065_s4 + $0x10] sm:$0xe] }
  0x59   : > { %1692 = vmatmul.msk.bf16.gmra.mxu1 %vm275_vm2, %v474_v57  ;;  %1706 = vmatmul.msk.bf16.gmra.mxu2 %vm275_vm2, %v601_v58  ;;  %v864_v27 = vrot.slane %v862_v21, 5  ;;  %v851_v31 = vor.u32 %v850_v22, %v847_v18  ;;  %v463_v33 = vsel %vm2121_vm8, %v458_v3, %v462_v20  ;;  %v1166_v35 = vshrl.u32 %v1812_v26, 16  ;;  %v1834_v3 = vld [vmem:[%s2065_s4 + $0x10] sm:$0xe]  ;;  %v1835_v20 = vld [vmem:[%s2065_s4 + $0x18] sm:$0xe] }
  0x5a   : > { %1736 = vmatmul.msk.bf16.gmra.mxu3 %vm275_vm2, %v1729_v55  ;;  %v1169_v36 = vshll.u32 %v1812_v26, 16  ;;  %v856_v38 = vrot.slane %v854_v23, 5  ;;  %v870_v39 = vrot.slane %v868_v25, 5  ;;  %v1180_v42 = vshrl.u32 %v1814_v32, 16  ;;  %v1867_v55 = vld [vmem:[%s2065_s4 + $0x3c] sm:$0xf0] }
  0x5b   : > { %v865_v34 = vor.u32 %v864_v27, %v861_v24  ;;  %v852_v37 = vrot.slane %v851_v31, 4  ;;  %v1183_v43 = vshll.u32 %v1814_v32, 16  ;;  %v470_v44 = vunpack.c.l.b16 %v449_v28  ;;  %v1816_v25 = vld [vmem:[%s2065_s4 + $0x20] sm:$0xf]  ;;  %v1818_v26 = vld [vmem:[%s2065_s4 + $0x28] sm:$0xf] }
  0x5c   : > { %v471_v46 = vunpack.c.l.b16 %v463_v33  ;;  %v597_v47 = vunpack.c.l.b16 %v586_v29  ;;  %v598_v48 = vunpack.c.l.b16 %v590_v30  ;;  %v1168_v49 = vrot.slane %v1166_v35, 4 }
  0x5d   : > { %1758 = vmatmul.msk.bf16.gmra.mxu0 %vm275_vm2, %v882_v52  ;;  %v866_v41 = vrot.slane %v865_v34, 4  ;;  %v1171_v53 = vrot.slane %v1169_v36, 5  ;;  %v857_v56 = vsel %vm2121_vm8, %v852_v37, %v856_v38  ;;  %v1182_v58 = vrot.slane %v1180_v42, 4  ;;  %v1868_v42 = vld [vmem:[%s2065_s4 + $0x14] sm:$0xf0] }
  0x5e   : > { %v1185_v59 = vrot.slane %v1183_v43, 5  ;;  %v475_v63 = vpack.c.b16 %v471_v46, %v470_v44  ;;  %v602_v1 = vpack.c.b16 %v598_v48, %v597_v47  ;;  %v1733_v2 = vor.u32 %v1867_v55, %v1732_v54  ;;  %v1819_v55 = vld [vmem:[%s2065_s4 + $0x2c] sm:$0x1] }
  0x5f   : > { %v871_v57 = vsel %vm2121_vm8, %v866_v41, %v870_v39  ;;  %v878_v4 = vunpack.c.l.b16 %v857_v56  ;;  %v1172_v10 = vor.u32 %v1171_v53, %v1168_v49  ;;  %v1175_v12 = vshll.u32 %v1813_v60, 16  ;;  %v1794_v41 = vld [vmem:[%s2065_s4 + $0x10] sm:$0xf]  ;;  %v1817_v49 = vld [vmem:[%s2065_s4 + $0x24] sm:$0x1] }
  0x60   : > { %v879_v5 = vunpack.c.l.b16 %v871_v57  ;;  %v1186_v13 = vor.u32 %v1185_v59, %v1182_v58  ;;  %v1189_v15 = vshll.u32 %v1815_v61, 16  ;;  %v966_v17 = vrot.slane %v2117_v50, 5  ;;  %v1762_v59 = vld [vmem:[%s2065_s4 + $0x18] sm:$0xe] }
  0x61   : > { %v970_v18 = vrot.slane %v2132_v0, 5  ;;  %v1770_v19 = vrot.slane %v1760_v7, 9  ;;  %v1771_v45 = vrot.slane %v1761_v8, 9  ;;  %v1173_v21 = vrot.slane %v1172_v10, 4 }
  0x62   : > { %v883_v52 = vpack.c.b16 %v879_v5, %v878_v4  ;;  %v1177_v22 = vrot.slane %v1175_v12, 5  ;;  %v1187_v23 = vrot.slane %v1186_v13, 4  ;;  %v1191_v24 = vrot.slane %v1189_v15, 5  ;;  %v1836_v13 = vld [vmem:[%s2065_s4 + $0x20] sm:$0xe] }
  0x63   : > { %v967_v50 = vsel %vm2108_vm7, %v1770_v19, %v966_v17  ;;  %v971_v0 = vsel %vm2108_vm7, %v1771_v45, %v970_v18  ;;  %v1844_v27 = vrot.slane %v1834_v3, 9  ;;  %v1371_v28 = vrot.slane %v1813_v60, 5  ;;  %v1763_v60 = vld [vmem:[%s2065_s4 + $0x20] sm:$0xe]  ;;  %v1837_v19 = vld [vmem:[%s2065_s4 + $0x28] sm:$0xe] }
  0x64   : > { %v1845_v29 = vrot.slane %v1835_v20, 9  ;;  %v1375_v30 = vrot.slane %v1815_v61, 5  ;;  %v1194_v31 = vshrl.u32 %v1816_v25, 16  ;;  %v1197_v32 = vshll.u32 %v1816_v25, 16  ;;  %v1820_v45 = vld [vmem:[%s2065_s4 + $0x30] sm:$0xf] }
  0x65   : > { %v1178_v33 = vsel %vm2121_vm8, %v1173_v21, %v1177_v22  ;;  %v1192_v34 = vsel %vm2121_vm8, %v1187_v23, %v1191_v24  ;;  %v1208_v35 = vshrl.u32 %v1818_v26, 16  ;;  %v1211_v36 = vshll.u32 %v1818_v26, 16  ;;  %v1822_v20 = vld [vmem:[%s2065_s4 + $0x38] sm:$0xf] }
  0x66   : > { %v996_v37 = vunpack.c.l.b16 %v967_v50  ;;  %v997_v38 = vunpack.c.l.b16 %v971_v0  ;;  %v1372_v39 = vsel %vm2108_vm7, %v1844_v27, %v1371_v28  ;;  %v1277_v43 = vunpack.c.l.b16 %v1178_v33 }
  0x67   : > { %v1278_v44 = vunpack.c.l.b16 %v1192_v34  ;;  %v1196_v46 = vrot.slane %v1194_v31, 4  ;;  %v1199_v47 = vrot.slane %v1197_v32, 5  ;;  %v1376_v48 = vsel %vm2108_vm7, %v1845_v29, %v1375_v30  ;;  %v1798_v31 = vld [vmem:[%s2065_s4 + $0x20] sm:$0xf]  ;;  %v1869_v32 = vld [vmem:[%s2065_s4 + $0x24] sm:$0xf0] }
  0x68   : > { %v1210_v53 = vrot.slane %v1208_v35, 4  ;;  %v1213_v54 = vrot.slane %v1211_v36, 5  ;;  %v1004_v56 = vpack.c.b16 %v997_v38, %v996_v37  ;;  %v1795_v57 = vor.u32 %v1868_v42, %v1794_v41  ;;  %v1821_v38 = vld [vmem:[%s2065_s4 + $0x34] sm:$0x1] }
  0x69   : > { %1693 = vmatmul.msk.bf16.gmra.mxu1 %vm275_vm2, %v475_v63  ;;  %1707 = vmatmul.msk.bf16.gmra.mxu2 %vm275_vm2, %v602_v1  ;;  %v1401_v58 = vunpack.c.l.b16 %v1372_v39  ;;  %v1285_v61 = vpack.c.b16 %v1278_v44, %v1277_v43  ;;  %v1402_v63 = vunpack.c.l.b16 %v1376_v48  ;;  %v1200_v1 = vor.u32 %v1199_v47, %v1196_v46  ;;  %v1823_v43 = vld [vmem:[%s2065_s4 + $0x3c] sm:$0x1] }
  0x6a   : > { %1737 = vmatmul.msk.bf16.gmra.mxu3 %vm275_vm2, %v1733_v2  ;;  %v1203_v2 = vshll.u32 %v1817_v49, 16  ;;  %v1214_v4 = vor.u32 %v1213_v54, %v1210_v53  ;;  %v1217_v5 = vshll.u32 %v1819_v55, 16  ;;  %v1772_v7 = vrot.slane %v1762_v59, 9 }
  0x6b   : > { %v974_v8 = vrot.slane %v2167_v62, 5  ;;  %v1773_v10 = vrot.slane %v1763_v60, 9  ;;  %v978_v12 = vrot.slane %v2180_v11, 5  ;;  %v1409_v15 = vpack.c.b16 %v1402_v63, %v1401_v58 }
  0x6c   : > { %v1201_v17 = vrot.slane %v1200_v1, 4  ;;  %v1205_v18 = vrot.slane %v1203_v2, 5  ;;  %v1219_v3 = vrot.slane %v1217_v5, 5  ;;  %v1846_v21 = vrot.slane %v1836_v13, 9  ;;  %v1826_v13 = vld [vmem:[%s2065_s4 + $0x48] sm:$0xf] }
  0x6d   : > { %1759 = vmatmul.msk.bf16.gmra.mxu0 %vm275_vm2, %v883_v52  ;;  %v1215_v52 = vrot.slane %v1214_v4, 4  ;;  %v975_v62 = vsel %vm2108_vm7, %v1772_v7, %v974_v8  ;;  %v979_v11 = vsel %vm2108_vm7, %v1773_v10, %v978_v12  ;;  %v1379_v22 = vrot.slane %v1817_v49, 5  ;;  %v1764_v49 = vld [vmem:[%s2065_s4 + $0x28] sm:$0xe]  ;;  %v1838_v8 = vld [vmem:[%s2065_s4 + $0x30] sm:$0xe] }
  0x6e   : > { %v1847_v23 = vrot.slane %v1837_v19, 9  ;;  %v1383_v24 = vrot.slane %v1819_v55, 5  ;;  %v1222_v25 = vshrl.u32 %v1820_v45, 16  ;;  %v1206_v26 = vsel %vm2121_vm8, %v1201_v17, %v1205_v18  ;;  %v1765_v55 = vld [vmem:[%s2065_s4 + $0x30] sm:$0xe] }
  0x6f   : > { %v1225_v50 = vshll.u32 %v1820_v45, 16  ;;  %v1236_v0 = vshrl.u32 %v1822_v20, 16  ;;  %v1239_v27 = vshll.u32 %v1822_v20, 16  ;;  %v1220_v28 = vsel %vm2121_vm8, %v1215_v52, %v1219_v3  ;;  %v1839_v10 = vld [vmem:[%s2065_s4 + $0x38] sm:$0xe] }
  0x70   : > { %v998_v29 = vunpack.c.l.b16 %v975_v62  ;;  %v999_v30 = vunpack.c.l.b16 %v979_v11  ;;  %v1279_v33 = vunpack.c.l.b16 %v1206_v26  ;;  %v1380_v34 = vsel %vm2108_vm7, %v1846_v21, %v1379_v22  ;;  %v1824_v12 = vld [vmem:[%s2065_s4 + $0x40] sm:$0xf] }
  0x71   : > { %v1384_v35 = vsel %vm2108_vm7, %v1847_v23, %v1383_v24  ;;  %v1224_v36 = vrot.slane %v1222_v25, 4  ;;  %v1280_v37 = vunpack.c.l.b16 %v1220_v28  ;;  %v1227_v39 = vrot.slane %v1225_v50, 5  ;;  %v1802_v23 = vld [vmem:[%s2065_s4 + $0x30] sm:$0xf]  ;;  %v1870_v24 = vld [vmem:[%s2065_s4 + $0x34] sm:$0xf0] }
  0x72   : > { %v1238_v41 = vrot.slane %v1236_v0, 4  ;;  %v1241_v42 = vrot.slane %v1239_v27, 5  ;;  %v1799_v44 = vor.u32 %v1869_v32, %v1798_v31  ;;  %v1005_v46 = vpack.c.b16 %v999_v30, %v998_v29  ;;  %v1825_v31 = vld [vmem:[%s2065_s4 + $0x44] sm:$0x1]  ;;  %v1827_v32 = vld [vmem:[%s2065_s4 + $0x4c] sm:$0x1] }
  0x73   : > { %v1403_v47 = vunpack.c.l.b16 %v1380_v34  ;;  %v1404_v48 = vunpack.c.l.b16 %v1384_v35  ;;  %v1231_v53 = vshll.u32 %v1821_v38, 16  ;;  %v1286_v54 = vpack.c.b16 %v1280_v37, %v1279_v33 }
  0x74   : > { %v1245_v58 = vshll.u32 %v1823_v43, 16  ;;  %v1774_v59 = vrot.slane %v1764_v49, 9  ;;  %v1775_v63 = vrot.slane %v1765_v55, 9  ;;  %v986_v1 = vrot.slane %v2214_v14, 5 }
  0x75   : > { %v1410_v60 = vpack.c.b16 %v1404_v48, %v1403_v47  ;;  %v1233_v4 = vrot.slane %v1231_v53, 5  ;;  %v1848_v17 = vrot.slane %v1838_v8, 9  ;;  %v1387_v14 = vrot.slane %v1821_v38, 5  ;;  %v1766_v38 = vld [vmem:[%s2065_s4 + $0x38] sm:$0xe] }
  0x76   : > { %v1247_v7 = vrot.slane %v1245_v58, 5  ;;  %v1849_v45 = vrot.slane %v1839_v10, 9  ;;  %v1391_v52 = vrot.slane %v1823_v43, 5  ;;  %v1250_v3 = vshrl.u32 %v1824_v12, 16  ;;  %v1840_v58 = vld [vmem:[%s2065_s4 + $0x40] sm:$0xe] }
  0x77   : > { %v1253_v20 = vshll.u32 %v1824_v12, 16  ;;  %v1264_v62 = vshrl.u32 %v1826_v13, 16  ;;  %v1267_v11 = vshll.u32 %v1826_v13, 16  ;;  %v1388_v50 = vsel %vm2108_vm7, %v1848_v17, %v1387_v14  ;;  %v1806_v8 = vld [vmem:[%s2065_s4 + $0x40] sm:$0xf] }
  0x78   : > { %v1392_v0 = vsel %vm2108_vm7, %v1849_v45, %v1391_v52  ;;  %v1252_v27 = vrot.slane %v1250_v3, 4  ;;  %v1803_v34 = vor.u32 %v1870_v24, %v1802_v23  ;;  %v1405_v35 = vunpack.c.l.b16 %v1388_v50  ;;  %v1871_v10 = vld [vmem:[%s2065_s4 + $0x44] sm:$0xf0] }
  0x79   : > { %1778 = vmatmul.msk.bf16.vlgmr.msra.gmra.mxu1 %vm275_vm2, %v1004_v56  ;;  %1808 = vmatmul.msk.bf16.vlgmr.msra.gmra.mxu2 %vm275_vm2, %v1795_v57  ;;  %v1228_v56 = vor.u32 %v1227_v39, %v1224_v36  ;;  %v1242_v57 = vor.u32 %v1241_v42, %v1238_v41  ;;  %v1255_v28 = vrot.slane %v1253_v20, 5  ;;  %v1266_v29 = vrot.slane %v1264_v62, 4  ;;  %v1767_v39 = vld [vmem:[%s2065_s4 + $0x40] sm:$0xe] }
  0x7a   : > { %1830 = vmatmul.msk.bf16.vlgmr.msra.gmra.mxu3 %vm275_vm2, %v1285_v61  ;;  %v982_v61 = vrot.slane %v2202_v6, 5  ;;  %v987_v6 = vsel %vm2108_vm7, %v1775_v63, %v986_v1  ;;  %v1269_v30 = vrot.slane %v1267_v11, 5  ;;  %v1406_v36 = vunpack.c.l.b16 %v1392_v0 }
  0x7b   : > { %v1229_v2 = vrot.slane %v1228_v56, 4  ;;  %v1243_v5 = vrot.slane %v1242_v57, 4  ;;  %v1001_v22 = vunpack.c.l.b16 %v987_v6  ;;  %v1256_v41 = vor.u32 %v1255_v28, %v1252_v27 }
  0x7c   : > { %v1259_v42 = vshll.u32 %v1825_v31, 16  ;;  %v1270_v43 = vor.u32 %v1269_v30, %v1266_v29  ;;  %v1776_v47 = vrot.slane %v1766_v38, 9  ;;  %v990_v48 = vrot.slane %v2236_v9, 5 }
  0x7d   : > { %1852 = vmatmul.msk.bf16.vlgmr.msra.gmra.mxu0 %vm275_vm2, %v1409_v15  ;;  %v983_v15 = vsel %vm2108_vm7, %v1774_v59, %v982_v61  ;;  %v1234_v18 = vsel %vm2121_vm8, %v1229_v2, %v1233_v4  ;;  %v1248_v19 = vsel %vm2121_vm8, %v1243_v5, %v1247_v7  ;;  %v1777_v49 = vrot.slane %v1767_v39, 9  ;;  %v1841_v59 = vld [vmem:[%s2065_s4 + $0x48] sm:$0xe] }
  0x7e   : > { %v1000_v21 = vunpack.c.l.b16 %v983_v15  ;;  %v1281_v25 = vunpack.c.l.b16 %v1234_v18  ;;  %v1282_v26 = vunpack.c.l.b16 %v1248_v19  ;;  %v994_v53 = vrot.slane %v2239_v16, 5 }
  0x7f   : > { %v1261_v55 = vrot.slane %v1259_v42, 5  ;;  %v1271_v56 = vrot.slane %v1270_v43, 4  ;;  %v1850_v9 = vrot.slane %v1840_v58, 9  ;;  %v1395_v63 = vrot.slane %v1825_v31, 5 }
  0x80   : > { %v1006_v33 = vpack.c.b16 %v1001_v22, %v1000_v21  ;;  %v1287_v37 = vpack.c.b16 %v1282_v26, %v1281_v25  ;;  %v995_v61 = vsel %vm2108_vm7, %v1777_v49, %v994_v53  ;;  %v1851_v2 = vrot.slane %v1841_v59, 9  ;;  %v236_v59 = vld [vmem:[#allocation2 + $0x8] sm:$0xff] }
  0x81   : > { %v1399_v4 = vrot.slane %v1827_v32, 5  ;;  %v1003_v7 = vunpack.c.l.b16 %v995_v61  ;;  %v1396_v15 = vsel %vm2108_vm7, %v1850_v9, %v1395_v63  ;;  %v1807_v14 = vor.u32 %v1871_v10, %v1806_v8 }
  0x82   : > { %v1407_v19 = vunpack.c.l.b16 %v1396_v15 }
  0x83   : > { %v1400_v6 = vsel %vm2108_vm7, %v1851_v2, %v1399_v4 }
  0x84   : > { %v1408_v45 = vunpack.c.l.b16 %v1400_v6 }
  0x86   : > { %v1412_v3 = vpack.c.b16 %v1408_v45, %v1407_v19 }
  0x89   : > { %1779 = vmatmul.msk.bf16.gmra.mxu1 %vm275_vm2, %v1005_v46  ;;  %1809 = vmatmul.msk.bf16.gmra.mxu2 %vm275_vm2, %v1799_v44  ;;  %v1273_v44 = vshll.u32 %v1827_v32, 16  ;;  %v1411_v46 = vpack.c.b16 %v1406_v36, %v1405_v35 }
  0x8a   : > { %1831 = vmatmul.msk.bf16.gmra.mxu3 %vm275_vm2, %v1286_v54  ;;  %v1257_v54 = vrot.slane %v1256_v41, 4 }
  0x8b   : > { %v1275_v57 = vrot.slane %v1273_v44, 5 }
  0x8c   : > { %v1262_v16 = vsel %vm2121_vm8, %v1257_v54, %v1261_v55 }
  0x8d   : > { %1853 = vmatmul.msk.bf16.gmra.mxu0 %vm275_vm2, %v1410_v60  ;;  %v991_v60 = vsel %vm2108_vm7, %v1776_v47, %v990_v48  ;;  %v1276_v1 = vsel %vm2121_vm8, %v1271_v56, %v1275_v57  ;;  %v1283_v12 = vunpack.c.l.b16 %v1262_v16  ;;  %v235_v48 = vld [vmem:[#allocation2] sm:$0xff] }
  0x8e   : > { %v1002_v5 = vunpack.c.l.b16 %v991_v60  ;;  %v1284_v13 = vunpack.c.l.b16 %v1276_v1 }
  0x90   : > { %v1007_v17 = vpack.c.b16 %v1003_v7, %v1002_v5  ;;  %v1288_v51 = vpack.c.b16 %v1284_v13, %v1283_v12  ;;  %v237_v7 = vld [vmem:[#allocation2 + $0x10] sm:$0xff] }
  0x99   : > { %1780 = vmatmul.msk.bf16.gmra.mxu1 %vm275_vm2, %v1006_v33  ;;  %1810 = vmatmul.msk.bf16.gmra.mxu2 %vm275_vm2, %v1803_v34 }
  0x9a   : > { %1832 = vmatmul.msk.bf16.gmra.mxu3 %vm275_vm2, %v1287_v37 }
  0x9d   : > { %1854 = vmatmul.msk.bf16.gmra.mxu0 %vm275_vm2, %v1411_v46 }
  0xa6   : > { %v2373_v18 = vpop.f32.mrf.mxu1 }
  0xa7   : > { %v323_v13 = vadd.f32 %v2373_v18, %v237_v7  ;;  %v240_v7 = vld [vmem:[#allocation2 + $0x28] sm:$0xff] }
  0xa8   : > { %v301_v52 = vpop.f32.mrf.mxu0 }
  0xa9   : > { %1781 = vmatmul.msk.bf16.gmra.mxu1 %vm275_vm2, %v1007_v17  ;;  %1811 = vmatmul.msk.bf16.gmra.mxu2 %vm275_vm2, %v1807_v14  ;;  %v321_v54 = vadd.f32 %v301_v52, %v235_v48 }
  0xaa   : > { %1833 = vmatmul.msk.bf16.gmra.mxu3 %vm275_vm2, %v1288_v51 }
  0xac   : > { %v2378_v20 = vpop.f32.mrf.mxu2 }
  0xad   : > { %v2380_v62 = vpop.f32.mrf.mxu3  ;;  %1855 = vmatmul.msk.bf16.gmra.mxu0 %vm275_vm2, %v1412_v3 }
  0xae   : > { %v2383_v40 = vpop.f32.mrf.mxu1 }
  0xb0   : > { %v303_v11 = vpop.f32.mrf.mxu0 }
  0xb1   : > { %v322_v9 = vadd.f32 %v303_v11, %v236_v59  ;;  %v238_v11 = vld [vmem:[#allocation2 + $0x18] sm:$0xff] }
  0xb4   : > { %v2385_v21 = vpop.f32.mrf.mxu2 }
  0xb5   : > { %v2387_v22 = vpop.f32.mrf.mxu3 }
  0xb6   : > { %v500_v23 = vpop.f32.mrf.mxu1 }
  0xb7   : > { %v520_v57 = vadd.f32 %v500_v23, %v321_v54 }
  0xba   : > { %v908_v24 = vpop.f32.mrf.mxu0 }
  0xbc   : > { %v627_v25 = vpop.f32.mrf.mxu2 }
  0xbd   : > { %v712_v26 = vpop.f32.mrf.mxu3  ;;  %v647_v58 = vadd.f32 %v627_v25, %v520_v57 }
  0xbe   : > { %v502_v50 = vpop.f32.mrf.mxu1 }
  0xbf   : > { %v732_v63 = vadd.f32 %v712_v26, %v647_v58  ;;  %v521_v2 = vadd.f32 %v502_v50, %v322_v9  ;;  %v324_v26 = vadd.f32 %v2383_v40, %v238_v11 }
  0xc1   : > { %v928_v5 = vadd.f32 %v908_v24, %v732_v63 }
  0xc2   : > { %v910_v0 = vpop.f32.mrf.mxu0 }
  0xc4   : > { %v629_v27 = vpop.f32.mrf.mxu2 }
  0xc5   : > { %v714_v28 = vpop.f32.mrf.mxu3  ;;  %v648_v4 = vadd.f32 %v629_v27, %v521_v2 }
  0xc6   : > { %v505_v29 = vpop.f32.mrf.mxu1 }
  0xc7   : > { %v733_v15 = vadd.f32 %v714_v28, %v648_v4  ;;  %v522_v51 = vadd.f32 %v505_v29, %v323_v13 }
  0xc9   : > { %v929_v3 = vadd.f32 %v910_v0, %v733_v15 }
  0xca   : > { %v913_v30 = vpop.f32.mrf.mxu0 }
  0xcc   : > { %v632_v31 = vpop.f32.mrf.mxu2 }
  0xcd   : > { %v717_v32 = vpop.f32.mrf.mxu3  ;;  %v649_v45 = vadd.f32 %v632_v31, %v522_v51  ;;  %v239_v31 = vld [vmem:[#allocation2 + $0x20] sm:$0xff]  ;;  %v241_v51 = vld [vmem:[#allocation2 + $0x30] sm:$0xff] }
  0xce   : > { %v507_v33 = vpop.f32.mrf.mxu1  ;;  %v325_v63 = vadd.f32 %v2378_v20, %v239_v31  ;;  %v326_v20 = vadd.f32 %v2385_v21, %v240_v7  ;;  %v327_v21 = vadd.f32 %v2380_v62, %v241_v51 }
  0xcf   : > { %v734_v50 = vadd.f32 %v717_v32, %v649_v45  ;;  %v523_v48 = vadd.f32 %v507_v33, %v324_v26  ;;  %v242_v26 = vld [vmem:[#allocation2 + $0x38] sm:$0xff] }
  0xd0   : > { %v328_v62 = vadd.f32 %v2387_v22, %v242_v26 }
  0xd1   : > { %v930_v58 = vadd.f32 %v913_v30, %v734_v50 }
  0xd2   : > { %v2389_v34 = vpop.f32.mrf.mxu0 }
  0xd4   : > { %v634_v35 = vpop.f32.mrf.mxu2 }
  0xd5   : > { %v2391_v36 = vpop.f32.mrf.mxu3  ;;  %v650_v57 = vadd.f32 %v634_v35, %v523_v48 }
  0xd6   : > { %v2393_v37 = vpop.f32.mrf.mxu1 }
  0xd7   : > { %v524_v4 = vadd.f32 %v2393_v37, %v325_v63 }
  0xda   : > { %v2395_v38 = vpop.f32.mrf.mxu0 }
  0xdc   : > { %v2397_v39 = vpop.f32.mrf.mxu2 }
  0xdd   : > { %v2399_v41 = vpop.f32.mrf.mxu3  ;;  %v651_v35 = vadd.f32 %v2397_v39, %v524_v4 }
  0xde   : > { %v2401_v42 = vpop.f32.mrf.mxu1 }
  0xdf   : > { %v525_v37 = vadd.f32 %v2401_v42, %v326_v20 }
  0xe2   : > { %v2403_v43 = vpop.f32.mrf.mxu0 }
  0xe4   : > { %v2405_v44 = vpop.f32.mrf.mxu2 }
  0xe5   : > { %v2407_v46 = vpop.f32.mrf.mxu3  ;;  %v652_v39 = vadd.f32 %v2405_v44, %v525_v37 }
  0xe6   : > { %v2409_v47 = vpop.f32.mrf.mxu1 }
  0xe7   : > { %v526_v42 = vadd.f32 %v2409_v47, %v327_v21 }
  0xea   : > { %v2411_v49 = vpop.f32.mrf.mxu0 }
  0xec   : > { %v2413_v53 = vpop.f32.mrf.mxu2 }
  0xed   : > { %v2415_v55 = vpop.f32.mrf.mxu3  ;;  %v653_v44 = vadd.f32 %v2413_v53, %v526_v42 }
  0xee   : > { %v2417_v56 = vpop.f32.mrf.mxu1 }
  0xef   : > { %v527_v47 = vadd.f32 %v2417_v56, %v328_v62 }
  0xf2   : > { %v2419_v60 = vpop.f32.mrf.mxu0 }
  0xf4   : > { %v2421_v61 = vpop.f32.mrf.mxu2 }
  0xf5   : > { %v2423_v16 = vpop.f32.mrf.mxu3  ;;  %v654_v53 = vadd.f32 %v2421_v61, %v527_v47 }
  0xf6   : > { %v1032_v1 = vpop.f32.mrf.mxu1 }
  0xf7   : > { %v1052_v8 = vadd.f32 %v1032_v1, %v928_v5  ;;  %v735_v1 = vadd.f32 %v2391_v36, %v650_v57  ;;  %v736_v36 = vadd.f32 %v2399_v41, %v651_v35  ;;  %v737_v41 = vadd.f32 %v2407_v46, %v652_v39 }
  0xf8   : > { %v738_v46 = vadd.f32 %v2415_v55, %v653_v44 }
  0xf9   : > { %v931_v30 = vadd.f32 %v2389_v34, %v735_v1  ;;  %v932_v34 = vadd.f32 %v2395_v38, %v736_v36  ;;  %v933_v38 = vadd.f32 %v2403_v43, %v737_v41 }
  0xfa   : > { %v1437_v10 = vpop.f32.mrf.mxu0  ;;  %v934_v43 = vadd.f32 %v2411_v49, %v738_v46 }
  0xfc   : > { %v1117_v12 = vpop.f32.mrf.mxu2 }
  0xfd   : > { %v1137_v6 = vadd.f32 %v1117_v12, %v1052_v8  ;;  %v1313_v17 = vpop.f32.mrf.mxu3 }
  0xfe   : > { %v1034_v14 = vpop.f32.mrf.mxu1 }
  0xff   : > { %v1333_v19 = vadd.f32 %v1313_v17, %v1137_v6  ;;  %v1053_v23 = vadd.f32 %v1034_v14, %v929_v3 }
 0x101   : > { %v1457_v52 = vadd.f32 %v1437_v10, %v1333_v19 }
 0x102   : > { %v1439_v24 = vpop.f32.mrf.mxu0 }
 0x103   : > { %1465 = vst.msk [vmem:[#allocation2] sm:$0xff] %vm275_vm2, %v1457_v52 }
 0x104   : > { %v1119_v25 = vpop.f32.mrf.mxu2 }
 0x105   : > { %v1138_v27 = vadd.f32 %v1119_v25, %v1053_v23  ;;  %v1315_v18 = vpop.f32.mrf.mxu3 }
 0x106   : > { %v1037_v28 = vpop.f32.mrf.mxu1 }
 0x107   : > { %v1334_v54 = vadd.f32 %v1315_v18, %v1138_v27  ;;  %v1054_v0 = vadd.f32 %v1037_v28, %v930_v58 }
 0x109   : > { %v1458_v29 = vadd.f32 %v1439_v24, %v1334_v54 }
 0x10a   : > { %v1442_v59 = vpop.f32.mrf.mxu0 }
 0x10b   : > { %1466 = vst.msk [vmem:[#allocation2 + $0x8] sm:$0xff] %vm275_vm2, %v1458_v29 }
 0x10c   : > { %v1122_v9 = vpop.f32.mrf.mxu2 }
 0x10d   : > { %v1139_v40 = vadd.f32 %v1122_v9, %v1054_v0  ;;  %v1318_v32 = vpop.f32.mrf.mxu3  ;;  %v739_v0 = vadd.f32 %v2423_v16, %v654_v53 }
 0x10e   : > { %v1039_v2 = vpop.f32.mrf.mxu1 }
 0x10f   : > { %v1335_v33 = vadd.f32 %v1318_v32, %v1139_v40  ;;  %v1055_v8 = vadd.f32 %v1039_v2, %v931_v30  ;;  %v935_v56 = vadd.f32 %v2419_v60, %v739_v0 }
 0x111   : > { %v1459_v5 = vadd.f32 %v1442_v59, %v1335_v33 }
 0x112   : > { %v1444_v10 = vpop.f32.mrf.mxu0 }
 0x113   : > { %1467 = vst.msk [vmem:[#allocation2 + $0x10] sm:$0xff] %vm275_vm2, %v1459_v5 }
 0x114   : > { %v1124_v12 = vpop.f32.mrf.mxu2 }
 0x115   : > { %v1140_v13 = vadd.f32 %v1124_v12, %v1055_v8  ;;  %v1320_v15 = vpop.f32.mrf.mxu3 }
 0x116   : > { %v1042_v6 = vpop.f32.mrf.mxu1 }
 0x117   : > { %v1336_v17 = vadd.f32 %v1320_v15, %v1140_v13  ;;  %v1056_v19 = vadd.f32 %v1042_v6, %v932_v34 }
 0x119   : > { %v1460_v14 = vadd.f32 %v1444_v10, %v1336_v17 }
 0x11a   : > { %v1447_v45 = vpop.f32.mrf.mxu0 }
 0x11b   : > { %1468 = vst.msk [vmem:[#allocation2 + $0x18] sm:$0xff] %vm275_vm2, %v1460_v14 }
 0x11c   : > { %v1127_v52 = vpop.f32.mrf.mxu2 }
 0x11d   : > { %v1141_v3 = vadd.f32 %v1127_v52, %v1056_v19  ;;  %v1323_v11 = vpop.f32.mrf.mxu3 }
 0x11e   : > { %v1044_v23 = vpop.f32.mrf.mxu1 }
 0x11f   : > { %v1337_v24 = vadd.f32 %v1323_v11, %v1141_v3  ;;  %v1057_v50 = vadd.f32 %v1044_v23, %v933_v38 }
 0x121   : > { %v1461_v25 = vadd.f32 %v1447_v45, %v1337_v24 }
 0x122   : > { %v1449_v27 = vpop.f32.mrf.mxu0 }
 0x123   : > { %1469 = vst.msk [vmem:[#allocation2 + $0x20] sm:$0xff] %vm275_vm2, %v1461_v25 }
 0x124   : > { %v1129_v18 = vpop.f32.mrf.mxu2 }
 0x125   : > { %v1142_v28 = vadd.f32 %v1129_v18, %v1057_v50  ;;  %v1325_v48 = vpop.f32.mrf.mxu3 }
 0x126   : > { %v1047_v54 = vpop.f32.mrf.mxu1 }
 0x127   : > { %v1338_v57 = vadd.f32 %v1325_v48, %v1142_v28  ;;  %v1058_v58 = vadd.f32 %v1047_v54, %v934_v43 }
 0x129   : > { %v1462_v29 = vadd.f32 %v1449_v27, %v1338_v57 }
 0x12a   : > { %v1452_v55 = vpop.f32.mrf.mxu0 }
 0x12b   : > { %1470 = vst.msk [vmem:[#allocation2 + $0x28] sm:$0xff] %vm275_vm2, %v1462_v29 }
 0x12c   : > { %v1132_v31 = vpop.f32.mrf.mxu2 }
 0x12d   : > { %v1143_v22 = vadd.f32 %v1132_v31, %v1058_v58  ;;  %v1328_v59 = vpop.f32.mrf.mxu3 }
 0x12e   : > { %v1049_v63 = vpop.f32.mrf.mxu1 }
 0x12f   : > { %v1339_v9 = vadd.f32 %v1328_v59, %v1143_v22  ;;  %v1059_v61 = vadd.f32 %v1049_v63, %v935_v56 }
 0x131   : > { %v1463_v1 = vadd.f32 %v1452_v55, %v1339_v9 }
 0x132   : > { %v1454_v4 = vpop.f32.mrf.mxu0 }
 0x133   : > { %1471 = vst.msk [vmem:[#allocation2 + $0x30] sm:$0xff] %vm275_vm2, %v1463_v1 }
 0x134   : > { %v1134_v40 = vpop.f32.mrf.mxu2 }
 0x135   : > { %v1144_v32 = vadd.f32 %v1134_v40, %v1059_v61  ;;  %v1330_v49 = vpop.f32.mrf.mxu3 }
 0x137   : > { %v1340_v2 = vadd.f32 %v1330_v49, %v1144_v32  ;;  %1476 = sbr.rel (%p1856_p10) target bundleno = 332 (0x14c), region = 40 }
 0x139   : > { %v1464_v33 = vadd.f32 %v1454_v4, %v1340_v2 }
 0x13b   : > { %1472 = vst.msk [vmem:[#allocation2 + $0x38] sm:$0xff] %vm275_vm2, %v1464_v33 }
 0x13c   : > { %v1477_v16 = vld [vmem:[#allocation2] sm:$0xff]  ;;  %v1478_v60 = vld [vmem:[#allocation2 + $0x8] sm:$0xff]  ;;  %v1479_v5 = vld [vmem:[#allocation2 + $0x10] sm:$0xff]  ;;  %vm1513_vm9 = vcmask 60416  }
 0x13d   : > { %v1934_v35 = vld [vmem:[%s2500_s2] ss:$0 sm:$0xff]  ;;  %v1480_v30 = vld [vmem:[#allocation2 + $0x18] sm:$0xff]  ;;  %v1482_v36 = vld [vmem:[#allocation2 + $0x28] sm:$0xff] }
 0x13e   : > { %v1489_v7 = vadd.f32 %v1934_v35, %v1477_v16  ;;  %v1490_v8 = vadd.f32 %v1934_v35, %v1478_v60  ;;  %v1491_v10 = vadd.f32 %v1934_v35, %v1479_v5  ;;  %v1492_v12 = vadd.f32 %v1934_v35, %v1480_v30  ;;  %v1481_v20 = vld [vmem:[#allocation2 + $0x20] sm:$0xff]  ;;  %v1483_v13 = vld [vmem:[#allocation2 + $0x30] sm:$0xff] }
 0x13f   : > { %v1493_v15 = vadd.f32 %v1934_v35, %v1481_v20  ;;  %v1494_v6 = vadd.f32 %v1934_v35, %v1482_v36  ;;  %v1495_v37 = vadd.f32 %v1934_v35, %v1483_v13 }
 0x140   : > { %v1497_v39 = vmax.f32 %v1489_v7, 0.0  ;;  %v1498_v14 = vmax.f32 %v1490_v8, 0.0  ;;  %v1499_v34 = vmax.f32 %v1491_v10, 0.0  ;;  %v1500_v51 = vmax.f32 %v1492_v12, 0.0 }
 0x141   : > { %v1501_v19 = vmax.f32 %v1493_v15, 0.0  ;;  %v1502_v45 = vmax.f32 %v1494_v6, 0.0  ;;  %v1503_v11 = vmax.f32 %v1495_v37, 0.0 }
 0x142   : > { %v1484_v17 = vld [vmem:[#allocation2 + $0x38] sm:$0xff]  ;;  %v1505_v21 = vpack.c.bf16 %v1497_v39, %v1497_v39  ;;  %v1506_v41 = vpack.c.bf16 %v1498_v14, %v1498_v14  ;;  %v1507_v3 = vpack.c.bf16 %v1499_v34, %v1499_v34  ;;  %v1508_v23 = vpack.c.bf16 %v1500_v51, %v1500_v51 }
 0x143   : > { %v1496_v52 = vadd.f32 %v1934_v35, %v1484_v17  ;;  %v1509_v24 = vpack.c.bf16 %v1501_v19, %v1501_v19  ;;  %v1510_v44 = vpack.c.bf16 %v1502_v45, %v1502_v45  ;;  %v1511_v25 = vpack.c.bf16 %v1503_v11, %v1503_v11 }
 0x144   : > { %1514 = vst.msk [vmem:[%s2070_s9] sm:$0xf] %vm1513_vm9, %v1505_v21 }
 0x145   : > { %v1504_v42 = vmax.f32 %v1496_v52, 0.0  ;;  %1515 = vst.msk [vmem:[%s2070_s9 + $0x4] sm:$0xf] %vm1513_vm9, %v1506_v41 }
 0x146   : > { %1516 = vst.msk [vmem:[%s2070_s9 + $0x8] sm:$0xf] %vm1513_vm9, %v1507_v3 }
 0x147   : > { %1517 = vst.msk [vmem:[%s2070_s9 + $0xc] sm:$0xf] %vm1513_vm9, %v1508_v23  ;;  %v1512_v38 = vpack.c.bf16 %v1504_v42, %v1504_v42 }
 0x148   : > { %1518 = vst.msk [vmem:[%s2070_s9 + $0x10] sm:$0xf] %vm1513_vm9, %v1509_v24 }
 0x149   : > { %1519 = vst.msk [vmem:[%s2070_s9 + $0x14] sm:$0xf] %vm1513_vm9, %v1510_v44 }
 0x14a   : > { %1520 = vst.msk [vmem:[%s2070_s9 + $0x18] sm:$0xf] %vm1513_vm9, %v1511_v25 }
 0x14b   : > { %1521 = vst.msk [vmem:[%s2070_s9 + $0x1c] sm:$0xf] %vm1513_vm9, %v1512_v38 }
 0x14c PF: > { %s13_s18 = sadd.s32 1, %s1989_s18   ;;  %s2506_s12 = smov %s1977_s15 }
 0x14d   : > { %p10_p11 = scmp.ge.s32.totalorder %s13_s18, 26   ;;  %s2507_s13 = smov %s1981_s16 }
 0x14e   : > { %s2508_s14 = smov %s1985_s17  ;;  %s2509_s15 = smov %s2513_s19 }
 0x14f   : > { %s2510_s16 = smov %s2517_s20  ;;  %s2511_s17 = smov %s2521_s21 }
 0x150   :  { %12 = sbr.rel (!%p10_p11) target bundleno = 4 (0x4), region = 81 }

</bundles_post_ra>
